<compile_context>
chip_gen: v7x
topology: tpu7x:2x2x1
jax: 0.10.0
libtpu: 0.0.40
codegen_flags: <defaults>
</compile_context>

<pallas_src>
import functools

import jax
import jax.numpy as jnp
from jax.experimental import pallas as pl
from jax.experimental.pallas import tpu as pltpu

EPS = 1e-5
NEG_SLOPE = 0.2


def _round_up(x, m):
    return ((x + m - 1) // m) * m


def _make_sel(lout, lin, stride, k):
    """sel[j, i, c] = 1 iff c == stride*i + j  (constant, folded by XLA)."""
    j = jnp.arange(k)[:, None, None]
    i = jnp.arange(lout)[None, :, None]
    c = jnp.arange(lin)[None, None, :]
    return (c == stride * i + j).astype(jnp.bfloat16)


# ----------------------------------------------------------------------------
# The single fused kernel: whole forward pass for one batch element.
# ----------------------------------------------------------------------------
def _fused_forward_kernel(
        dims,
        # per-batch data
        col1_ref, pc_ref, lab_ref,
        # constant selection matrices for the strided convs
        sel2_ref, sel3_ref,
        # OctreeKeyConv conv1 / conv2 / conv3 / linear1
        wo1_ref, so1_ref, bo1_ref,
        wo2_ref, so2_ref, bo2_ref,
        wo3_ref, so3_ref, bo3_ref,
        wol_ref, sol_ref, bol_ref,
        # pointcloud_conv, label_embedd, embedd_vec_conv
        wpc_ref, spc_ref, bpc_ref,
        wlb_ref, slb_ref, blb_ref,
        wev_ref, sev_ref, bev_ref,
        # segmentation head conv2..conv6
        w2_ref, s2_ref, b2_ref,
        w3_ref, s3_ref, b3_ref,
        w4_ref, s4_ref, b4_ref,
        w5_ref, s5_ref, b5_ref,
        w6_ref, s6_ref, b6_ref,
        # output + scratch
        o_ref, emb_buf):
    L1, L2, L3, C, Np, P, Lemb = dims
    Lo = L1 + L2 + L3
    f32 = jnp.float32
    bf16 = jnp.bfloat16

    def act(y, s, b):
        # Conv1d -> LeakyReLU(0.2) -> folded eval-mode BatchNorm (f32 epilogue)
        y = jnp.where(y >= 0, y, NEG_SLOPE * y)
        return y * s + b

    def strided_conv(x_bf, sel_ref, w_ref, s_ref, b_ref):
        # out = sum_j (sel_j @ x) @ W_j   (im2col-free strided Conv1d)
        acc = None
        for j in range(sel_ref.shape[0]):
            rows = jnp.dot(sel_ref[j], x_bf, preferred_element_type=f32)
            term = jnp.dot(rows.astype(bf16), w_ref[j],
                           preferred_element_type=f32)
            acc = term if acc is None else acc + term
        return act(acc, s_ref[...], b_ref[...])

    # ---------------- OctreeKeyConv ----------------
    # conv1 (k=5, s=5, pad=2) was pre-im2col'd on the host: (L1, 5) @ (5, C)
    x1 = act(jnp.dot(col1_ref[0], wo1_ref[...], preferred_element_type=f32),
             so1_ref[...], bo1_ref[...])                           # (L1, C) f32
    # conv2 (k=5, s=4) and conv3 (k=4, s=2): selection-matrix matmuls
    x2 = strided_conv(x1.astype(bf16), sel2_ref, wo2_ref, so2_ref, bo2_ref)
    x3 = strided_conv(x2.astype(bf16), sel3_ref, wo3_ref, so3_ref, bo3_ref)

    def linear1(x):
        # linear1 is a 1x1 conv -> can be applied per concat piece
        return act(jnp.dot(x.astype(bf16), wol_ref[...],
                           preferred_element_type=f32),
                   sol_ref[...], bol_ref[...])

    # Channel-last embedding (rows = sequence positions, cols = C channels),
    # assembled row-block by row-block in VMEM (replaces the XLA transpose /
    # concat / pad glue between kernels).
    emb_buf[0:L1, :] = linear1(x1)
    emb_buf[L1:L1 + L2, :] = linear1(x2)
    emb_buf[L1 + L2:Lo, :] = linear1(x3)
    # pointcloud_conv: (Np, 3) @ (3, C)
    emb_buf[Lo:Lo + Np, :] = act(
        jnp.dot(pc_ref[0], wpc_ref[...], preferred_element_type=f32),
        spc_ref[...], bpc_ref[...])
    # label_embedd: (C, 16) @ (16, 1) -> (C, 1); torch's repeat(1, 1, C)
    # repeats along the length axis -> row j of the caps block == caps[j].
    caps = act(jnp.dot(wlb_ref[...], lab_ref[0], preferred_element_type=f32),
               slb_ref[...], blb_ref[...])                          # (C, 1)
    emb_buf[Lo + Np:Lemb, :] = jnp.broadcast_to(caps, (C, C))

    # ---------------- embedd_vec_conv ----------------
    # h[p, pos] = sum_c Wev[p, c] * emb[pos, c]   (rhs-transposed matmul)
    emb = emb_buf[...].astype(bf16)                                 # (Lemb, C)
    h = jax.lax.dot_general(wev_ref[...], emb, (((1,), (1,)), ((), ())),
                            preferred_element_type=f32)             # (P, Lemb)
    h = act(h, sev_ref[...], bev_ref[...]).astype(bf16)

    # ---------------- segmentation head conv2..conv6 ----------------
    z = h
    for w_ref, s_ref, b_ref in ((w2_ref, s2_ref, b2_ref),
                                (w3_ref, s3_ref, b3_ref),
                                (w4_ref, s4_ref, b4_ref),
                                (w5_ref, s5_ref, b5_ref)):
        z = act(jnp.dot(z, w_ref[...], preferred_element_type=f32),
                s_ref[...], b_ref[...]).astype(bf16)
    # final layer -> f32 logits, lane-dense (SP = 128) store
    o_ref[0] = act(jnp.dot(z, w6_ref[...], preferred_element_type=f32),
                   s6_ref[...], b6_ref[...])


# ----------------------------------------------------------------------------
# Parameter construction (deterministic, synthetic).  Weights are stored
# pre-transposed / pre-cast (bf16); folded BN scale/bias stay f32.  The only
# lane padding is the final seg_num -> 128 output width (padded with zeros so
# the padded region of the output is exactly zero).
# ----------------------------------------------------------------------------
def init_params(key, channel, num_points, seg_num, lemb):
    C = channel
    P = num_points
    SP = _round_up(seg_num, 128)
    kit = iter(jax.random.split(key, 64))

    def nrm(shape, s=0.05):
        return s * jax.random.normal(next(kit), shape, jnp.float32)

    def bn_fold(n):
        gamma = 1.0 + 0.1 * jax.random.normal(next(kit), (n,), jnp.float32)
        beta = 0.1 * jax.random.normal(next(kit), (n,), jnp.float32)
        mean = 0.05 * jax.random.normal(next(kit), (n,), jnp.float32)
        var = 0.5 + 0.5 * jnp.abs(jax.random.normal(next(kit), (n,), jnp.float32))
        scale = gamma / jnp.sqrt(var + EPS)
        bias = beta - mean * scale
        return scale, bias

    def bn_row(n, n_pad=None):            # broadcast along lanes: (1, n_pad)
        n_pad = n if n_pad is None else n_pad
        s, b = bn_fold(n)
        return (jnp.pad(s, (0, n_pad - n)).reshape(1, n_pad),
                jnp.pad(b, (0, n_pad - n)).reshape(1, n_pad))

    def bn_col(n):                        # broadcast along rows: (n, 1)
        s, b = bn_fold(n)
        return s.reshape(n, 1), b.reshape(n, 1)

    p = {}
    # OctreeKeyConv (native C=32 widths, no lane padding; (k, Cin, Cout))
    p["w_oc1"] = nrm((5, C)).astype(jnp.bfloat16)          # Cin=1 folded into k
    p["bn_oc1"] = bn_row(C)
    p["w_oc2"] = nrm((5, C, C)).astype(jnp.bfloat16)
    p["bn_oc2"] = bn_row(C)
    p["w_oc3"] = nrm((4, C, C)).astype(jnp.bfloat16)
    p["bn_oc3"] = bn_row(C)
    p["w_oclin"] = nrm((C, C)).astype(jnp.bfloat16)
    p["bn_oclin"] = bn_row(C)
    # pointcloud_conv: Conv1d(3, C, 1)
    p["w_pc"] = nrm((3, C)).astype(jnp.bfloat16)
    p["bn_pc"] = bn_row(C)
    # label_embedd: Conv1d(16, C, 1), stored (Cout, Cin) for a column matmul
    p["w_label"] = nrm((C, 16)).astype(jnp.bfloat16)
    p["bn_label"] = bn_col(C)
    # embedd_vec_conv: Conv1d(C, num_points, 1); BN over num_points -> (P, 1)
    p["w_emb"] = nrm((P, C)).astype(jnp.bfloat16)
    p["bn_emb"] = bn_col(P)
    # segmentation head (1x1 convs), stored (K, N)
    p["w_c2"] = nrm((lemb, 1024)).astype(jnp.bfloat16)
    p["bn_c2"] = bn_row(1024)
    p["w_c3"] = nrm((1024, 512)).astype(jnp.bfloat16)
    p["bn_c3"] = bn_row(512)
    p["w_c4"] = nrm((512, 256)).astype(jnp.bfloat16)
    p["bn_c4"] = bn_row(256)
    p["w_c5"] = nrm((256, 128)).astype(jnp.bfloat16)
    p["bn_c5"] = bn_row(128)
    p["w_c6"] = jnp.pad(nrm((128, seg_num)),
                        ((0, 0), (0, SP - seg_num))).astype(jnp.bfloat16)
    p["bn_c6"] = bn_row(seg_num, SP)
    return p


# ----------------------------------------------------------------------------
# Forward pass: tiny host-side input prep, then ONE fused pallas_call.
# ----------------------------------------------------------------------------
def octree_caps_partseg_forward(params, data, pointcloud, l,
                                channel, num_points, seg_num):
    C = channel
    P = num_points
    B, _, L = data.shape
    Np = pointcloud.shape[2]

    # OctreeKeyConv geometry (compile-time constants)
    L1 = (L + 4 - 5) // 5 + 1            # conv1: k=5, pad=2, stride=5
    L2 = (L1 - 5) // 4 + 1               # conv2: k=5, pad=0, stride=4
    L3 = (L2 - 4) // 2 + 1               # conv3: k=4, pad=0, stride=2
    Lo = L1 + L2 + L3
    Lemb = Lo + Np + C
    SP = params["w_c6"].shape[1]

    # --- minimal host-side input prep (fused by XLA into the input feed) ---
    xpad = jnp.pad(data[:, 0, :], ((0, 0), (2, 2)))
    col1 = xpad[:, :L1 * 5].reshape(B, L1, 5).astype(jnp.bfloat16)   # (B,L1,5)
    pc = jnp.transpose(pointcloud, (0, 2, 1)).astype(jnp.bfloat16)   # (B,Np,3)
    lab = l.reshape(B, 16, 1).astype(jnp.bfloat16)                   # (B,16,1)
    sel2 = _make_sel(L2, L1, 4, 5)        # (5, L2, L1) constant
    sel3 = _make_sel(L3, L2, 2, 4)        # (4, L3, L2) constant

    inputs = [col1, pc, lab, sel2, sel3]
    in_specs = [
        pl.BlockSpec((1, L1, 5), lambda b: (b, 0, 0)),
        pl.BlockSpec((1, Np, 3), lambda b: (b, 0, 0)),
        pl.BlockSpec((1, 16, 1), lambda b: (b, 0, 0)),
    ]

    def const_spec(a):
        if a.ndim == 2:
            return pl.BlockSpec(a.shape, lambda b: (0, 0))
        return pl.BlockSpec(a.shape, lambda b: (0, 0, 0))

    in_specs += [const_spec(sel2), const_spec(sel3)]
    for name in ("oc1", "oc2", "oc3", "oclin", "pc", "label", "emb",
                 "c2", "c3", "c4", "c5", "c6"):
        w = params["w_" + name]
        s, bb = params["bn_" + name]
        inputs += [w, s, bb]
        in_specs += [const_spec(w), const_spec(s), const_spec(bb)]

    dims = (L1, L2, L3, C, Np, P, Lemb)
    kernel = functools.partial(_fused_forward_kernel, dims)

    flops = 2 * B * (
        L1 * 5 * C
        + 5 * (L2 * L1 * C + L2 * C * C)
        + 4 * (L3 * L2 * C + L3 * C * C)
        + Lo * C * C + Np * 3 * C + C * 16
        + P * C * Lemb
        + P * (Lemb * 1024 + 1024 * 512 + 512 * 256 + 256 * 128 + 128 * SP))
    bytes_accessed = (sum(int(a.size) * a.dtype.itemsize for a in inputs)
                      + B * P * SP * 4)
    cost = pl.CostEstimate(flops=flops, transcendentals=0,
                           bytes_accessed=bytes_accessed)

    out = pl.pallas_call(
        kernel,
        out_shape=jax.ShapeDtypeStruct((B, P, SP), jnp.float32),
        grid=(B,),
        in_specs=in_specs,
        out_specs=pl.BlockSpec((1, P, SP), lambda b: (b, 0, 0)),
        scratch_shapes=[pltpu.VMEM((Lemb, C), jnp.float32)],
        compiler_params=pltpu.CompilerParams(dimension_semantics=("parallel",)),
        cost_estimate=cost,
    )(*inputs)

    # Final torch-shaped result: (B, seg_num, num_points).  The kernel store
    # stays lane-dense (SP=128); the slice + transpose are done once here.
    result = out[:, :, :seg_num]
    return jnp.transpose(result, (0, 2, 1))


# ----------------------------------------------------------------------------
if __name__ == "__main__":
    B = 2
    CHANNEL = 32          # self.channel (output_channel)
    NUM_POINTS = 16       # args.num_points
    SEG_NUM = 50
    L_OCTREE = 100        # length of the 1-channel octree key sequence

    L1 = (L_OCTREE + 4 - 5) // 5 + 1
    L2 = (L1 - 5) // 4 + 1
    L3 = (L2 - 4) // 2 + 1
    LO = L1 + L2 + L3
    LEMB = LO + NUM_POINTS + CHANNEL      # in-channels of head conv2

    root = jax.random.PRNGKey(0)
    k_par, k_data, k_pc, k_lab = jax.random.split(root, 4)

    params = init_params(k_par, CHANNEL, NUM_POINTS, SEG_NUM, LEMB)

    data = jax.random.normal(k_data, (B, 1, L_OCTREE), jnp.float32)
    pointcloud = jax.random.normal(k_pc, (B, 3, NUM_POINTS), jnp.float32)
    label_idx = jax.random.randint(k_lab, (B,), 0, 16)
    l = jax.nn.one_hot(label_idx, 16, dtype=jnp.float32)       # (B, 16)

    fwd = jax.jit(functools.partial(
        octree_caps_partseg_forward,
        channel=CHANNEL, num_points=NUM_POINTS, seg_num=SEG_NUM))
    out = jax.block_until_ready(fwd(params, data, pointcloud, l))

    assert out.shape == (B, SEG_NUM, NUM_POINTS), out.shape
    assert bool(jnp.all(jnp.isfinite(out)))
    print("KERNEL_OK")
</pallas_src>

<mosaic_0001>
module attributes {stable_mosaic.version = 11 : i64} {
  func.func @_fused_forward_kernel(%arg0: i32, %arg1: memref<1x20x5xbf16, #tpu.memory_space<vmem>>, %arg2: memref<1x16x3xbf16, #tpu.memory_space<vmem>>, %arg3: memref<1x16x1xbf16, #tpu.memory_space<vmem>>, %arg4: memref<5x4x20xbf16, #tpu.memory_space<vmem>>, %arg5: memref<4x1x4xbf16, #tpu.memory_space<vmem>>, %arg6: memref<5x32xbf16, #tpu.memory_space<vmem>>, %arg7: memref<1x32xf32, #tpu.memory_space<vmem>>, %arg8: memref<1x32xf32, #tpu.memory_space<vmem>>, %arg9: memref<5x32x32xbf16, #tpu.memory_space<vmem>>, %arg10: memref<1x32xf32, #tpu.memory_space<vmem>>, %arg11: memref<1x32xf32, #tpu.memory_space<vmem>>, %arg12: memref<4x32x32xbf16, #tpu.memory_space<vmem>>, %arg13: memref<1x32xf32, #tpu.memory_space<vmem>>, %arg14: memref<1x32xf32, #tpu.memory_space<vmem>>, %arg15: memref<32x32xbf16, #tpu.memory_space<vmem>>, %arg16: memref<1x32xf32, #tpu.memory_space<vmem>>, %arg17: memref<1x32xf32, #tpu.memory_space<vmem>>, %arg18: memref<3x32xbf16, #tpu.memory_space<vmem>>, %arg19: memref<1x32xf32, #tpu.memory_space<vmem>>, %arg20: memref<1x32xf32, #tpu.memory_space<vmem>>, %arg21: memref<32x16xbf16, #tpu.memory_space<vmem>>, %arg22: memref<32x1xf32, #tpu.memory_space<vmem>>, %arg23: memref<32x1xf32, #tpu.memory_space<vmem>>, %arg24: memref<16x32xbf16, #tpu.memory_space<vmem>>, %arg25: memref<16x1xf32, #tpu.memory_space<vmem>>, %arg26: memref<16x1xf32, #tpu.memory_space<vmem>>, %arg27: memref<73x1024xbf16, #tpu.memory_space<vmem>>, %arg28: memref<1x1024xf32, #tpu.memory_space<vmem>>, %arg29: memref<1x1024xf32, #tpu.memory_space<vmem>>, %arg30: memref<1024x512xbf16, #tpu.memory_space<vmem>>, %arg31: memref<1x512xf32, #tpu.memory_space<vmem>>, %arg32: memref<1x512xf32, #tpu.memory_space<vmem>>, %arg33: memref<512x256xbf16, #tpu.memory_space<vmem>>, %arg34: memref<1x256xf32, #tpu.memory_space<vmem>>, %arg35: memref<1x256xf32, #tpu.memory_space<vmem>>, %arg36: memref<256x128xbf16, #tpu.memory_space<vmem>>, %arg37: memref<1x128xf32, #tpu.memory_space<vmem>>, %arg38: memref<1x128xf32, #tpu.memory_space<vmem>>, %arg39: memref<128x128xbf16, #tpu.memory_space<vmem>>, %arg40: memref<1x128xf32, #tpu.memory_space<vmem>>, %arg41: memref<1x128xf32, #tpu.memory_space<vmem>>, %arg42: memref<1x16x128xf32, #tpu.memory_space<vmem>>, %arg43: memref<73x32xf32, #tpu.memory_space<vmem>>) attributes {dimension_semantics = [#tpu.dimension_semantics<parallel>], iteration_bounds = array<i64: 2>, scalar_prefetch = 0 : i64, scratch_operands = 1 : i64, tpu.core_type = #tpu.core_type<tc>, window_params = [{transform_indices = @transform_0, window_bounds = array<i64: 1, 20, 5>}, {transform_indices = @transform_1, window_bounds = array<i64: 1, 16, 3>}, {transform_indices = @transform_2, window_bounds = array<i64: 1, 16, 1>}, {pipeline_mode = #tpu.pipeline_mode<synchronous>, transform_indices = @transform_3, window_bounds = array<i64: 5, 4, 20>}, {pipeline_mode = #tpu.pipeline_mode<synchronous>, transform_indices = @transform_4, window_bounds = array<i64: 4, 1, 4>}, {pipeline_mode = #tpu.pipeline_mode<synchronous>, transform_indices = @transform_5, window_bounds = array<i64: 5, 32>}, {pipeline_mode = #tpu.pipeline_mode<synchronous>, transform_indices = @transform_6, window_bounds = array<i64: 1, 32>}, {pipeline_mode = #tpu.pipeline_mode<synchronous>, transform_indices = @transform_7, window_bounds = array<i64: 1, 32>}, {pipeline_mode = #tpu.pipeline_mode<synchronous>, transform_indices = @transform_8, window_bounds = array<i64: 5, 32, 32>}, {pipeline_mode = #tpu.pipeline_mode<synchronous>, transform_indices = @transform_9, window_bounds = array<i64: 1, 32>}, {pipeline_mode = #tpu.pipeline_mode<synchronous>, transform_indices = @transform_10, window_bounds = array<i64: 1, 32>}, {pipeline_mode = #tpu.pipeline_mode<synchronous>, transform_indices = @transform_11, window_bounds = array<i64: 4, 32, 32>}, {pipeline_mode = #tpu.pipeline_mode<synchronous>, transform_indices = @transform_12, window_bounds = array<i64: 1, 32>}, {pipeline_mode = #tpu.pipeline_mode<synchronous>, transform_indices = @transform_13, window_bounds = array<i64: 1, 32>}, {pipeline_mode = #tpu.pipeline_mode<synchronous>, transform_indices = @transform_14, window_bounds = array<i64: 32, 32>}, {pipeline_mode = #tpu.pipeline_mode<synchronous>, transform_indices = @transform_15, window_bounds = array<i64: 1, 32>}, {pipeline_mode = #tpu.pipeline_mode<synchronous>, transform_indices = @transform_16, window_bounds = array<i64: 1, 32>}, {pipeline_mode = #tpu.pipeline_mode<synchronous>, transform_indices = @transform_17, window_bounds = array<i64: 3, 32>}, {pipeline_mode = #tpu.pipeline_mode<synchronous>, transform_indices = @transform_18, window_bounds = array<i64: 1, 32>}, {pipeline_mode = #tpu.pipeline_mode<synchronous>, transform_indices = @transform_19, window_bounds = array<i64: 1, 32>}, {pipeline_mode = #tpu.pipeline_mode<synchronous>, transform_indices = @transform_20, window_bounds = array<i64: 32, 16>}, {pipeline_mode = #tpu.pipeline_mode<synchronous>, transform_indices = @transform_21, window_bounds = array<i64: 32, 1>}, {pipeline_mode = #tpu.pipeline_mode<synchronous>, transform_indices = @transform_22, window_bounds = array<i64: 32, 1>}, {pipeline_mode = #tpu.pipeline_mode<synchronous>, transform_indices = @transform_23, window_bounds = array<i64: 16, 32>}, {pipeline_mode = #tpu.pipeline_mode<synchronous>, transform_indices = @transform_24, window_bounds = array<i64: 16, 1>}, {pipeline_mode = #tpu.pipeline_mode<synchronous>, transform_indices = @transform_25, window_bounds = array<i64: 16, 1>}, {pipeline_mode = #tpu.pipeline_mode<synchronous>, transform_indices = @transform_26, window_bounds = array<i64: 73, 1024>}, {pipeline_mode = #tpu.pipeline_mode<synchronous>, transform_indices = @transform_27, window_bounds = array<i64: 1, 1024>}, {pipeline_mode = #tpu.pipeline_mode<synchronous>, transform_indices = @transform_28, window_bounds = array<i64: 1, 1024>}, {pipeline_mode = #tpu.pipeline_mode<synchronous>, transform_indices = @transform_29, window_bounds = array<i64: 1024, 512>}, {pipeline_mode = #tpu.pipeline_mode<synchronous>, transform_indices = @transform_30, window_bounds = array<i64: 1, 512>}, {pipeline_mode = #tpu.pipeline_mode<synchronous>, transform_indices = @transform_31, window_bounds = array<i64: 1, 512>}, {pipeline_mode = #tpu.pipeline_mode<synchronous>, transform_indices = @transform_32, window_bounds = array<i64: 512, 256>}, {pipeline_mode = #tpu.pipeline_mode<synchronous>, transform_indices = @transform_33, window_bounds = array<i64: 1, 256>}, {pipeline_mode = #tpu.pipeline_mode<synchronous>, transform_indices = @transform_34, window_bounds = array<i64: 1, 256>}, {pipeline_mode = #tpu.pipeline_mode<synchronous>, transform_indices = @transform_35, window_bounds = array<i64: 256, 128>}, {pipeline_mode = #tpu.pipeline_mode<synchronous>, transform_indices = @transform_36, window_bounds = array<i64: 1, 128>}, {pipeline_mode = #tpu.pipeline_mode<synchronous>, transform_indices = @transform_37, window_bounds = array<i64: 1, 128>}, {pipeline_mode = #tpu.pipeline_mode<synchronous>, transform_indices = @transform_38, window_bounds = array<i64: 128, 128>}, {pipeline_mode = #tpu.pipeline_mode<synchronous>, transform_indices = @transform_39, window_bounds = array<i64: 1, 128>}, {pipeline_mode = #tpu.pipeline_mode<synchronous>, transform_indices = @transform_40, window_bounds = array<i64: 1, 128>}, {transform_indices = @transform_41, window_bounds = array<i64: 1, 16, 128>}]} {
    %c0 = arith.constant 0 : index
    %c0_0 = arith.constant 0 : index
    %c0_1 = arith.constant 0 : index
    %0 = vector.load %arg1[%c0, %c0_0, %c0_1] : memref<1x20x5xbf16, #tpu.memory_space<vmem>>, vector<1x20x5xbf16>
    %1 = vector.shape_cast %0 : vector<1x20x5xbf16> to vector<20x5xbf16>
    %c0_2 = arith.constant 0 : index
    %c0_3 = arith.constant 0 : index
    %2 = vector.load %arg6[%c0_2, %c0_3] : memref<5x32xbf16, #tpu.memory_space<vmem>>, vector<5x32xbf16>
    %cst = arith.constant dense<0.000000e+00> : vector<20x32xf32>
    %3 = tpu.matmul %1, %2, %cst {dimension_numbers = #tpu.dot_dimension_numbers<[1], [0], [0], [1], [0, 0, 1, 1], [], []>} : vector<20x5xbf16>, vector<5x32xbf16>, vector<20x32xf32> -> vector<20x32xf32>
    %c0_4 = arith.constant 0 : index
    %c0_5 = arith.constant 0 : index
    %4 = vector.load %arg7[%c0_4, %c0_5] : memref<1x32xf32, #tpu.memory_space<vmem>>, vector<1x32xf32>
    %c0_6 = arith.constant 0 : index
    %c0_7 = arith.constant 0 : index
    %5 = vector.load %arg8[%c0_6, %c0_7] : memref<1x32xf32, #tpu.memory_space<vmem>>, vector<1x32xf32>
    %cst_8 = arith.constant 0.000000e+00 : f32
    %6 = vector.broadcast %cst_8 : f32 to vector<20x32xf32>
    %7 = arith.cmpf oge, %3, %6 : vector<20x32xf32>
    %cst_9 = arith.constant 2.000000e-01 : f32
    %8 = vector.broadcast %cst_9 : f32 to vector<20x32xf32>
    %9 = arith.mulf %8, %3 : vector<20x32xf32>
    %10 = arith.select %7, %3, %9 : vector<20x32xi1>, vector<20x32xf32>
    %11 = vector.broadcast %4 : vector<1x32xf32> to vector<20x32xf32>
    %12 = arith.mulf %10, %11 : vector<20x32xf32>
    %13 = vector.broadcast %5 : vector<1x32xf32> to vector<20x32xf32>
    %14 = arith.addf %12, %13 : vector<20x32xf32>
    %15 = arith.truncf %14 : vector<20x32xf32> to vector<20x32xbf16>
    %c0_10 = arith.constant 0 : index
    %c0_11 = arith.constant 0 : index
    %c0_12 = arith.constant 0 : index
    %16 = vector.load %arg4[%c0_10, %c0_11, %c0_12] : memref<5x4x20xbf16, #tpu.memory_space<vmem>>, vector<1x4x20xbf16>
    %17 = vector.shape_cast %16 : vector<1x4x20xbf16> to vector<4x20xbf16>
    %cst_13 = arith.constant dense<0.000000e+00> : vector<4x32xf32>
    %18 = tpu.matmul %17, %15, %cst_13 {dimension_numbers = #tpu.dot_dimension_numbers<[1], [0], [0], [1], [0, 0, 1, 1], [], []>} : vector<4x20xbf16>, vector<20x32xbf16>, vector<4x32xf32> -> vector<4x32xf32>
    %19 = arith.truncf %18 : vector<4x32xf32> to vector<4x32xbf16>
    %c0_14 = arith.constant 0 : index
    %c0_15 = arith.constant 0 : index
    %c0_16 = arith.constant 0 : index
    %20 = vector.load %arg9[%c0_14, %c0_15, %c0_16] : memref<5x32x32xbf16, #tpu.memory_space<vmem>>, vector<1x32x32xbf16>
    %21 = vector.shape_cast %20 : vector<1x32x32xbf16> to vector<32x32xbf16>
    %cst_17 = arith.constant dense<0.000000e+00> : vector<4x32xf32>
    %22 = tpu.matmul %19, %21, %cst_17 {dimension_numbers = #tpu.dot_dimension_numbers<[1], [0], [0], [1], [0, 0, 1, 1], [], []>} : vector<4x32xbf16>, vector<32x32xbf16>, vector<4x32xf32> -> vector<4x32xf32>
    %c1 = arith.constant 1 : index
    %c0_18 = arith.constant 0 : index
    %c0_19 = arith.constant 0 : index
    %23 = vector.load %arg4[%c1, %c0_18, %c0_19] : memref<5x4x20xbf16, #tpu.memory_space<vmem>>, vector<1x4x20xbf16>
    %24 = vector.shape_cast %23 : vector<1x4x20xbf16> to vector<4x20xbf16>
    %cst_20 = arith.constant dense<0.000000e+00> : vector<4x32xf32>
    %25 = tpu.matmul %24, %15, %cst_20 {dimension_numbers = #tpu.dot_dimension_numbers<[1], [0], [0], [1], [0, 0, 1, 1], [], []>} : vector<4x20xbf16>, vector<20x32xbf16>, vector<4x32xf32> -> vector<4x32xf32>
    %26 = arith.truncf %25 : vector<4x32xf32> to vector<4x32xbf16>
    %c1_21 = arith.constant 1 : index
    %c0_22 = arith.constant 0 : index
    %c0_23 = arith.constant 0 : index
    %27 = vector.load %arg9[%c1_21, %c0_22, %c0_23] : memref<5x32x32xbf16, #tpu.memory_space<vmem>>, vector<1x32x32xbf16>
    %28 = vector.shape_cast %27 : vector<1x32x32xbf16> to vector<32x32xbf16>
    %cst_24 = arith.constant dense<0.000000e+00> : vector<4x32xf32>
    %29 = tpu.matmul %26, %28, %cst_24 {dimension_numbers = #tpu.dot_dimension_numbers<[1], [0], [0], [1], [0, 0, 1, 1], [], []>} : vector<4x32xbf16>, vector<32x32xbf16>, vector<4x32xf32> -> vector<4x32xf32>
    %30 = arith.addf %22, %29 : vector<4x32xf32>
    %c2 = arith.constant 2 : index
    %c0_25 = arith.constant 0 : index
    %c0_26 = arith.constant 0 : index
    %31 = vector.load %arg4[%c2, %c0_25, %c0_26] : memref<5x4x20xbf16, #tpu.memory_space<vmem>>, vector<1x4x20xbf16>
    %32 = vector.shape_cast %31 : vector<1x4x20xbf16> to vector<4x20xbf16>
    %cst_27 = arith.constant dense<0.000000e+00> : vector<4x32xf32>
    %33 = tpu.matmul %32, %15, %cst_27 {dimension_numbers = #tpu.dot_dimension_numbers<[1], [0], [0], [1], [0, 0, 1, 1], [], []>} : vector<4x20xbf16>, vector<20x32xbf16>, vector<4x32xf32> -> vector<4x32xf32>
    %34 = arith.truncf %33 : vector<4x32xf32> to vector<4x32xbf16>
    %c2_28 = arith.constant 2 : index
    %c0_29 = arith.constant 0 : index
    %c0_30 = arith.constant 0 : index
    %35 = vector.load %arg9[%c2_28, %c0_29, %c0_30] : memref<5x32x32xbf16, #tpu.memory_space<vmem>>, vector<1x32x32xbf16>
    %36 = vector.shape_cast %35 : vector<1x32x32xbf16> to vector<32x32xbf16>
    %cst_31 = arith.constant dense<0.000000e+00> : vector<4x32xf32>
    %37 = tpu.matmul %34, %36, %cst_31 {dimension_numbers = #tpu.dot_dimension_numbers<[1], [0], [0], [1], [0, 0, 1, 1], [], []>} : vector<4x32xbf16>, vector<32x32xbf16>, vector<4x32xf32> -> vector<4x32xf32>
    %38 = arith.addf %30, %37 : vector<4x32xf32>
    %c3 = arith.constant 3 : index
    %c0_32 = arith.constant 0 : index
    %c0_33 = arith.constant 0 : index
    %39 = vector.load %arg4[%c3, %c0_32, %c0_33] : memref<5x4x20xbf16, #tpu.memory_space<vmem>>, vector<1x4x20xbf16>
    %40 = vector.shape_cast %39 : vector<1x4x20xbf16> to vector<4x20xbf16>
    %cst_34 = arith.constant dense<0.000000e+00> : vector<4x32xf32>
    %41 = tpu.matmul %40, %15, %cst_34 {dimension_numbers = #tpu.dot_dimension_numbers<[1], [0], [0], [1], [0, 0, 1, 1], [], []>} : vector<4x20xbf16>, vector<20x32xbf16>, vector<4x32xf32> -> vector<4x32xf32>
    %42 = arith.truncf %41 : vector<4x32xf32> to vector<4x32xbf16>
    %c3_35 = arith.constant 3 : index
    %c0_36 = arith.constant 0 : index
    %c0_37 = arith.constant 0 : index
    %43 = vector.load %arg9[%c3_35, %c0_36, %c0_37] : memref<5x32x32xbf16, #tpu.memory_space<vmem>>, vector<1x32x32xbf16>
    %44 = vector.shape_cast %43 : vector<1x32x32xbf16> to vector<32x32xbf16>
    %cst_38 = arith.constant dense<0.000000e+00> : vector<4x32xf32>
    %45 = tpu.matmul %42, %44, %cst_38 {dimension_numbers = #tpu.dot_dimension_numbers<[1], [0], [0], [1], [0, 0, 1, 1], [], []>} : vector<4x32xbf16>, vector<32x32xbf16>, vector<4x32xf32> -> vector<4x32xf32>
    %46 = arith.addf %38, %45 : vector<4x32xf32>
    %c4 = arith.constant 4 : index
    %c0_39 = arith.constant 0 : index
    %c0_40 = arith.constant 0 : index
    %47 = vector.load %arg4[%c4, %c0_39, %c0_40] : memref<5x4x20xbf16, #tpu.memory_space<vmem>>, vector<1x4x20xbf16>
    %48 = vector.shape_cast %47 : vector<1x4x20xbf16> to vector<4x20xbf16>
    %cst_41 = arith.constant dense<0.000000e+00> : vector<4x32xf32>
    %49 = tpu.matmul %48, %15, %cst_41 {dimension_numbers = #tpu.dot_dimension_numbers<[1], [0], [0], [1], [0, 0, 1, 1], [], []>} : vector<4x20xbf16>, vector<20x32xbf16>, vector<4x32xf32> -> vector<4x32xf32>
    %50 = arith.truncf %49 : vector<4x32xf32> to vector<4x32xbf16>
    %c4_42 = arith.constant 4 : index
    %c0_43 = arith.constant 0 : index
    %c0_44 = arith.constant 0 : index
    %51 = vector.load %arg9[%c4_42, %c0_43, %c0_44] : memref<5x32x32xbf16, #tpu.memory_space<vmem>>, vector<1x32x32xbf16>
    %52 = vector.shape_cast %51 : vector<1x32x32xbf16> to vector<32x32xbf16>
    %cst_45 = arith.constant dense<0.000000e+00> : vector<4x32xf32>
    %53 = tpu.matmul %50, %52, %cst_45 {dimension_numbers = #tpu.dot_dimension_numbers<[1], [0], [0], [1], [0, 0, 1, 1], [], []>} : vector<4x32xbf16>, vector<32x32xbf16>, vector<4x32xf32> -> vector<4x32xf32>
    %54 = arith.addf %46, %53 : vector<4x32xf32>
    %c0_46 = arith.constant 0 : index
    %c0_47 = arith.constant 0 : index
    %55 = vector.load %arg10[%c0_46, %c0_47] : memref<1x32xf32, #tpu.memory_space<vmem>>, vector<1x32xf32>
    %c0_48 = arith.constant 0 : index
    %c0_49 = arith.constant 0 : index
    %56 = vector.load %arg11[%c0_48, %c0_49] : memref<1x32xf32, #tpu.memory_space<vmem>>, vector<1x32xf32>
    %cst_50 = arith.constant 0.000000e+00 : f32
    %57 = vector.broadcast %cst_50 : f32 to vector<4x32xf32>
    %58 = arith.cmpf oge, %54, %57 : vector<4x32xf32>
    %cst_51 = arith.constant 2.000000e-01 : f32
    %59 = vector.broadcast %cst_51 : f32 to vector<4x32xf32>
    %60 = arith.mulf %59, %54 : vector<4x32xf32>
    %61 = arith.select %58, %54, %60 : vector<4x32xi1>, vector<4x32xf32>
    %62 = vector.broadcast %55 : vector<1x32xf32> to vector<4x32xf32>
    %63 = arith.mulf %61, %62 : vector<4x32xf32>
    %64 = vector.broadcast %56 : vector<1x32xf32> to vector<4x32xf32>
    %65 = arith.addf %63, %64 : vector<4x32xf32>
    %66 = arith.truncf %65 : vector<4x32xf32> to vector<4x32xbf16>
    %c0_52 = arith.constant 0 : index
    %c0_53 = arith.constant 0 : index
    %c0_54 = arith.constant 0 : index
    %67 = vector.load %arg5[%c0_52, %c0_53, %c0_54] : memref<4x1x4xbf16, #tpu.memory_space<vmem>>, vector<1x1x4xbf16>
    %68 = vector.shape_cast %67 : vector<1x1x4xbf16> to vector<1x4xbf16>
    %cst_55 = arith.constant dense<0.000000e+00> : vector<1x32xf32>
    %69 = tpu.matmul %68, %66, %cst_55 {dimension_numbers = #tpu.dot_dimension_numbers<[1], [0], [0], [1], [0, 0, 1, 1], [], []>} : vector<1x4xbf16>, vector<4x32xbf16>, vector<1x32xf32> -> vector<1x32xf32>
    %70 = arith.truncf %69 : vector<1x32xf32> to vector<1x32xbf16>
    %c0_56 = arith.constant 0 : index
    %c0_57 = arith.constant 0 : index
    %c0_58 = arith.constant 0 : index
    %71 = vector.load %arg12[%c0_56, %c0_57, %c0_58] : memref<4x32x32xbf16, #tpu.memory_space<vmem>>, vector<1x32x32xbf16>
    %72 = vector.shape_cast %71 : vector<1x32x32xbf16> to vector<32x32xbf16>
    %cst_59 = arith.constant dense<0.000000e+00> : vector<1x32xf32>
    %73 = tpu.matmul %70, %72, %cst_59 {dimension_numbers = #tpu.dot_dimension_numbers<[1], [0], [0], [1], [0, 0, 1, 1], [], []>} : vector<1x32xbf16>, vector<32x32xbf16>, vector<1x32xf32> -> vector<1x32xf32>
    %c1_60 = arith.constant 1 : index
    %c0_61 = arith.constant 0 : index
    %c0_62 = arith.constant 0 : index
    %74 = vector.load %arg5[%c1_60, %c0_61, %c0_62] : memref<4x1x4xbf16, #tpu.memory_space<vmem>>, vector<1x1x4xbf16>
    %75 = vector.shape_cast %74 : vector<1x1x4xbf16> to vector<1x4xbf16>
    %cst_63 = arith.constant dense<0.000000e+00> : vector<1x32xf32>
    %76 = tpu.matmul %75, %66, %cst_63 {dimension_numbers = #tpu.dot_dimension_numbers<[1], [0], [0], [1], [0, 0, 1, 1], [], []>} : vector<1x4xbf16>, vector<4x32xbf16>, vector<1x32xf32> -> vector<1x32xf32>
    %77 = arith.truncf %76 : vector<1x32xf32> to vector<1x32xbf16>
    %c1_64 = arith.constant 1 : index
    %c0_65 = arith.constant 0 : index
    %c0_66 = arith.constant 0 : index
    %78 = vector.load %arg12[%c1_64, %c0_65, %c0_66] : memref<4x32x32xbf16, #tpu.memory_space<vmem>>, vector<1x32x32xbf16>
    %79 = vector.shape_cast %78 : vector<1x32x32xbf16> to vector<32x32xbf16>
    %cst_67 = arith.constant dense<0.000000e+00> : vector<1x32xf32>
    %80 = tpu.matmul %77, %79, %cst_67 {dimension_numbers = #tpu.dot_dimension_numbers<[1], [0], [0], [1], [0, 0, 1, 1], [], []>} : vector<1x32xbf16>, vector<32x32xbf16>, vector<1x32xf32> -> vector<1x32xf32>
    %81 = arith.addf %73, %80 : vector<1x32xf32>
    %c2_68 = arith.constant 2 : index
    %c0_69 = arith.constant 0 : index
    %c0_70 = arith.constant 0 : index
    %82 = vector.load %arg5[%c2_68, %c0_69, %c0_70] : memref<4x1x4xbf16, #tpu.memory_space<vmem>>, vector<1x1x4xbf16>
    %83 = vector.shape_cast %82 : vector<1x1x4xbf16> to vector<1x4xbf16>
    %cst_71 = arith.constant dense<0.000000e+00> : vector<1x32xf32>
    %84 = tpu.matmul %83, %66, %cst_71 {dimension_numbers = #tpu.dot_dimension_numbers<[1], [0], [0], [1], [0, 0, 1, 1], [], []>} : vector<1x4xbf16>, vector<4x32xbf16>, vector<1x32xf32> -> vector<1x32xf32>
    %85 = arith.truncf %84 : vector<1x32xf32> to vector<1x32xbf16>
    %c2_72 = arith.constant 2 : index
    %c0_73 = arith.constant 0 : index
    %c0_74 = arith.constant 0 : index
    %86 = vector.load %arg12[%c2_72, %c0_73, %c0_74] : memref<4x32x32xbf16, #tpu.memory_space<vmem>>, vector<1x32x32xbf16>
    %87 = vector.shape_cast %86 : vector<1x32x32xbf16> to vector<32x32xbf16>
    %cst_75 = arith.constant dense<0.000000e+00> : vector<1x32xf32>
    %88 = tpu.matmul %85, %87, %cst_75 {dimension_numbers = #tpu.dot_dimension_numbers<[1], [0], [0], [1], [0, 0, 1, 1], [], []>} : vector<1x32xbf16>, vector<32x32xbf16>, vector<1x32xf32> -> vector<1x32xf32>
    %89 = arith.addf %81, %88 : vector<1x32xf32>
    %c3_76 = arith.constant 3 : index
    %c0_77 = arith.constant 0 : index
    %c0_78 = arith.constant 0 : index
    %90 = vector.load %arg5[%c3_76, %c0_77, %c0_78] : memref<4x1x4xbf16, #tpu.memory_space<vmem>>, vector<1x1x4xbf16>
    %91 = vector.shape_cast %90 : vector<1x1x4xbf16> to vector<1x4xbf16>
    %cst_79 = arith.constant dense<0.000000e+00> : vector<1x32xf32>
    %92 = tpu.matmul %91, %66, %cst_79 {dimension_numbers = #tpu.dot_dimension_numbers<[1], [0], [0], [1], [0, 0, 1, 1], [], []>} : vector<1x4xbf16>, vector<4x32xbf16>, vector<1x32xf32> -> vector<1x32xf32>
    %93 = arith.truncf %92 : vector<1x32xf32> to vector<1x32xbf16>
    %c3_80 = arith.constant 3 : index
    %c0_81 = arith.constant 0 : index
    %c0_82 = arith.constant 0 : index
    %94 = vector.load %arg12[%c3_80, %c0_81, %c0_82] : memref<4x32x32xbf16, #tpu.memory_space<vmem>>, vector<1x32x32xbf16>
    %95 = vector.shape_cast %94 : vector<1x32x32xbf16> to vector<32x32xbf16>
    %cst_83 = arith.constant dense<0.000000e+00> : vector<1x32xf32>
    %96 = tpu.matmul %93, %95, %cst_83 {dimension_numbers = #tpu.dot_dimension_numbers<[1], [0], [0], [1], [0, 0, 1, 1], [], []>} : vector<1x32xbf16>, vector<32x32xbf16>, vector<1x32xf32> -> vector<1x32xf32>
    %97 = arith.addf %89, %96 : vector<1x32xf32>
    %c0_84 = arith.constant 0 : index
    %c0_85 = arith.constant 0 : index
    %98 = vector.load %arg13[%c0_84, %c0_85] : memref<1x32xf32, #tpu.memory_space<vmem>>, vector<1x32xf32>
    %c0_86 = arith.constant 0 : index
    %c0_87 = arith.constant 0 : index
    %99 = vector.load %arg14[%c0_86, %c0_87] : memref<1x32xf32, #tpu.memory_space<vmem>>, vector<1x32xf32>
    %cst_88 = arith.constant 0.000000e+00 : f32
    %100 = vector.broadcast %cst_88 : f32 to vector<1x32xf32>
    %101 = arith.cmpf oge, %97, %100 : vector<1x32xf32>
    %cst_89 = arith.constant 2.000000e-01 : f32
    %102 = vector.broadcast %cst_89 : f32 to vector<1x32xf32>
    %103 = arith.mulf %102, %97 : vector<1x32xf32>
    %104 = arith.select %101, %97, %103 : vector<1x32xi1>, vector<1x32xf32>
    %105 = arith.mulf %104, %98 : vector<1x32xf32>
    %106 = arith.addf %105, %99 : vector<1x32xf32>
    %107 = arith.truncf %14 : vector<20x32xf32> to vector<20x32xbf16>
    %c0_90 = arith.constant 0 : index
    %c0_91 = arith.constant 0 : index
    %108 = vector.load %arg15[%c0_90, %c0_91] : memref<32x32xbf16, #tpu.memory_space<vmem>>, vector<32x32xbf16>
    %cst_92 = arith.constant dense<0.000000e+00> : vector<20x32xf32>
    %109 = tpu.matmul %107, %108, %cst_92 {dimension_numbers = #tpu.dot_dimension_numbers<[1], [0], [0], [1], [0, 0, 1, 1], [], []>} : vector<20x32xbf16>, vector<32x32xbf16>, vector<20x32xf32> -> vector<20x32xf32>
    %c0_93 = arith.constant 0 : index
    %c0_94 = arith.constant 0 : index
    %110 = vector.load %arg16[%c0_93, %c0_94] : memref<1x32xf32, #tpu.memory_space<vmem>>, vector<1x32xf32>
    %c0_95 = arith.constant 0 : index
    %c0_96 = arith.constant 0 : index
    %111 = vector.load %arg17[%c0_95, %c0_96] : memref<1x32xf32, #tpu.memory_space<vmem>>, vector<1x32xf32>
    %cst_97 = arith.constant 0.000000e+00 : f32
    %112 = vector.broadcast %cst_97 : f32 to vector<20x32xf32>
    %113 = arith.cmpf oge, %109, %112 : vector<20x32xf32>
    %cst_98 = arith.constant 2.000000e-01 : f32
    %114 = vector.broadcast %cst_98 : f32 to vector<20x32xf32>
    %115 = arith.mulf %114, %109 : vector<20x32xf32>
    %116 = arith.select %113, %109, %115 : vector<20x32xi1>, vector<20x32xf32>
    %117 = vector.broadcast %110 : vector<1x32xf32> to vector<20x32xf32>
    %118 = arith.mulf %116, %117 : vector<20x32xf32>
    %119 = vector.broadcast %111 : vector<1x32xf32> to vector<20x32xf32>
    %120 = arith.addf %118, %119 : vector<20x32xf32>
    %c0_99 = arith.constant 0 : index
    %c0_100 = arith.constant 0 : index
    %121 = vector.load %arg43[%c0_99, %c0_100] : memref<73x32xf32, #tpu.memory_space<vmem>>, vector<20x32xf32>
    tpu.vector_store %arg43[%c0_99, %c0_100], %120 {strides = array<i32>} : memref<73x32xf32, #tpu.memory_space<vmem>>, vector<20x32xf32>,
    %122 = arith.truncf %65 : vector<4x32xf32> to vector<4x32xbf16>
    %c0_101 = arith.constant 0 : index
    %c0_102 = arith.constant 0 : index
    %123 = vector.load %arg15[%c0_101, %c0_102] : memref<32x32xbf16, #tpu.memory_space<vmem>>, vector<32x32xbf16>
    %cst_103 = arith.constant dense<0.000000e+00> : vector<4x32xf32>
    %124 = tpu.matmul %122, %123, %cst_103 {dimension_numbers = #tpu.dot_dimension_numbers<[1], [0], [0], [1], [0, 0, 1, 1], [], []>} : vector<4x32xbf16>, vector<32x32xbf16>, vector<4x32xf32> -> vector<4x32xf32>
    %c0_104 = arith.constant 0 : index
    %c0_105 = arith.constant 0 : index
    %125 = vector.load %arg16[%c0_104, %c0_105] : memref<1x32xf32, #tpu.memory_space<vmem>>, vector<1x32xf32>
    %c0_106 = arith.constant 0 : index
    %c0_107 = arith.constant 0 : index
    %126 = vector.load %arg17[%c0_106, %c0_107] : memref<1x32xf32, #tpu.memory_space<vmem>>, vector<1x32xf32>
    %cst_108 = arith.constant 0.000000e+00 : f32
    %127 = vector.broadcast %cst_108 : f32 to vector<4x32xf32>
    %128 = arith.cmpf oge, %124, %127 : vector<4x32xf32>
    %cst_109 = arith.constant 2.000000e-01 : f32
    %129 = vector.broadcast %cst_109 : f32 to vector<4x32xf32>
    %130 = arith.mulf %129, %124 : vector<4x32xf32>
    %131 = arith.select %128, %124, %130 : vector<4x32xi1>, vector<4x32xf32>
    %132 = vector.broadcast %125 : vector<1x32xf32> to vector<4x32xf32>
    %133 = arith.mulf %131, %132 : vector<4x32xf32>
    %134 = vector.broadcast %126 : vector<1x32xf32> to vector<4x32xf32>
    %135 = arith.addf %133, %134 : vector<4x32xf32>
    %c20 = arith.constant 20 : index
    %c0_110 = arith.constant 0 : index
    %136 = vector.load %arg43[%c20, %c0_110] : memref<73x32xf32, #tpu.memory_space<vmem>>, vector<4x32xf32>
    tpu.vector_store %arg43[%c20, %c0_110], %135 {strides = array<i32>} : memref<73x32xf32, #tpu.memory_space<vmem>>, vector<4x32xf32>,
    %137 = arith.truncf %106 : vector<1x32xf32> to vector<1x32xbf16>
    %c0_111 = arith.constant 0 : index
    %c0_112 = arith.constant 0 : index
    %138 = vector.load %arg15[%c0_111, %c0_112] : memref<32x32xbf16, #tpu.memory_space<vmem>>, vector<32x32xbf16>
    %cst_113 = arith.constant dense<0.000000e+00> : vector<1x32xf32>
    %139 = tpu.matmul %137, %138, %cst_113 {dimension_numbers = #tpu.dot_dimension_numbers<[1], [0], [0], [1], [0, 0, 1, 1], [], []>} : vector<1x32xbf16>, vector<32x32xbf16>, vector<1x32xf32> -> vector<1x32xf32>
    %c0_114 = arith.constant 0 : index
    %c0_115 = arith.constant 0 : index
    %140 = vector.load %arg16[%c0_114, %c0_115] : memref<1x32xf32, #tpu.memory_space<vmem>>, vector<1x32xf32>
    %c0_116 = arith.constant 0 : index
    %c0_117 = arith.constant 0 : index
    %141 = vector.load %arg17[%c0_116, %c0_117] : memref<1x32xf32, #tpu.memory_space<vmem>>, vector<1x32xf32>
    %cst_118 = arith.constant 0.000000e+00 : f32
    %142 = vector.broadcast %cst_118 : f32 to vector<1x32xf32>
    %143 = arith.cmpf oge, %139, %142 : vector<1x32xf32>
    %cst_119 = arith.constant 2.000000e-01 : f32
    %144 = vector.broadcast %cst_119 : f32 to vector<1x32xf32>
    %145 = arith.mulf %144, %139 : vector<1x32xf32>
    %146 = arith.select %143, %139, %145 : vector<1x32xi1>, vector<1x32xf32>
    %147 = arith.mulf %146, %140 : vector<1x32xf32>
    %148 = arith.addf %147, %141 : vector<1x32xf32>
    %c24 = arith.constant 24 : index
    %c0_120 = arith.constant 0 : index
    %149 = vector.load %arg43[%c24, %c0_120] : memref<73x32xf32, #tpu.memory_space<vmem>>, vector<1x32xf32>
    tpu.vector_store %arg43[%c24, %c0_120], %148 {strides = array<i32>} : memref<73x32xf32, #tpu.memory_space<vmem>>, vector<1x32xf32>,
    %c0_121 = arith.constant 0 : index
    %c0_122 = arith.constant 0 : index
    %c0_123 = arith.constant 0 : index
    %150 = vector.load %arg2[%c0_121, %c0_122, %c0_123] : memref<1x16x3xbf16, #tpu.memory_space<vmem>>, vector<1x16x3xbf16>
    %151 = vector.shape_cast %150 : vector<1x16x3xbf16> to vector<16x3xbf16>
    %c0_124 = arith.constant 0 : index
    %c0_125 = arith.constant 0 : index
    %152 = vector.load %arg18[%c0_124, %c0_125] : memref<3x32xbf16, #tpu.memory_space<vmem>>, vector<3x32xbf16>
    %cst_126 = arith.constant dense<0.000000e+00> : vector<16x32xf32>
    %153 = tpu.matmul %151, %152, %cst_126 {dimension_numbers = #tpu.dot_dimension_numbers<[1], [0], [0], [1], [0, 0, 1, 1], [], []>} : vector<16x3xbf16>, vector<3x32xbf16>, vector<16x32xf32> -> vector<16x32xf32>
    %c0_127 = arith.constant 0 : index
    %c0_128 = arith.constant 0 : index
    %154 = vector.load %arg19[%c0_127, %c0_128] : memref<1x32xf32, #tpu.memory_space<vmem>>, vector<1x32xf32>
    %c0_129 = arith.constant 0 : index
    %c0_130 = arith.constant 0 : index
    %155 = vector.load %arg20[%c0_129, %c0_130] : memref<1x32xf32, #tpu.memory_space<vmem>>, vector<1x32xf32>
    %cst_131 = arith.constant 0.000000e+00 : f32
    %156 = vector.broadcast %cst_131 : f32 to vector<16x32xf32>
    %157 = arith.cmpf oge, %153, %156 : vector<16x32xf32>
    %cst_132 = arith.constant 2.000000e-01 : f32
    %158 = vector.broadcast %cst_132 : f32 to vector<16x32xf32>
    %159 = arith.mulf %158, %153 : vector<16x32xf32>
    %160 = arith.select %157, %153, %159 : vector<16x32xi1>, vector<16x32xf32>
    %161 = vector.broadcast %154 : vector<1x32xf32> to vector<16x32xf32>
    %162 = arith.mulf %160, %161 : vector<16x32xf32>
    %163 = vector.broadcast %155 : vector<1x32xf32> to vector<16x32xf32>
    %164 = arith.addf %162, %163 : vector<16x32xf32>
    %c25 = arith.constant 25 : index
    %c0_133 = arith.constant 0 : index
    %165 = vector.load %arg43[%c25, %c0_133] : memref<73x32xf32, #tpu.memory_space<vmem>>, vector<16x32xf32>
    tpu.vector_store %arg43[%c25, %c0_133], %164 {strides = array<i32>} : memref<73x32xf32, #tpu.memory_space<vmem>>, vector<16x32xf32>,
    %c0_134 = arith.constant 0 : index
    %c0_135 = arith.constant 0 : index
    %166 = vector.load %arg21[%c0_134, %c0_135] : memref<32x16xbf16, #tpu.memory_space<vmem>>, vector<32x16xbf16>
    %c0_136 = arith.constant 0 : index
    %c0_137 = arith.constant 0 : index
    %c0_138 = arith.constant 0 : index
    %167 = vector.load %arg3[%c0_136, %c0_137, %c0_138] : memref<1x16x1xbf16, #tpu.memory_space<vmem>>, vector<1x16x1xbf16>
    %168 = vector.shape_cast %167 : vector<1x16x1xbf16> to vector<16x1xbf16>
    %cst_139 = arith.constant dense<0.000000e+00> : vector<32x1xf32>
    %169 = tpu.matmul %166, %168, %cst_139 {dimension_numbers = #tpu.dot_dimension_numbers<[1], [0], [0], [1], [0, 0, 1, 1], [], []>} : vector<32x16xbf16>, vector<16x1xbf16>, vector<32x1xf32> -> vector<32x1xf32>
    %c0_140 = arith.constant 0 : index
    %c0_141 = arith.constant 0 : index
    %170 = vector.load %arg22[%c0_140, %c0_141] : memref<32x1xf32, #tpu.memory_space<vmem>>, vector<32x1xf32>
    %c0_142 = arith.constant 0 : index
    %c0_143 = arith.constant 0 : index
    %171 = vector.load %arg23[%c0_142, %c0_143] : memref<32x1xf32, #tpu.memory_space<vmem>>, vector<32x1xf32>
    %cst_144 = arith.constant 0.000000e+00 : f32
    %172 = vector.broadcast %cst_144 : f32 to vector<32x1xf32>
    %173 = arith.cmpf oge, %169, %172 : vector<32x1xf32>
    %cst_145 = arith.constant 2.000000e-01 : f32
    %174 = vector.broadcast %cst_145 : f32 to vector<32x1xf32>
    %175 = arith.mulf %174, %169 : vector<32x1xf32>
    %176 = arith.select %173, %169, %175 : vector<32x1xi1>, vector<32x1xf32>
    %177 = arith.mulf %176, %170 : vector<32x1xf32>
    %178 = arith.addf %177, %171 : vector<32x1xf32>
    %179 = vector.shape_cast %178 : vector<32x1xf32> to vector<32x1xf32>
    %180 = vector.broadcast %179 : vector<32x1xf32> to vector<32x32xf32>
    %c41 = arith.constant 41 : index
    %c0_146 = arith.constant 0 : index
    %181 = vector.load %arg43[%c41, %c0_146] : memref<73x32xf32, #tpu.memory_space<vmem>>, vector<32x32xf32>
    tpu.vector_store %arg43[%c41, %c0_146], %180 {strides = array<i32>} : memref<73x32xf32, #tpu.memory_space<vmem>>, vector<32x32xf32>,
    %c0_147 = arith.constant 0 : index
    %c0_148 = arith.constant 0 : index
    %182 = vector.load %arg43[%c0_147, %c0_148] : memref<73x32xf32, #tpu.memory_space<vmem>>, vector<73x32xf32>
    %183 = arith.truncf %182 : vector<73x32xf32> to vector<73x32xbf16>
    %c0_149 = arith.constant 0 : index
    %c0_150 = arith.constant 0 : index
    %184 = vector.load %arg24[%c0_149, %c0_150] : memref<16x32xbf16, #tpu.memory_space<vmem>>, vector<16x32xbf16>
    %cst_151 = arith.constant dense<0.000000e+00> : vector<16x73xf32>
    %185 = tpu.matmul %184, %183, %cst_151 {dimension_numbers = #tpu.dot_dimension_numbers<[1], [1], [0], [0], [0, 0, 1, 0], [], []>} : vector<16x32xbf16>, vector<73x32xbf16>, vector<16x73xf32> -> vector<16x73xf32>
    %c0_152 = arith.constant 0 : index
    %c0_153 = arith.constant 0 : index
    %186 = vector.load %arg25[%c0_152, %c0_153] : memref<16x1xf32, #tpu.memory_space<vmem>>, vector<16x1xf32>
    %c0_154 = arith.constant 0 : index
    %c0_155 = arith.constant 0 : index
    %187 = vector.load %arg26[%c0_154, %c0_155] : memref<16x1xf32, #tpu.memory_space<vmem>>, vector<16x1xf32>
    %cst_156 = arith.constant 0.000000e+00 : f32
    %188 = vector.broadcast %cst_156 : f32 to vector<16x73xf32>
    %189 = arith.cmpf oge, %185, %188 : vector<16x73xf32>
    %cst_157 = arith.constant 2.000000e-01 : f32
    %190 = vector.broadcast %cst_157 : f32 to vector<16x73xf32>
    %191 = arith.mulf %190, %185 : vector<16x73xf32>
    %192 = arith.select %189, %185, %191 : vector<16x73xi1>, vector<16x73xf32>
    %193 = vector.broadcast %186 : vector<16x1xf32> to vector<16x73xf32>
    %194 = arith.mulf %192, %193 : vector<16x73xf32>
    %195 = vector.broadcast %187 : vector<16x1xf32> to vector<16x73xf32>
    %196 = arith.addf %194, %195 : vector<16x73xf32>
    %197 = arith.truncf %196 : vector<16x73xf32> to vector<16x73xbf16>
    %c0_158 = arith.constant 0 : index
    %c0_159 = arith.constant 0 : index
    %198 = vector.load %arg27[%c0_158, %c0_159] : memref<73x1024xbf16, #tpu.memory_space<vmem>>, vector<73x1024xbf16>
    %cst_160 = arith.constant dense<0.000000e+00> : vector<16x1024xf32>
    %199 = tpu.matmul %197, %198, %cst_160 {dimension_numbers = #tpu.dot_dimension_numbers<[1], [0], [0], [1], [0, 0, 1, 1], [], []>} : vector<16x73xbf16>, vector<73x1024xbf16>, vector<16x1024xf32> -> vector<16x1024xf32>
    %c0_161 = arith.constant 0 : index
    %c0_162 = arith.constant 0 : index
    %200 = vector.load %arg28[%c0_161, %c0_162] : memref<1x1024xf32, #tpu.memory_space<vmem>>, vector<1x1024xf32>
    %c0_163 = arith.constant 0 : index
    %c0_164 = arith.constant 0 : index
    %201 = vector.load %arg29[%c0_163, %c0_164] : memref<1x1024xf32, #tpu.memory_space<vmem>>, vector<1x1024xf32>
    %cst_165 = arith.constant 0.000000e+00 : f32
    %202 = vector.broadcast %cst_165 : f32 to vector<16x1024xf32>
    %203 = arith.cmpf oge, %199, %202 : vector<16x1024xf32>
    %cst_166 = arith.constant 2.000000e-01 : f32
    %204 = vector.broadcast %cst_166 : f32 to vector<16x1024xf32>
    %205 = arith.mulf %204, %199 : vector<16x1024xf32>
    %206 = arith.select %203, %199, %205 : vector<16x1024xi1>, vector<16x1024xf32>
    %207 = vector.broadcast %200 : vector<1x1024xf32> to vector<16x1024xf32>
    %208 = arith.mulf %206, %207 : vector<16x1024xf32>
    %209 = vector.broadcast %201 : vector<1x1024xf32> to vector<16x1024xf32>
    %210 = arith.addf %208, %209 : vector<16x1024xf32>
    %211 = arith.truncf %210 : vector<16x1024xf32> to vector<16x1024xbf16>
    %c0_167 = arith.constant 0 : index
    %c0_168 = arith.constant 0 : index
    %212 = vector.load %arg30[%c0_167, %c0_168] : memref<1024x512xbf16, #tpu.memory_space<vmem>>, vector<1024x512xbf16>
    %cst_169 = arith.constant dense<0.000000e+00> : vector<16x512xf32>
    %213 = tpu.matmul %211, %212, %cst_169 {dimension_numbers = #tpu.dot_dimension_numbers<[1], [0], [0], [1], [0, 0, 1, 1], [], []>} : vector<16x1024xbf16>, vector<1024x512xbf16>, vector<16x512xf32> -> vector<16x512xf32>
    %c0_170 = arith.constant 0 : index
    %c0_171 = arith.constant 0 : index
    %214 = vector.load %arg31[%c0_170, %c0_171] : memref<1x512xf32, #tpu.memory_space<vmem>>, vector<1x512xf32>
    %c0_172 = arith.constant 0 : index
    %c0_173 = arith.constant 0 : index
    %215 = vector.load %arg32[%c0_172, %c0_173] : memref<1x512xf32, #tpu.memory_space<vmem>>, vector<1x512xf32>
    %cst_174 = arith.constant 0.000000e+00 : f32
    %216 = vector.broadcast %cst_174 : f32 to vector<16x512xf32>
    %217 = arith.cmpf oge, %213, %216 : vector<16x512xf32>
    %cst_175 = arith.constant 2.000000e-01 : f32
    %218 = vector.broadcast %cst_175 : f32 to vector<16x512xf32>
    %219 = arith.mulf %218, %213 : vector<16x512xf32>
    %220 = arith.select %217, %213, %219 : vector<16x512xi1>, vector<16x512xf32>
    %221 = vector.broadcast %214 : vector<1x512xf32> to vector<16x512xf32>
    %222 = arith.mulf %220, %221 : vector<16x512xf32>
    %223 = vector.broadcast %215 : vector<1x512xf32> to vector<16x512xf32>
    %224 = arith.addf %222, %223 : vector<16x512xf32>
    %225 = arith.truncf %224 : vector<16x512xf32> to vector<16x512xbf16>
    %c0_176 = arith.constant 0 : index
    %c0_177 = arith.constant 0 : index
    %226 = vector.load %arg33[%c0_176, %c0_177] : memref<512x256xbf16, #tpu.memory_space<vmem>>, vector<512x256xbf16>
    %cst_178 = arith.constant dense<0.000000e+00> : vector<16x256xf32>
    %227 = tpu.matmul %225, %226, %cst_178 {dimension_numbers = #tpu.dot_dimension_numbers<[1], [0], [0], [1], [0, 0, 1, 1], [], []>} : vector<16x512xbf16>, vector<512x256xbf16>, vector<16x256xf32> -> vector<16x256xf32>
    %c0_179 = arith.constant 0 : index
    %c0_180 = arith.constant 0 : index
    %228 = vector.load %arg34[%c0_179, %c0_180] : memref<1x256xf32, #tpu.memory_space<vmem>>, vector<1x256xf32>
    %c0_181 = arith.constant 0 : index
    %c0_182 = arith.constant 0 : index
    %229 = vector.load %arg35[%c0_181, %c0_182] : memref<1x256xf32, #tpu.memory_space<vmem>>, vector<1x256xf32>
    %cst_183 = arith.constant 0.000000e+00 : f32
    %230 = vector.broadcast %cst_183 : f32 to vector<16x256xf32>
    %231 = arith.cmpf oge, %227, %230 : vector<16x256xf32>
    %cst_184 = arith.constant 2.000000e-01 : f32
    %232 = vector.broadcast %cst_184 : f32 to vector<16x256xf32>
    %233 = arith.mulf %232, %227 : vector<16x256xf32>
    %234 = arith.select %231, %227, %233 : vector<16x256xi1>, vector<16x256xf32>
    %235 = vector.broadcast %228 : vector<1x256xf32> to vector<16x256xf32>
    %236 = arith.mulf %234, %235 : vector<16x256xf32>
    %237 = vector.broadcast %229 : vector<1x256xf32> to vector<16x256xf32>
    %238 = arith.addf %236, %237 : vector<16x256xf32>
    %239 = arith.truncf %238 : vector<16x256xf32> to vector<16x256xbf16>
    %c0_185 = arith.constant 0 : index
    %c0_186 = arith.constant 0 : index
    %240 = vector.load %arg36[%c0_185, %c0_186] : memref<256x128xbf16, #tpu.memory_space<vmem>>, vector<256x128xbf16>
    %cst_187 = arith.constant dense<0.000000e+00> : vector<16x128xf32>
    %241 = tpu.matmul %239, %240, %cst_187 {dimension_numbers = #tpu.dot_dimension_numbers<[1], [0], [0], [1], [0, 0, 1, 1], [], []>} : vector<16x256xbf16>, vector<256x128xbf16>, vector<16x128xf32> -> vector<16x128xf32>
    %c0_188 = arith.constant 0 : index
    %c0_189 = arith.constant 0 : index
    %242 = vector.load %arg37[%c0_188, %c0_189] : memref<1x128xf32, #tpu.memory_space<vmem>>, vector<1x128xf32>
    %c0_190 = arith.constant 0 : index
    %c0_191 = arith.constant 0 : index
    %243 = vector.load %arg38[%c0_190, %c0_191] : memref<1x128xf32, #tpu.memory_space<vmem>>, vector<1x128xf32>
    %cst_192 = arith.constant 0.000000e+00 : f32
    %244 = vector.broadcast %cst_192 : f32 to vector<16x128xf32>
    %245 = arith.cmpf oge, %241, %244 : vector<16x128xf32>
    %cst_193 = arith.constant 2.000000e-01 : f32
    %246 = vector.broadcast %cst_193 : f32 to vector<16x128xf32>
    %247 = arith.mulf %246, %241 : vector<16x128xf32>
    %248 = arith.select %245, %241, %247 : vector<16x128xi1>, vector<16x128xf32>
    %249 = vector.broadcast %242 : vector<1x128xf32> to vector<16x128xf32>
    %250 = arith.mulf %248, %249 : vector<16x128xf32>
    %251 = vector.broadcast %243 : vector<1x128xf32> to vector<16x128xf32>
    %252 = arith.addf %250, %251 : vector<16x128xf32>
    %253 = arith.truncf %252 : vector<16x128xf32> to vector<16x128xbf16>
    %c0_194 = arith.constant 0 : index
    %c0_195 = arith.constant 0 : index
    %254 = vector.load %arg39[%c0_194, %c0_195] : memref<128x128xbf16, #tpu.memory_space<vmem>>, vector<128x128xbf16>
    %cst_196 = arith.constant dense<0.000000e+00> : vector<16x128xf32>
    %255 = tpu.matmul %253, %254, %cst_196 {dimension_numbers = #tpu.dot_dimension_numbers<[1], [0], [0], [1], [0, 0, 1, 1], [], []>} : vector<16x128xbf16>, vector<128x128xbf16>, vector<16x128xf32> -> vector<16x128xf32>
    %c0_197 = arith.constant 0 : index
    %c0_198 = arith.constant 0 : index
    %256 = vector.load %arg40[%c0_197, %c0_198] : memref<1x128xf32, #tpu.memory_space<vmem>>, vector<1x128xf32>
    %c0_199 = arith.constant 0 : index
    %c0_200 = arith.constant 0 : index
    %257 = vector.load %arg41[%c0_199, %c0_200] : memref<1x128xf32, #tpu.memory_space<vmem>>, vector<1x128xf32>
    %cst_201 = arith.constant 0.000000e+00 : f32
    %258 = vector.broadcast %cst_201 : f32 to vector<16x128xf32>
    %259 = arith.cmpf oge, %255, %258 : vector<16x128xf32>
    %cst_202 = arith.constant 2.000000e-01 : f32
    %260 = vector.broadcast %cst_202 : f32 to vector<16x128xf32>
    %261 = arith.mulf %260, %255 : vector<16x128xf32>
    %262 = arith.select %259, %255, %261 : vector<16x128xi1>, vector<16x128xf32>
    %263 = vector.broadcast %256 : vector<1x128xf32> to vector<16x128xf32>
    %264 = arith.mulf %262, %263 : vector<16x128xf32>
    %265 = vector.broadcast %257 : vector<1x128xf32> to vector<16x128xf32>
    %266 = arith.addf %264, %265 : vector<16x128xf32>
    %c0_203 = arith.constant 0 : index
    %c0_204 = arith.constant 0 : index
    %c0_205 = arith.constant 0 : index
    %267 = vector.load %arg42[%c0_203, %c0_204, %c0_205] : memref<1x16x128xf32, #tpu.memory_space<vmem>>, vector<1x16x128xf32>
    %268 = vector.shape_cast %267 : vector<1x16x128xf32> to vector<16x128xf32>
    %269 = vector.shape_cast %266 : vector<16x128xf32> to vector<1x16x128xf32>
    tpu.vector_store %arg42[%c0_203, %c0_204, %c0_205], %269 {strides = array<i32>} : memref<1x16x128xf32, #tpu.memory_space<vmem>>, vector<1x16x128xf32>,
    return
  }
  func.func @transform_0(%arg0: i32) -> (i32, i32, i32) {
    %c0_i32 = arith.constant 0 : i32
    %c0_i32_0 = arith.constant 0 : i32
    %c0_i32_1 = arith.constant 0 : i32
    return %arg0, %c0_i32, %c0_i32_0 : i32, i32, i32
  }
  func.func @transform_1(%arg0: i32) -> (i32, i32, i32) {
    %c0_i32 = arith.constant 0 : i32
    %c0_i32_0 = arith.constant 0 : i32
    %c0_i32_1 = arith.constant 0 : i32
    return %arg0, %c0_i32, %c0_i32_0 : i32, i32, i32
  }
  func.func @transform_2(%arg0: i32) -> (i32, i32, i32) {
    %c0_i32 = arith.constant 0 : i32
    %c0_i32_0 = arith.constant 0 : i32
    %c0_i32_1 = arith.constant 0 : i32
    return %arg0, %c0_i32, %c0_i32_0 : i32, i32, i32
  }
  func.func @transform_3(%arg0: i32) -> (i32, i32, i32) {
    %c0_i32 = arith.constant 0 : i32
    %c0_i32_0 = arith.constant 0 : i32
    %c0_i32_1 = arith.constant 0 : i32
    %c0_i32_2 = arith.constant 0 : i32
    return %c0_i32, %c0_i32_0, %c0_i32_1 : i32, i32, i32
  }
  func.func @transform_4(%arg0: i32) -> (i32, i32, i32) {
    %c0_i32 = arith.constant 0 : i32
    %c0_i32_0 = arith.constant 0 : i32
    %c0_i32_1 = arith.constant 0 : i32
    %c0_i32_2 = arith.constant 0 : i32
    return %c0_i32, %c0_i32_0, %c0_i32_1 : i32, i32, i32
  }
  func.func @transform_5(%arg0: i32) -> (i32, i32) {
    %c0_i32 = arith.constant 0 : i32
    %c0_i32_0 = arith.constant 0 : i32
    %c0_i32_1 = arith.constant 0 : i32
    return %c0_i32, %c0_i32_0 : i32, i32
  }
  func.func @transform_6(%arg0: i32) -> (i32, i32) {
    %c0_i32 = arith.constant 0 : i32
    %c0_i32_0 = arith.constant 0 : i32
    %c0_i32_1 = arith.constant 0 : i32
    return %c0_i32, %c0_i32_0 : i32, i32
  }
  func.func @transform_7(%arg0: i32) -> (i32, i32) {
    %c0_i32 = arith.constant 0 : i32
    %c0_i32_0 = arith.constant 0 : i32
    %c0_i32_1 = arith.constant 0 : i32
    return %c0_i32, %c0_i32_0 : i32, i32
  }
  func.func @transform_8(%arg0: i32) -> (i32, i32, i32) {
    %c0_i32 = arith.constant 0 : i32
    %c0_i32_0 = arith.constant 0 : i32
    %c0_i32_1 = arith.constant 0 : i32
    %c0_i32_2 = arith.constant 0 : i32
    return %c0_i32, %c0_i32_0, %c0_i32_1 : i32, i32, i32
  }
  func.func @transform_9(%arg0: i32) -> (i32, i32) {
    %c0_i32 = arith.constant 0 : i32
    %c0_i32_0 = arith.constant 0 : i32
    %c0_i32_1 = arith.constant 0 : i32
    return %c0_i32, %c0_i32_0 : i32, i32
  }
  func.func @transform_10(%arg0: i32) -> (i32, i32) {
    %c0_i32 = arith.constant 0 : i32
    %c0_i32_0 = arith.constant 0 : i32
    %c0_i32_1 = arith.constant 0 : i32
    return %c0_i32, %c0_i32_0 : i32, i32
  }
  func.func @transform_11(%arg0: i32) -> (i32, i32, i32) {
    %c0_i32 = arith.constant 0 : i32
    %c0_i32_0 = arith.constant 0 : i32
    %c0_i32_1 = arith.constant 0 : i32
    %c0_i32_2 = arith.constant 0 : i32
    return %c0_i32, %c0_i32_0, %c0_i32_1 : i32, i32, i32
  }
  func.func @transform_12(%arg0: i32) -> (i32, i32) {
    %c0_i32 = arith.constant 0 : i32
    %c0_i32_0 = arith.constant 0 : i32
    %c0_i32_1 = arith.constant 0 : i32
    return %c0_i32, %c0_i32_0 : i32, i32
  }
  func.func @transform_13(%arg0: i32) -> (i32, i32) {
    %c0_i32 = arith.constant 0 : i32
    %c0_i32_0 = arith.constant 0 : i32
    %c0_i32_1 = arith.constant 0 : i32
    return %c0_i32, %c0_i32_0 : i32, i32
  }
  func.func @transform_14(%arg0: i32) -> (i32, i32) {
    %c0_i32 = arith.constant 0 : i32
    %c0_i32_0 = arith.constant 0 : i32
    %c0_i32_1 = arith.constant 0 : i32
    return %c0_i32, %c0_i32_0 : i32, i32
  }
  func.func @transform_15(%arg0: i32) -> (i32, i32) {
    %c0_i32 = arith.constant 0 : i32
    %c0_i32_0 = arith.constant 0 : i32
    %c0_i32_1 = arith.constant 0 : i32
    return %c0_i32, %c0_i32_0 : i32, i32
  }
  func.func @transform_16(%arg0: i32) -> (i32, i32) {
    %c0_i32 = arith.constant 0 : i32
    %c0_i32_0 = arith.constant 0 : i32
    %c0_i32_1 = arith.constant 0 : i32
    return %c0_i32, %c0_i32_0 : i32, i32
  }
  func.func @transform_17(%arg0: i32) -> (i32, i32) {
    %c0_i32 = arith.constant 0 : i32
    %c0_i32_0 = arith.constant 0 : i32
    %c0_i32_1 = arith.constant 0 : i32
    return %c0_i32, %c0_i32_0 : i32, i32
  }
  func.func @transform_18(%arg0: i32) -> (i32, i32) {
    %c0_i32 = arith.constant 0 : i32
    %c0_i32_0 = arith.constant 0 : i32
    %c0_i32_1 = arith.constant 0 : i32
    return %c0_i32, %c0_i32_0 : i32, i32
  }
  func.func @transform_19(%arg0: i32) -> (i32, i32) {
    %c0_i32 = arith.constant 0 : i32
    %c0_i32_0 = arith.constant 0 : i32
    %c0_i32_1 = arith.constant 0 : i32
    return %c0_i32, %c0_i32_0 : i32, i32
  }
  func.func @transform_20(%arg0: i32) -> (i32, i32) {
    %c0_i32 = arith.constant 0 : i32
    %c0_i32_0 = arith.constant 0 : i32
    %c0_i32_1 = arith.constant 0 : i32
    return %c0_i32, %c0_i32_0 : i32, i32
  }
  func.func @transform_21(%arg0: i32) -> (i32, i32) {
    %c0_i32 = arith.constant 0 : i32
    %c0_i32_0 = arith.constant 0 : i32
    %c0_i32_1 = arith.constant 0 : i32
    return %c0_i32, %c0_i32_0 : i32, i32
  }
  func.func @transform_22(%arg0: i32) -> (i32, i32) {
    %c0_i32 = arith.constant 0 : i32
    %c0_i32_0 = arith.constant 0 : i32
    %c0_i32_1 = arith.constant 0 : i32
    return %c0_i32, %c0_i32_0 : i32, i32
  }
  func.func @transform_23(%arg0: i32) -> (i32, i32) {
    %c0_i32 = arith.constant 0 : i32
    %c0_i32_0 = arith.constant 0 : i32
    %c0_i32_1 = arith.constant 0 : i32
    return %c0_i32, %c0_i32_0 : i32, i32
  }
  func.func @transform_24(%arg0: i32) -> (i32, i32) {
    %c0_i32 = arith.constant 0 : i32
    %c0_i32_0 = arith.constant 0 : i32
    %c0_i32_1 = arith.constant 0 : i32
    return %c0_i32, %c0_i32_0 : i32, i32
  }
  func.func @transform_25(%arg0: i32) -> (i32, i32) {
    %c0_i32 = arith.constant 0 : i32
    %c0_i32_0 = arith.constant 0 : i32
    %c0_i32_1 = arith.constant 0 : i32
    return %c0_i32, %c0_i32_0 : i32, i32
  }
  func.func @transform_26(%arg0: i32) -> (i32, i32) {
    %c0_i32 = arith.constant 0 : i32
    %c0_i32_0 = arith.constant 0 : i32
    %c0_i32_1 = arith.constant 0 : i32
    return %c0_i32, %c0_i32_0 : i32, i32
  }
  func.func @transform_27(%arg0: i32) -> (i32, i32) {
    %c0_i32 = arith.constant 0 : i32
    %c0_i32_0 = arith.constant 0 : i32
    %c0_i32_1 = arith.constant 0 : i32
    return %c0_i32, %c0_i32_0 : i32, i32
  }
  func.func @transform_28(%arg0: i32) -> (i32, i32) {
    %c0_i32 = arith.constant 0 : i32
    %c0_i32_0 = arith.constant 0 : i32
    %c0_i32_1 = arith.constant 0 : i32
    return %c0_i32, %c0_i32_0 : i32, i32
  }
  func.func @transform_29(%arg0: i32) -> (i32, i32) {
    %c0_i32 = arith.constant 0 : i32
    %c0_i32_0 = arith.constant 0 : i32
    %c0_i32_1 = arith.constant 0 : i32
    return %c0_i32, %c0_i32_0 : i32, i32
  }
  func.func @transform_30(%arg0: i32) -> (i32, i32) {
    %c0_i32 = arith.constant 0 : i32
    %c0_i32_0 = arith.constant 0 : i32
    %c0_i32_1 = arith.constant 0 : i32
    return %c0_i32, %c0_i32_0 : i32, i32
  }
  func.func @transform_31(%arg0: i32) -> (i32, i32) {
    %c0_i32 = arith.constant 0 : i32
    %c0_i32_0 = arith.constant 0 : i32
    %c0_i32_1 = arith.constant 0 : i32
    return %c0_i32, %c0_i32_0 : i32, i32
  }
  func.func @transform_32(%arg0: i32) -> (i32, i32) {
    %c0_i32 = arith.constant 0 : i32
    %c0_i32_0 = arith.constant 0 : i32
    %c0_i32_1 = arith.constant 0 : i32
    return %c0_i32, %c0_i32_0 : i32, i32
  }
  func.func @transform_33(%arg0: i32) -> (i32, i32) {
    %c0_i32 = arith.constant 0 : i32
    %c0_i32_0 = arith.constant 0 : i32
    %c0_i32_1 = arith.constant 0 : i32
    return %c0_i32, %c0_i32_0 : i32, i32
  }
  func.func @transform_34(%arg0: i32) -> (i32, i32) {
    %c0_i32 = arith.constant 0 : i32
    %c0_i32_0 = arith.constant 0 : i32
    %c0_i32_1 = arith.constant 0 : i32
    return %c0_i32, %c0_i32_0 : i32, i32
  }
  func.func @transform_35(%arg0: i32) -> (i32, i32) {
    %c0_i32 = arith.constant 0 : i32
    %c0_i32_0 = arith.constant 0 : i32
    %c0_i32_1 = arith.constant 0 : i32
    return %c0_i32, %c0_i32_0 : i32, i32
  }
  func.func @transform_36(%arg0: i32) -> (i32, i32) {
    %c0_i32 = arith.constant 0 : i32
    %c0_i32_0 = arith.constant 0 : i32
    %c0_i32_1 = arith.constant 0 : i32
    return %c0_i32, %c0_i32_0 : i32, i32
  }
  func.func @transform_37(%arg0: i32) -> (i32, i32) {
    %c0_i32 = arith.constant 0 : i32
    %c0_i32_0 = arith.constant 0 : i32
    %c0_i32_1 = arith.constant 0 : i32
    return %c0_i32, %c0_i32_0 : i32, i32
  }
  func.func @transform_38(%arg0: i32) -> (i32, i32) {
    %c0_i32 = arith.constant 0 : i32
    %c0_i32_0 = arith.constant 0 : i32
    %c0_i32_1 = arith.constant 0 : i32
    return %c0_i32, %c0_i32_0 : i32, i32
  }
  func.func @transform_39(%arg0: i32) -> (i32, i32) {
    %c0_i32 = arith.constant 0 : i32
    %c0_i32_0 = arith.constant 0 : i32
    %c0_i32_1 = arith.constant 0 : i32
    return %c0_i32, %c0_i32_0 : i32, i32
  }
  func.func @transform_40(%arg0: i32) -> (i32, i32) {
    %c0_i32 = arith.constant 0 : i32
    %c0_i32_0 = arith.constant 0 : i32
    %c0_i32_1 = arith.constant 0 : i32
    return %c0_i32, %c0_i32_0 : i32, i32
  }
  func.func @transform_41(%arg0: i32) -> (i32, i32, i32) {
    %c0_i32 = arith.constant 0 : i32
    %c0_i32_0 = arith.constant 0 : i32
    %c0_i32_1 = arith.constant 0 : i32
    return %arg0, %c0_i32, %c0_i32_0 : i32, i32, i32
  }
}

</mosaic_0001>

<bundles_post_ra>
// kernel: octree_caps_partseg_forward.1
= control target key start
LH: loop header
LB: loop body
LE: loop exit
PB: predicated region body
PF: predicated region fallthrough
CT: control target
= control target key end

     0   :  { %s9574_s6 = smov 1   ;;  %s9575_s10 = smov 2   ;;  %s10689_s0 = inlined_call_operand.smem [shape: u32[42], index: -1, kind: input, shape index: {}] }
   0x1   :  { %s9658_s5 = sld [smem:[%s10689_s0]]   ;;  %s9576_s14 = smov 3  }
   0x2   :  { %s9663_s9 = sld [smem:[%s10689_s0 + %s9574_s6]]   ;;  %s9577_s18 = smov 4  }
   0x3   :  { %s9668_s13 = sld [smem:[%s10689_s0 + %s9575_s10]]   ;;  %s9578_s22 = smov 5  }
   0x4   :  { %s9673_s17 = sld [smem:[%s10689_s0 + %s9576_s14]]   ;;  %s9579_s26 = smov 6  }
   0x5   :  { %s9678_s21 = sld [smem:[%s10689_s0 + %s9577_s18]]   ;;  %s9580_s30 = smov 7  }
   0x6   :  { %s9683_s25 = sld [smem:[%s10689_s0 + %s9578_s22]]   ;;  %s9581_s4 = smov 8  }
   0x7   :  { %10723 = sst [smem:[#allocation54_spill]] %s9658_s5  ;;  %s9582_s10 = smov 9  }
   0x8   :  { %10724 = sst [smem:[#allocation55_spill]] %s9663_s9  ;;  %s9583_s15 = smov 10  }
   0x9   :  { %10725 = sst [smem:[#allocation56_spill]] %s9668_s13  ;;  %s9584_s20 = smov 11  }
   0xa   :  { %10726 = sst [smem:[#allocation57_spill]] %s9673_s17  ;;  %s9586_s1 = smov 13  }
   0xb   :  { %10727 = sst [smem:[#allocation58_spill]] %s9678_s21  ;;  %s9587_s7 = smov 14  }
   0xc   :  { %10728 = sst [smem:[#allocation59_spill]] %s9683_s25  ;;  %s9589_s22 = smov 16  }
   0xd   :  { %s9688_s29 = sld [smem:[%s10689_s0 + %s9579_s26]]   ;;  %s9585_s26 = smov 12  }
   0xe   :  { %s9693_s3 = sld [smem:[%s10689_s0 + %s9580_s30]]   ;;  %s9590_s28 = smov 17  }
   0xf   :  { %s9698_s8 = sld [smem:[%s10689_s0 + %s9581_s4]]  }
  0x10   :  { %s9703_s14 = sld [smem:[%s10689_s0 + %s9582_s10]]  }
  0x11   :  { %s9708_s19 = sld [smem:[%s10689_s0 + %s9583_s15]]   ;;  %s9588_s15 = smov 15  }
  0x12   :  { %s9713_s24 = sld [smem:[%s10689_s0 + %s9584_s20]]  }
  0x13   :  { %10729 = sst [smem:[#allocation60_spill]] %s9688_s29 }
  0x14   :  { %10730 = sst [smem:[#allocation61_spill]] %s9693_s3 }
  0x15   :  { %10731 = sst [smem:[#allocation62_spill]] %s9698_s8 }
  0x16   :  { %10732 = sst [smem:[#allocation63_spill]] %s9703_s14 }
  0x17   :  { %s9718_s30 = sld [smem:[%s10689_s0 + %s9585_s26]]  }
  0x18   :  { %s9723_s6 = sld [smem:[%s10689_s0 + %s9586_s1]]  }
  0x19   :  { %s9728_s12 = sld [smem:[%s10689_s0 + %s9587_s7]]   ;;  %s9591_s7 = smov 18  }
  0x1a   :  { %s9733_s20 = sld [smem:[%s10689_s0 + %s9588_s15]]   ;;  %s9592_s15 = smov 19  }
  0x1b   :  { %s9738_s27 = sld [smem:[%s10689_s0 + %s9589_s22]]   ;;  %s9593_s22 = smov 20  }
  0x1c   :  { %s9743_s4 = sld [smem:[%s10689_s0 + %s9590_s28]]   ;;  %s9594_s28 = smov 21  }
  0x1d   :  { %s9748_s9 = sld [smem:[%s10689_s0 + %s9591_s7]]   ;;  %s9595_s7 = smov 22  }
  0x1e   :  { %10733 = sst [smem:[#allocation64_spill]] %s9723_s6 }
  0x1f   :  { %10734 = sst [smem:[#allocation65_spill]] %s9728_s12 }
  0x20   :  { %s9753_s13 = sld [smem:[%s10689_s0 + %s9592_s15]]   ;;  %s9596_s15 = smov 23  }
  0x21   :  { %10735 = sst [smem:[#allocation66_spill]] %s9738_s27 }
  0x22   :  { %10736 = sst [smem:[#allocation67_spill]] %s9743_s4 }
  0x23   :  { %10737 = sst [smem:[#allocation68_spill]] %s9748_s9 }
  0x24   :  { %s9758_s12 = sld [smem:[%s10689_s0 + %s9593_s22]]   ;;  %s9597_s22 = smov 24  }
  0x25   :  { %s9763_s4 = sld [smem:[%s10689_s0 + %s9594_s28]]   ;;  %s9598_s28 = smov 25  }
  0x26   :  { %10738 = sst [smem:[#allocation69_spill]] %s9753_s13 }
  0x27   :  { %s9768_s21 = sld [smem:[%s10689_s0 + %s9595_s7]]   ;;  %s9599_s7 = smov 26  }
  0x28   :  { %s9773_s17 = sld [smem:[%s10689_s0 + %s9596_s15]]   ;;  %s9600_s15 = smov 27  }
  0x2a   :  { %10739 = sst [smem:[#allocation70_spill]] %s9758_s12 }
  0x2b   :  { %10740 = sst [smem:[#allocation71_spill]] %s9763_s4 }
  0x2c   :  { %s9778_s12 = sld [smem:[%s10689_s0 + %s9597_s22]]   ;;  %s9601_s22 = smov 28  }
  0x2d   :  { %10741 = sst [smem:[#allocation72_spill]] %s9768_s21 }
  0x2e   :  { %10742 = sst [smem:[#allocation73_spill]] %s9773_s17 }
  0x2f   :  { %s9783_s4 = sld [smem:[%s10689_s0 + %s9598_s28]]   ;;  %s9602_s28 = smov 29  }
  0x30   :  { %s9788_s21 = sld [smem:[%s10689_s0 + %s9599_s7]]   ;;  %s9603_s7 = smov 30  }
  0x31   :  { %s9793_s17 = sld [smem:[%s10689_s0 + %s9600_s15]]   ;;  %s9604_s15 = smov 31  }
  0x32   :  { %10743 = sst [smem:[#allocation74_spill]] %s9778_s12 }
  0x33   :  { %s9798_s12 = sld [smem:[%s10689_s0 + %s9601_s22]]   ;;  %s9605_s22 = smov 32  }
  0x34   :  { %s9813_s29 = sld [smem:[%s10689_s0 + %s9604_s15]]   ;;  %s9608_s15 = smov 35  }
  0x35   :  { %10744 = sst [smem:[#allocation75_spill]] %s9783_s4 }
  0x36   :  { %10745 = sst [smem:[#allocation76_spill]] %s9788_s21 }
  0x37   :  { %s9803_s4 = sld [smem:[%s10689_s0 + %s9602_s28]]   ;;  %s9606_s28 = smov 33  }
  0x38   :  { %s9808_s21 = sld [smem:[%s10689_s0 + %s9603_s7]]   ;;  %s9607_s7 = smov 34  }
  0x39   :  { %10746 = sst [smem:[#allocation77_spill]] %s9798_s12 }
  0x3a   :  { %s9818_s5 = sld [smem:[%s10689_s0 + %s9605_s22]]   ;;  %s9609_s22 = smov 36  }
  0x3b   :  { %s9823_s25 = sld [smem:[%s10689_s0 + %s9606_s28]]   ;;  %s9610_s28 = smov 37  }
  0x3c   :  { %s9833_s12 = sld [smem:[%s10689_s0 + %s9608_s15]]   ;;  %s9612_s15 = smov 39  }
  0x3d   :  { %10747 = sst [smem:[#allocation78_spill]] %s9803_s4 }
  0x3e   :  { %10748 = sst [smem:[#allocation79_spill]] %s9808_s21 }
  0x3f   :  { %s9828_s21 = sld [smem:[%s10689_s0 + %s9607_s7]]   ;;  %s9611_s7 = smov 38  }
  0x40   :  { %10749 = sst [smem:[#allocation80_spill]] %s9818_s5 }
  0x41   :  { %s9838_s5 = sld [smem:[%s10689_s0 + %s9609_s22]]   ;;  %s9613_s22 = smov 40  }
  0x42   :  { %10751 = sst [smem:[#allocation82_spill]] %s9833_s12 }
  0x43   :  { %s9843_s13 = sld [smem:[%s10689_s0 + %s9610_s28]]   ;;  %s9614_s28 = smov 41  }
  0x44   :  { %s9853_s27 = sld [smem:[%s10689_s0 + %s9612_s15]]  }
  0x45   :  { %10750 = sst [smem:[#allocation81_spill]] %s9828_s21 }
  0x46   :  { %s9848_s21 = sld [smem:[%s10689_s0 + %s9611_s7]]  }
  0x47   :  { %10752 = sst [smem:[#allocation83_spill]] %s9838_s5 }
  0x48   :  { %s9858_s5 = sld [smem:[%s10689_s0 + %s9613_s22]]  }
  0x49   :  { %10753 = sst [smem:[#allocation84_spill]] %s9843_s13 }
  0x4a   :  { %s9863_s6 = sld [smem:[%s10689_s0 + %s9614_s28]]  }
  0x4b   :  { %88 = vsyncpa [#allocation4], 0 }
  0x4c   :  { %89 = vsyncpa [#allocation6], 0 }
  0x4d   :  { %90 = vsyncpa [#allocation9], 0 }
  0x4e   :  { %91 = vsyncpa [#allocation12], 0 }
  0x4f   :  { %92 = vsyncpa [#allocation15], 0 }
  0x50   :  { %93 = vsyncpa [#allocation18], 0 }
  0x51   :  { %94 = vsyncpa [#allocation21], 0 }
  0x52   :  { %95 = vsyncpa [#allocation24], 0 }
  0x53   :  { %96 = vsyncpa [#allocation27], 0 }
  0x54   :  { %97 = vsyncpa [#allocation30], 0 }
  0x55   :  { %98 = vsyncpa [#allocation33], 0 }
  0x56   :  { %99 = vsyncpa [#allocation36], 0 }
  0x57   :  { %100 = vsyncpa [#allocation39], 0  ;;  %s9865_s7 = smov 0  }
  0x58 LB: > { %s10754_s14 = sld [smem:[#allocation63_spill]]  ;;  %s10755_s13 = sld [smem:[#allocation84_spill]]  ;;  %s9572_s7 = sphi %s9865_s7, %s106_s7  }
  0x59   : > { %s10756_s12 = sld [smem:[#allocation82_spill]]  ;;  %s10757_s9 = sld [smem:[#allocation68_spill]] }
  0x5a   : > { %s10758_s8 = sld [smem:[#allocation62_spill]]  ;;  %s10760_s3 = sld [smem:[#allocation61_spill]] }
  0x5b   : > { %s10759_s4 = sld [smem:[#allocation78_spill]]  ;;  %10761 = sst [smem:[#allocation85_spill]] %s9572_s7 }
  0x5c   : > { %s9615_s0 = smov [#allocation5]   ;;  %s9871_s11 = sadd.s32 4294967295, %s9572_s7  }
  0x5d   : > { %s1048_s10 = sshll.u32 %s9615_s0, 4  ;;  %p7060_p0 = scmp.ge.s32.totalorder %s9572_s7, 1  ;;  %s9876_s10 = int_to_ptr.vmem [resolvable:$true] %s1048_s10 }
  0x5e   : > { %p1013_p1 = scmp.lt.s32.totalorder %s9572_s7, 3  ;;  %p10707_p2 = scmp.eq.s32.totalorder %s9871_s11, 0 }
  0x5f   : > { %s9616_s16 = smov [#allocation8]   ;;  %s9617_s23 = smov [#allocation11]  }
  0x60   : > { %p9878_p3 = pnand %p7060_p0, %p1013_p1  ;;  %s1073_s18 = sshll.u32 %s9616_s16, 4  ;;  %s9884_s18 = int_to_ptr.vmem [resolvable:$true] %s1073_s18 }
  0x61   : > { %s1097_s26 = sshll.u32 %s9617_s23, 4  ;;  %s9618_s28 = smov [#allocation14]   ;;  %s9892_s26 = int_to_ptr.vmem [resolvable:$true] %s1097_s26 }
  0x62   : > { %s10762_s15 = scalar_select %p9878_p3, 1, 0 }
  0x63   : > { %p8067_p4 = pneg %p9878_p3  ;;  %s9894_s1 = sshll.u32 %s9618_s28, 4  ;;  %s1123_s1 = int_to_ptr.vmem [resolvable:$true] %s9894_s1 }
  0x64   : > { %s8814_s2 = scalar_lea.hbm %s10758_s8, 1280 }
  0x65   : > { %p9888_p5 = pnand %p10707_p2, %p8067_p4  ;;  %p8815_p6 = scmp.ne.s32.totalorder %s10758_s8, %s8814_s2 }
  0x66   : > { %p8821_p10 = scmp.lt.u32.totalorder %s8814_s2, %s10758_s8 }
  0x67   : > { %p9900_p7 = pneg %p9888_p5 }
  0x69   : > { %p8817_p8 = pnand %p9900_p7, %p8815_p6 }
  0x6b   : > { %p8818_p9 = pneg %p8817_p8 }
  0x6d   : > { %p8823_p11 = pnand %p8821_p10, %p8818_p9 }
  0x6f   : > { %8826 = shalt.err (!%p8823_p11)
}
  0x70   : > { %s8827_s16 = scalar_lea.vmem %s9876_s10, 1280  ;;  %p8835_p1 = scmp.lt.s32.totalorder %s9876_s10, %s9876_s10 }
  0x71   : > { %p8828_p12 = scmp.ne.s32.totalorder %s9876_s10, %s8827_s16  ;;  %p8836_p4 = scmp.lt.s32.totalorder %s8827_s16, %s8827_s16 }
  0x73   : > { %p8830_p13 = pnand %p8828_p12, %p9900_p7  ;;  %p8837_p2 = por %p8836_p4, %p8835_p1 }
  0x75   : > { %p8831_p0 = pneg %p8830_p13 }
  0x77   : > { %p8838_p3 = pnand %p8837_p2, %p8831_p0 }
  0x79   : > { %8841 = shalt.err (!%p8838_p3)
}
  0x7a   : > { %s10710_s23 = smov 64   ;;  %s10712_s28 = smov 4  }
  0x7b   : > { %8073 = dma.hbm_to_vmem [thread:$0]  (!%p9888_p5), %s10758_s8, 1280, %s9876_s10, [#allocation6], %s10710_s23, %s10710_s23, %s10712_s28  }
  0x7c   : > { %s8842_s2 = scalar_lea.hbm %s9708_s19, 16 }
  0x7d   : > { %p8843_p6 = scmp.ne.s32.totalorder %s9708_s19, %s8842_s2  ;;  %p8849_p3 = scmp.lt.u32.totalorder %s8842_s2, %s9708_s19 }
  0x7f   : > { %p8845_p8 = pnand %p8843_p6, %p9900_p7 }
  0x81   : > { %p8846_p2 = pneg %p8845_p8 }
  0x83   : > { %p8851_p9 = pnand %p8849_p3, %p8846_p2 }
  0x85   : > { %8854 = shalt.err (!%p8851_p9)
}
  0x86   : > { %s8855_s16 = scalar_lea.vmem %s9884_s18, 16  ;;  %s8862_s7 = scalar_lea.vmem %s9884_s18, 32 }
  0x87   : > { %p8856_p10 = scmp.ne.s32.totalorder %s9884_s18, %s8855_s16  ;;  %p8863_p13 = scmp.lt.s32.totalorder %s9884_s18, %s9884_s18 }
  0x88   : > { %p8864_p0 = scmp.lt.s32.totalorder %s8862_s7, %s8855_s16 }
  0x89   : > { %p8858_p11 = pnand %p8856_p10, %p9900_p7 }
  0x8a   : > { %p8865_p1 = por %p8864_p0, %p8863_p13 }
  0x8b   : > { %p8859_p12 = pneg %p8858_p11 }
  0x8d   : > { %p8866_p4 = pnand %p8865_p1, %p8859_p12 }
  0x8f   : > { %8869 = shalt.err (!%p8866_p4)
}
  0x90   : > { %8079 = dma.hbm_to_vmem [thread:$0]  (!%p9888_p5), %s9708_s19, 16, %s9884_s18, [#allocation9]  }
  0x91   : > { %s8870_s10 = scalar_lea.hbm %s9718_s30, 16 }
  0x92   : > { %p8871_p6 = scmp.ne.s32.totalorder %s9718_s30, %s8870_s10  ;;  %p8877_p3 = scmp.lt.u32.totalorder %s8870_s10, %s9718_s30 }
  0x94   : > { %p8873_p8 = pnand %p8871_p6, %p9900_p7 }
  0x96   : > { %p8874_p2 = pneg %p8873_p8 }
  0x98   : > { %p8879_p9 = pnand %p8877_p3, %p8874_p2 }
  0x9a   : > { %8882 = shalt.err (!%p8879_p9)
}
  0x9b   : > { %s8883_s7 = scalar_lea.vmem %s9892_s26, 16  ;;  %s8890_s2 = scalar_lea.vmem %s9892_s26, 32 }
  0x9c   : > { %p8884_p10 = scmp.ne.s32.totalorder %s9892_s26, %s8883_s7  ;;  %p8891_p13 = scmp.lt.s32.totalorder %s9892_s26, %s9892_s26 }
  0x9d   : > { %p8892_p0 = scmp.lt.s32.totalorder %s8890_s2, %s8883_s7 }
  0x9e   : > { %p8886_p11 = pnand %p8884_p10, %p9900_p7 }
  0x9f   : > { %p8893_p1 = por %p8892_p0, %p8891_p13 }
  0xa0   : > { %p8887_p12 = pneg %p8886_p11 }
  0xa2   : > { %p8894_p4 = pnand %p8893_p1, %p8887_p12 }
  0xa4   : > { %8897 = shalt.err (!%p8894_p4)
}
  0xa5   : > { %8085 = dma.hbm_to_vmem [thread:$0]  (!%p9888_p5), %s9718_s30, 16, %s9892_s26, [#allocation12]  }
  0xa6   : > { %s8898_s18 = scalar_lea.hbm %s9733_s20, 16 }
  0xa7   : > { %p8899_p6 = scmp.ne.s32.totalorder %s9733_s20, %s8898_s18  ;;  %p8905_p3 = scmp.lt.u32.totalorder %s8898_s18, %s9733_s20 }
  0xa9   : > { %p8901_p8 = pnand %p8899_p6, %p9900_p7 }
  0xab   : > { %p8902_p2 = pneg %p8901_p8 }
  0xad   : > { %p8907_p9 = pnand %p8905_p3, %p8902_p2 }
  0xaf   : > { %8910 = shalt.err (!%p8907_p9)
}
  0xb0   : > { %s8911_s16 = scalar_lea.vmem %s1123_s1, 16  ;;  %s8918_s10 = scalar_lea.vmem %s1123_s1, 32 }
  0xb1   : > { %p8912_p10 = scmp.ne.s32.totalorder %s1123_s1, %s8911_s16  ;;  %p8919_p13 = scmp.lt.s32.totalorder %s1123_s1, %s1123_s1 }
  0xb2   : > { %p8920_p0 = scmp.lt.s32.totalorder %s8918_s10, %s8911_s16 }
  0xb3   : > { %p8914_p11 = pnand %p8912_p10, %p9900_p7 }
  0xb4   : > { %p8921_p1 = por %p8920_p0, %p8919_p13 }
  0xb5   : > { %p8915_p12 = pneg %p8914_p11 }
  0xb7   : > { %p8922_p4 = pnand %p8921_p1, %p8915_p12 }
  0xb9   : > { %8925 = shalt.err (!%p8922_p4)
}
  0xba   : > { %8091 = dma.hbm_to_vmem [thread:$0]  (!%p9888_p5), %s9733_s20, 16, %s1123_s1, [#allocation15]  }
  0xbb   : > { %s9621_s26 = smov [#allocation17]   ;;  %s9622_s2 = smov [#allocation20]  }
  0xbc   : > { %s1147_s7 = sshll.u32 %s9621_s26, 4  ;;  %s1190_s18 = sshll.u32 %s9622_s2, 4  ;;  %s1148_s7 = int_to_ptr.vmem [resolvable:$true] %s1147_s7  ;;  %s1191_s18 = int_to_ptr.vmem [resolvable:$true] %s1190_s18 }
  0xbd   : > { %s8926_s23 = scalar_lea.hbm %s10757_s9, 16 }
  0xbe   : > { %p8927_p6 = scmp.ne.s32.totalorder %s10757_s9, %s8926_s23  ;;  %p8933_p3 = scmp.lt.u32.totalorder %s8926_s23, %s10757_s9 }
  0xc0   : > { %p8929_p8 = pnand %p8927_p6, %p9900_p7 }
  0xc2   : > { %p8930_p2 = pneg %p8929_p8 }
  0xc4   : > { %p8935_p9 = pnand %p8933_p3, %p8930_p2 }
  0xc6   : > { %8938 = shalt.err (!%p8935_p9)
}
  0xc7   : > { %s8939_s16 = scalar_lea.vmem %s1148_s7, 16  ;;  %s8946_s1 = scalar_lea.vmem %s1148_s7, 32 }
  0xc8   : > { %p8940_p10 = scmp.ne.s32.totalorder %s1148_s7, %s8939_s16  ;;  %p8947_p13 = scmp.lt.s32.totalorder %s1148_s7, %s1148_s7 }
  0xc9   : > { %p8948_p0 = scmp.lt.s32.totalorder %s8946_s1, %s8939_s16 }
  0xca   : > { %p8942_p11 = pnand %p8940_p10, %p9900_p7 }
  0xcb   : > { %p8949_p1 = por %p8948_p0, %p8947_p13 }
  0xcc   : > { %p8943_p12 = pneg %p8942_p11 }
  0xce   : > { %p8950_p4 = pnand %p8949_p1, %p8943_p12 }
  0xd0   : > { %8953 = shalt.err (!%p8950_p4)
}
  0xd1   : > { %8097 = dma.hbm_to_vmem [thread:$0]  (!%p9888_p5), %s10757_s9, 16, %s1148_s7, [#allocation18]  }
  0xd2   : > { %s8954_s23 = scalar_lea.hbm %s9793_s17, 128 }
  0xd3   : > { %p8955_p6 = scmp.ne.s32.totalorder %s9793_s17, %s8954_s23  ;;  %p8961_p3 = scmp.lt.u32.totalorder %s8954_s23, %s9793_s17 }
  0xd5   : > { %p8957_p8 = pnand %p8955_p6, %p9900_p7 }
  0xd7   : > { %p8958_p2 = pneg %p8957_p8 }
  0xd9   : > { %p8963_p9 = pnand %p8961_p3, %p8958_p2 }
  0xdb   : > { %8966 = shalt.err (!%p8963_p9)
}
  0xdc   : > { %s8967_s10 = scalar_lea.vmem %s1191_s18, 128  ;;  %p8975_p13 = scmp.lt.s32.totalorder %s1191_s18, %s1191_s18 }
  0xdd   : > { %p8968_p10 = scmp.ne.s32.totalorder %s1191_s18, %s8967_s10  ;;  %p8976_p0 = scmp.lt.s32.totalorder %s8967_s10, %s8967_s10 }
  0xdf   : > { %p8970_p11 = pnand %p8968_p10, %p9900_p7  ;;  %p8977_p1 = por %p8976_p0, %p8975_p13 }
  0xe1   : > { %p8971_p12 = pneg %p8970_p11 }
  0xe3   : > { %p8978_p4 = pnand %p8977_p1, %p8971_p12 }
  0xe5   : > { %8981 = shalt.err (!%p8978_p4)
}
  0xe6   : > { %8103 = dma.hbm_to_vmem [thread:$0]  (!%p9888_p5), %s9793_s17, 128, %s1191_s18, [#allocation21]  }
  0xe7   : > { %s9623_s26 = smov [#allocation23]   ;;  %s8982_s2 = scalar_lea.hbm %s10759_s4, 32768 }
  0xe8   : > { %s1211_s7 = sshll.u32 %s9623_s26, 4  ;;  %p8983_p6 = scmp.ne.s32.totalorder %s10759_s4, %s8982_s2  ;;  %s1212_s7 = int_to_ptr.vmem [resolvable:$true] %s1211_s7 }
  0xe9   : > { %p8989_p3 = scmp.lt.u32.totalorder %s8982_s2, %s10759_s4 }
  0xea   : > { %p8985_p8 = pnand %p8983_p6, %p9900_p7 }
  0xec   : > { %p8986_p2 = pneg %p8985_p8 }
  0xee   : > { %p8991_p9 = pnand %p8989_p3, %p8986_p2 }
  0xf0   : > { %8994 = shalt.err (!%p8991_p9)
}
  0xf1   : > { %s8995_s16 = scalar_lea.vmem %s1212_s7, 32768  ;;  %p9003_p13 = scmp.lt.s32.totalorder %s1212_s7, %s1212_s7 }
  0xf2   : > { %p8996_p10 = scmp.ne.s32.totalorder %s1212_s7, %s8995_s16  ;;  %p9004_p0 = scmp.lt.s32.totalorder %s8995_s16, %s8995_s16 }
  0xf4   : > { %p8998_p11 = pnand %p8996_p10, %p9900_p7  ;;  %p9005_p1 = por %p9004_p0, %p9003_p13 }
  0xf6   : > { %p8999_p12 = pneg %p8998_p11 }
  0xf8   : > { %p9006_p4 = pnand %p9005_p1, %p8999_p12 }
  0xfa   : > { %9009 = shalt.err (!%p9006_p4)
}
  0xfb   : > { %s9624_s18 = smov 256   ;;  %s9625_s1 = smov 16  }
  0xfc   : > { %8109 = dma.hbm_to_vmem [thread:$0]  (!%p9888_p5), %s10759_s4, 32768, %s1212_s7, [#allocation24], %s9624_s18, %s9624_s18, %s9625_s1  }
  0xfd   : > { %s9626_s23 = smov [#allocation26]   ;;  %s9627_s26 = smov [#allocation29]  }
  0xfe   : > { %s1236_s10 = sshll.u32 %s9626_s23, 4  ;;  %s1260_s2 = sshll.u32 %s9627_s26, 4  ;;  %s1237_s10 = int_to_ptr.vmem [resolvable:$true] %s1236_s10  ;;  %s9993_s2 = int_to_ptr.vmem [resolvable:$true] %s1260_s2 }
  0xff   : > { %s9010_s16 = scalar_lea.hbm %s9813_s29, 64 }
 0x100   : > { %p9011_p6 = scmp.ne.s32.totalorder %s9813_s29, %s9010_s16  ;;  %p9017_p3 = scmp.lt.u32.totalorder %s9010_s16, %s9813_s29 }
 0x102   : > { %p9013_p8 = pnand %p9011_p6, %p9900_p7 }
 0x104   : > { %p9014_p2 = pneg %p9013_p8 }
 0x106   : > { %p9019_p9 = pnand %p9017_p3, %p9014_p2 }
 0x108   : > { %9022 = shalt.err (!%p9019_p9)
}
 0x109   : > { %s9023_s28 = scalar_lea.vmem %s1237_s10, 64  ;;  %p9031_p13 = scmp.lt.s32.totalorder %s1237_s10, %s1237_s10 }
 0x10a   : > { %p9024_p10 = scmp.ne.s32.totalorder %s1237_s10, %s9023_s28  ;;  %p9032_p0 = scmp.lt.s32.totalorder %s9023_s28, %s9023_s28 }
 0x10c   : > { %p9026_p11 = pnand %p9024_p10, %p9900_p7  ;;  %p9033_p1 = por %p9032_p0, %p9031_p13 }
 0x10e   : > { %p9027_p12 = pneg %p9026_p11 }
 0x110   : > { %p9034_p4 = pnand %p9033_p1, %p9027_p12 }
 0x112   : > { %9037 = shalt.err (!%p9034_p4)
}
 0x113   : > { %8115 = dma.hbm_to_vmem [thread:$0]  (!%p9888_p5), %s9813_s29, 64, %s1237_s10, [#allocation27]  }
 0x114   : > { %s9038_s7 = scalar_lea.hbm %s9823_s25, 32 }
 0x115   : > { %p9039_p6 = scmp.ne.s32.totalorder %s9823_s25, %s9038_s7  ;;  %p9045_p3 = scmp.lt.u32.totalorder %s9038_s7, %s9823_s25 }
 0x117   : > { %p9041_p8 = pnand %p9039_p6, %p9900_p7 }
 0x119   : > { %p9042_p2 = pneg %p9041_p8 }
 0x11b   : > { %p9047_p9 = pnand %p9045_p3, %p9042_p2 }
 0x11d   : > { %9050 = shalt.err (!%p9047_p9)
}
 0x11e   : > { %s9051_s28 = scalar_lea.vmem %s9993_s2, 32  ;;  %p9059_p13 = scmp.lt.s32.totalorder %s9993_s2, %s9993_s2 }
 0x11f   : > { %p9052_p10 = scmp.ne.s32.totalorder %s9993_s2, %s9051_s28  ;;  %p9060_p0 = scmp.lt.s32.totalorder %s9051_s28, %s9051_s28 }
 0x121   : > { %p9054_p11 = pnand %p9052_p10, %p9900_p7  ;;  %p9061_p1 = por %p9060_p0, %p9059_p13 }
 0x123   : > { %p9055_p12 = pneg %p9054_p11 }
 0x125   : > { %p9062_p4 = pnand %p9061_p1, %p9055_p12 }
 0x127   : > { %9065 = shalt.err (!%p9062_p4)
}
 0x128   : > { %8121 = dma.hbm_to_vmem [thread:$0]  (!%p9888_p5), %s9823_s25, 32, %s9993_s2, [#allocation30]  }
 0x129   : > { %s9628_s18 = smov [#allocation32]   ;;  %s9629_s23 = smov [#allocation35]  }
 0x12a   : > { %s1281_s1 = sshll.u32 %s9628_s18, 4  ;;  %s1306_s10 = sshll.u32 %s9629_s23, 4  ;;  %s1282_s1 = int_to_ptr.vmem [resolvable:$true] %s1281_s1  ;;  %s10020_s10 = int_to_ptr.vmem [resolvable:$true] %s1306_s10 }
 0x12b   : > { %s9066_s26 = scalar_lea.hbm %s10756_s12, 2048 }
 0x12c   : > { %p9067_p6 = scmp.ne.s32.totalorder %s10756_s12, %s9066_s26  ;;  %p9073_p3 = scmp.lt.u32.totalorder %s9066_s26, %s10756_s12 }
 0x12e   : > { %p9069_p8 = pnand %p9067_p6, %p9900_p7 }
 0x130   : > { %p9070_p2 = pneg %p9069_p8 }
 0x132   : > { %p9075_p9 = pnand %p9073_p3, %p9070_p2 }
 0x134   : > { %9078 = shalt.err (!%p9075_p9)
}
 0x135   : > { %s9079_s16 = scalar_lea.vmem %s1282_s1, 2048  ;;  %p9087_p13 = scmp.lt.s32.totalorder %s1282_s1, %s1282_s1 }
 0x136   : > { %p9080_p10 = scmp.ne.s32.totalorder %s1282_s1, %s9079_s16  ;;  %p9088_p0 = scmp.lt.s32.totalorder %s9079_s16, %s9079_s16 }
 0x138   : > { %p9082_p11 = pnand %p9080_p10, %p9900_p7  ;;  %p9089_p1 = por %p9088_p0, %p9087_p13 }
 0x13a   : > { %p9083_p12 = pneg %p9082_p11 }
 0x13c   : > { %p9090_p4 = pnand %p9089_p1, %p9083_p12 }
 0x13e   : > { %9093 = shalt.err (!%p9090_p4)
}
 0x13f   : > { %s10765_s2 = smov 4   ;;  %s10766_s7 = smov 64  }
 0x140   : > { %8127 = dma.hbm_to_vmem [thread:$0]  (!%p9888_p5), %s10756_s12, 2048, %s1282_s1, [#allocation33], %s10766_s7, %s10766_s7, %s10765_s2  }
 0x141   : > { %s9094_s28 = scalar_lea.hbm %s10755_s13, 16 }
 0x142   : > { %p9095_p6 = scmp.ne.s32.totalorder %s10755_s13, %s9094_s28  ;;  %p9101_p3 = scmp.lt.u32.totalorder %s9094_s28, %s10755_s13 }
 0x144   : > { %p9097_p8 = pnand %p9095_p6, %p9900_p7 }
 0x146   : > { %p9098_p2 = pneg %p9097_p8 }
 0x148   : > { %p9103_p9 = pnand %p9101_p3, %p9098_p2 }
 0x14a   : > { %9106 = shalt.err (!%p9103_p9)
}
 0x14b   : > { %s9107_s18 = scalar_lea.vmem %s10020_s10, 16  ;;  %s9114_s23 = scalar_lea.vmem %s10020_s10, 32 }
 0x14c   : > { %p9108_p10 = scmp.ne.s32.totalorder %s10020_s10, %s9107_s18  ;;  %p9115_p13 = scmp.lt.s32.totalorder %s10020_s10, %s10020_s10 }
 0x14d   : > { %p9116_p0 = scmp.lt.s32.totalorder %s9114_s23, %s9107_s18 }
 0x14e   : > { %p9110_p11 = pnand %p9108_p10, %p9900_p7 }
 0x14f   : > { %p9117_p1 = por %p9116_p0, %p9115_p13 }
 0x150   : > { %p9111_p12 = pneg %p9110_p11 }
 0x152   : > { %p9118_p4 = pnand %p9117_p1, %p9111_p12 }
 0x154   : > { %9121 = shalt.err (!%p9118_p4)
}
 0x155   : > { %8133 = dma.hbm_to_vmem [thread:$0]  (!%p9888_p5), %s10755_s13, 16, %s10020_s10, [#allocation36]  }
 0x156   : > { %s9630_s1 = smov [#allocation38]   ;;  %s9631_s16 = smov [#allocation3]  }
 0x157   : > { %s1330_s26 = sshll.u32 %s9630_s1, 4  ;;  %s1038_s28 = sshll.u32 %s9631_s16, 4  ;;  %s1331_s26 = int_to_ptr.vmem [resolvable:$true] %s1330_s26  ;;  %s10051_s28 = int_to_ptr.vmem [resolvable:$true] %s1038_s28 }
 0x158   : > { %s9122_s18 = scalar_lea.hbm %s9853_s27, 16 }
 0x159   : > { %p9123_p6 = scmp.ne.s32.totalorder %s9853_s27, %s9122_s18  ;;  %p9129_p3 = scmp.lt.u32.totalorder %s9122_s18, %s9853_s27 }
 0x15b   : > { %p9125_p8 = pnand %p9123_p6, %p9900_p7 }
 0x15d   : > { %p9126_p2 = pneg %p9125_p8 }
 0x15f   : > { %p9131_p9 = pnand %p9129_p3, %p9126_p2 }
 0x161   : > { %9134 = shalt.err (!%p9131_p9)
}
 0x162   : > { %s9135_s23 = scalar_lea.vmem %s1331_s26, 16  ;;  %s9142_s10 = scalar_lea.vmem %s1331_s26, 32 }
 0x163   : > { %p9136_p10 = scmp.ne.s32.totalorder %s1331_s26, %s9135_s23  ;;  %p9143_p13 = scmp.lt.s32.totalorder %s1331_s26, %s1331_s26 }
 0x164   : > { %p9144_p0 = scmp.lt.s32.totalorder %s9142_s10, %s9135_s23 }
 0x165   : > { %p9138_p11 = pnand %p9136_p10, %p9900_p7 }
 0x166   : > { %p9145_p1 = por %p9144_p0, %p9143_p13 }
 0x167   : > { %p9139_p12 = pneg %p9138_p11 }
 0x169   : > { %p9146_p4 = pnand %p9145_p1, %p9139_p12 }
 0x16b   : > { %9149 = shalt.err (!%p9146_p4)
}
 0x16c   : > { %8139 = dma.hbm_to_vmem [thread:$0]  (!%p9888_p5), %s9853_s27, 16, %s1331_s26, [#allocation39]  }
 0x16d   : > { %s9150_s1 = scalar_lea.hbm %s10760_s3, 16 }
 0x16e   : > { %p9151_p6 = scmp.ne.s32.totalorder %s10760_s3, %s9150_s1  ;;  %p9157_p3 = scmp.lt.u32.totalorder %s9150_s1, %s10760_s3 }
 0x170   : > { %p9153_p8 = pnand %p9151_p6, %p9900_p7 }
 0x172   : > { %p9154_p2 = pneg %p9153_p8 }
 0x174   : > { %p9159_p9 = pnand %p9157_p3, %p9154_p2 }
 0x176   : > { %9162 = shalt.err (!%p9159_p9)
}
 0x177   : > { %s9163_s16 = scalar_lea.vmem %s10051_s28, 16  ;;  %s9170_s18 = scalar_lea.vmem %s10051_s28, 32 }
 0x178   : > { %p9164_p10 = scmp.ne.s32.totalorder %s10051_s28, %s9163_s16  ;;  %p9171_p13 = scmp.lt.s32.totalorder %s10051_s28, %s10051_s28 }
 0x179   : > { %p9172_p0 = scmp.lt.s32.totalorder %s9170_s18, %s9163_s16 }
 0x17a   : > { %p9166_p11 = pnand %p9164_p10, %p9900_p7 }
 0x17b   : > { %p9173_p1 = por %p9172_p0, %p9171_p13 }
 0x17c   : > { %p9167_p12 = pneg %p9166_p11 }
 0x17e   : > { %p9174_p4 = pnand %p9173_p1, %p9167_p12 }
 0x180   : > { %9177 = shalt.err (!%p9174_p4)
}
 0x181   : > { %8070 = dma.hbm_to_vmem [thread:$0]  (!%p9888_p5), %s10760_s3, 16, %s10051_s28, [#allocation4]  }
 0x182   : > { %s9632_s26 = smov [#allocation7]   ;;  %s9633_s10 = smov [#allocation10]  }
 0x183   : > { %s1062_s23 = sshll.u32 %s9632_s26, 4  ;;  %s1083_s1 = sshll.u32 %s9633_s10, 4  ;;  %s1063_s23 = int_to_ptr.vmem [resolvable:$true] %s1062_s23  ;;  %s10079_s1 = int_to_ptr.vmem [resolvable:$true] %s1083_s1 }
 0x184   : > { %s9178_s16 = scalar_lea.hbm %s10754_s14, 16 }
 0x185   : > { %p9179_p6 = scmp.ne.s32.totalorder %s10754_s14, %s9178_s16  ;;  %p9185_p3 = scmp.lt.u32.totalorder %s9178_s16, %s10754_s14 }
 0x187   : > { %p9181_p8 = pnand %p9179_p6, %p9900_p7 }
 0x189   : > { %p9182_p2 = pneg %p9181_p8 }
 0x18b   : > { %p9187_p9 = pnand %p9185_p3, %p9182_p2 }
 0x18d   : > { %9190 = shalt.err (!%p9187_p9)
}
 0x18e   : > { %s9191_s18 = scalar_lea.vmem %s1063_s23, 16  ;;  %s9198_s28 = scalar_lea.vmem %s1063_s23, 32 }
 0x18f   : > { %p9192_p10 = scmp.ne.s32.totalorder %s1063_s23, %s9191_s18  ;;  %p9199_p13 = scmp.lt.s32.totalorder %s1063_s23, %s1063_s23 }
 0x190   : > { %p9200_p0 = scmp.lt.s32.totalorder %s9198_s28, %s9191_s18 }
 0x191   : > { %p9194_p11 = pnand %p9192_p10, %p9900_p7 }
 0x192   : > { %p9201_p1 = por %p9200_p0, %p9199_p13 }
 0x193   : > { %p9195_p12 = pneg %p9194_p11 }
 0x195   : > { %p9202_p4 = pnand %p9201_p1, %p9195_p12 }
 0x197   : > { %9205 = shalt.err (!%p9202_p4)
}
 0x198   : > { %8076 = dma.hbm_to_vmem [thread:$0]  (!%p9888_p5), %s10754_s14, 16, %s1063_s23, [#allocation6]  }
 0x199   : > { %s9206_s26 = scalar_lea.hbm %s9713_s24, 1024 }
 0x19a   : > { %p9207_p6 = scmp.ne.s32.totalorder %s9713_s24, %s9206_s26  ;;  %p9213_p3 = scmp.lt.u32.totalorder %s9206_s26, %s9713_s24 }
 0x19c   : > { %p9209_p8 = pnand %p9207_p6, %p9900_p7 }
 0x19e   : > { %p9210_p2 = pneg %p9209_p8 }
 0x1a0   : > { %p9215_p9 = pnand %p9213_p3, %p9210_p2 }
 0x1a2   : > { %9218 = shalt.err (!%p9215_p9)
}
 0x1a3   : > { %s9219_s10 = scalar_lea.vmem %s10079_s1, 1024  ;;  %p9227_p13 = scmp.lt.s32.totalorder %s10079_s1, %s10079_s1 }
 0x1a4   : > { %p9220_p10 = scmp.ne.s32.totalorder %s10079_s1, %s9219_s10  ;;  %p9228_p0 = scmp.lt.s32.totalorder %s9219_s10, %s9219_s10 }
 0x1a6   : > { %p9222_p11 = pnand %p9220_p10, %p9900_p7  ;;  %p9229_p1 = por %p9228_p0, %p9227_p13 }
 0x1a8   : > { %p9223_p12 = pneg %p9222_p11 }
 0x1aa   : > { %p9230_p4 = pnand %p9229_p1, %p9223_p12 }
 0x1ac   : > { %9233 = shalt.err (!%p9230_p4)
}
 0x1ad   : > { %s10767_s23 = sld [smem:[#allocation64_spill]]  ;;  %s9634_s16 = smov [#allocation13]  }
 0x1ae   : > { %8082 = dma.hbm_to_vmem [thread:$0]  (!%p9888_p5), %s9713_s24, 1024, %s10079_s1, [#allocation9], %s10766_s7, %s10766_s7, %s10765_s2  }
 0x1af   : > { %s1108_s18 = sshll.u32 %s9634_s16, 4  ;;  %s9635_s28 = smov [#allocation16]   ;;  %s1109_s18 = int_to_ptr.vmem [resolvable:$true] %s1108_s18 }
 0x1b0   : > { %s1133_s26 = sshll.u32 %s9635_s28, 4  ;;  %s10109_s26 = int_to_ptr.vmem [resolvable:$true] %s1133_s26 }
 0x1b3   : > { %s9234_s10 = scalar_lea.hbm %s10767_s23, 16 }
 0x1b4   : > { %p9235_p6 = scmp.ne.s32.totalorder %s10767_s23, %s9234_s10  ;;  %p9241_p3 = scmp.lt.u32.totalorder %s9234_s10, %s10767_s23 }
 0x1b6   : > { %p9237_p8 = pnand %p9235_p6, %p9900_p7 }
 0x1b8   : > { %p9238_p2 = pneg %p9237_p8 }
 0x1ba   : > { %p9243_p9 = pnand %p9241_p3, %p9238_p2 }
 0x1bc   : > { %9246 = shalt.err (!%p9243_p9)
}
 0x1bd   : > { %s9247_s3 = scalar_lea.vmem %s1109_s18, 16  ;;  %s9254_s1 = scalar_lea.vmem %s1109_s18, 32 }
 0x1be   : > { %p9248_p10 = scmp.ne.s32.totalorder %s1109_s18, %s9247_s3  ;;  %p9255_p13 = scmp.lt.s32.totalorder %s1109_s18, %s1109_s18 }
 0x1bf   : > { %p9256_p0 = scmp.lt.s32.totalorder %s9254_s1, %s9247_s3 }
 0x1c0   : > { %p9250_p11 = pnand %p9248_p10, %p9900_p7 }
 0x1c1   : > { %p9257_p1 = por %p9256_p0, %p9255_p13 }
 0x1c2   : > { %p9251_p12 = pneg %p9250_p11 }
 0x1c4   : > { %p9258_p4 = pnand %p9257_p1, %p9251_p12 }
 0x1c6   : > { %9261 = shalt.err (!%p9258_p4)
}
 0x1c7   : > { %s10768_s16 = sld [smem:[#allocation66_spill]] }
 0x1c8   : > { %8088 = dma.hbm_to_vmem [thread:$0]  (!%p9888_p5), %s10767_s23, 16, %s1109_s18, [#allocation12]  }
 0x1cd   : > { %s9262_s28 = scalar_lea.hbm %s10768_s16, 16 }
 0x1ce   : > { %p9263_p6 = scmp.ne.s32.totalorder %s10768_s16, %s9262_s28  ;;  %p9269_p3 = scmp.lt.u32.totalorder %s9262_s28, %s10768_s16 }
 0x1d0   : > { %p9265_p8 = pnand %p9263_p6, %p9900_p7 }
 0x1d2   : > { %p9266_p2 = pneg %p9265_p8 }
 0x1d4   : > { %p9271_p9 = pnand %p9269_p3, %p9266_p2 }
 0x1d6   : > { %9274 = shalt.err (!%p9271_p9)
}
 0x1d7   : > { %s9275_s3 = scalar_lea.vmem %s10109_s26, 16  ;;  %s9282_s10 = scalar_lea.vmem %s10109_s26, 32 }
 0x1d8   : > { %p9276_p10 = scmp.ne.s32.totalorder %s10109_s26, %s9275_s3  ;;  %p9283_p13 = scmp.lt.s32.totalorder %s10109_s26, %s10109_s26 }
 0x1d9   : > { %p9284_p0 = scmp.lt.s32.totalorder %s9282_s10, %s9275_s3 }
 0x1da   : > { %p9278_p11 = pnand %p9276_p10, %p9900_p7 }
 0x1db   : > { %p9285_p1 = por %p9284_p0, %p9283_p13 }
 0x1dc   : > { %p9279_p12 = pneg %p9278_p11 }
 0x1de   : > { %p9286_p4 = pnand %p9285_p1, %p9279_p12 }
 0x1e0   : > { %9289 = shalt.err (!%p9286_p4)
}
 0x1e1   : > { %s10769_s18 = sld [smem:[#allocation69_spill]]  ;;  %s9636_s1 = smov [#allocation19]  }
 0x1e2   : > { %8094 = dma.hbm_to_vmem [thread:$0]  (!%p9888_p5), %s10768_s16, 16, %s10109_s26, [#allocation15]  }
 0x1e3   : > { %s1158_s28 = sshll.u32 %s9636_s1, 4  ;;  %s9637_s4 = smov [#allocation22]   ;;  %s1159_s28 = int_to_ptr.vmem [resolvable:$true] %s1158_s28 }
 0x1e4   : > { %s1201_s8 = sshll.u32 %s9637_s4, 4  ;;  %s10137_s8 = int_to_ptr.vmem [resolvable:$true] %s1201_s8 }
 0x1e7   : > { %s9290_s3 = scalar_lea.hbm %s10769_s18, 16 }
 0x1e8   : > { %p9291_p6 = scmp.ne.s32.totalorder %s10769_s18, %s9290_s3  ;;  %p9297_p3 = scmp.lt.u32.totalorder %s9290_s3, %s10769_s18 }
 0x1ea   : > { %p9293_p8 = pnand %p9291_p6, %p9900_p7 }
 0x1ec   : > { %p9294_p2 = pneg %p9293_p8 }
 0x1ee   : > { %p9299_p9 = pnand %p9297_p3, %p9294_p2 }
 0x1f0   : > { %9302 = shalt.err (!%p9299_p9)
}
 0x1f1   : > { %s9303_s10 = scalar_lea.vmem %s1159_s28, 16  ;;  %s9310_s26 = scalar_lea.vmem %s1159_s28, 32 }
 0x1f2   : > { %p9304_p10 = scmp.ne.s32.totalorder %s1159_s28, %s9303_s10  ;;  %p9311_p13 = scmp.lt.s32.totalorder %s1159_s28, %s1159_s28 }
 0x1f3   : > { %p9312_p0 = scmp.lt.s32.totalorder %s9310_s26, %s9303_s10 }
 0x1f4   : > { %p9306_p11 = pnand %p9304_p10, %p9900_p7 }
 0x1f5   : > { %p9313_p1 = por %p9312_p0, %p9311_p13 }
 0x1f6   : > { %p9307_p12 = pneg %p9306_p11 }
 0x1f8   : > { %p9314_p4 = pnand %p9313_p1, %p9307_p12 }
 0x1fa   : > { %9317 = shalt.err (!%p9314_p4)
}
 0x1fb   : > { %s10770_s4 = sld [smem:[#allocation77_spill]] }
 0x1fc   : > { %8100 = dma.hbm_to_vmem [thread:$0]  (!%p9888_p5), %s10769_s18, 16, %s1159_s28, [#allocation18]  }
 0x201   : > { %s9318_s1 = scalar_lea.hbm %s10770_s4, 128 }
 0x202   : > { %p9319_p6 = scmp.ne.s32.totalorder %s10770_s4, %s9318_s1  ;;  %p9325_p3 = scmp.lt.u32.totalorder %s9318_s1, %s10770_s4 }
 0x204   : > { %p9321_p8 = pnand %p9319_p6, %p9900_p7 }
 0x206   : > { %p9322_p2 = pneg %p9321_p8 }
 0x208   : > { %p9327_p9 = pnand %p9325_p3, %p9322_p2 }
 0x20a   : > { %9330 = shalt.err (!%p9327_p9)
}
 0x20b   : > { %s9331_s3 = scalar_lea.vmem %s10137_s8, 128  ;;  %p9339_p13 = scmp.lt.s32.totalorder %s10137_s8, %s10137_s8 }
 0x20c   : > { %p9332_p10 = scmp.ne.s32.totalorder %s10137_s8, %s9331_s3  ;;  %p9340_p0 = scmp.lt.s32.totalorder %s9331_s3, %s9331_s3 }
 0x20e   : > { %p9334_p11 = pnand %p9332_p10, %p9900_p7  ;;  %p9341_p1 = por %p9340_p0, %p9339_p13 }
 0x210   : > { %p9335_p12 = pneg %p9334_p11 }
 0x212   : > { %p9342_p4 = pnand %p9341_p1, %p9335_p12 }
 0x214   : > { %9345 = shalt.err (!%p9342_p4)
}
 0x215   : > { %s10771_s28 = sld [smem:[#allocation79_spill]]  ;;  %s9638_s10 = smov [#allocation25]  }
 0x216   : > { %8106 = dma.hbm_to_vmem [thread:$0]  (!%p9888_p5), %s10770_s4, 128, %s10137_s8, [#allocation21]  }
 0x217   : > { %s1225_s26 = sshll.u32 %s9638_s10, 4  ;;  %s9639_s1 = smov [#allocation28]   ;;  %s1226_s26 = int_to_ptr.vmem [resolvable:$true] %s1225_s26 }
 0x218   : > { %s1246_s9 = sshll.u32 %s9639_s1, 4  ;;  %s10164_s9 = int_to_ptr.vmem [resolvable:$true] %s1246_s9 }
 0x21b   : > { %s9346_s3 = scalar_lea.hbm %s10771_s28, 64 }
 0x21c   : > { %p9347_p6 = scmp.ne.s32.totalorder %s10771_s28, %s9346_s3  ;;  %p9353_p3 = scmp.lt.u32.totalorder %s9346_s3, %s10771_s28 }
 0x21e   : > { %p9349_p8 = pnand %p9347_p6, %p9900_p7 }
 0x220   : > { %p9350_p2 = pneg %p9349_p8 }
 0x222   : > { %p9355_p9 = pnand %p9353_p3, %p9350_p2 }
 0x224   : > { %9358 = shalt.err (!%p9355_p9)
}
 0x225   : > { %s9359_s12 = scalar_lea.vmem %s1226_s26, 64  ;;  %p9367_p13 = scmp.lt.s32.totalorder %s1226_s26, %s1226_s26 }
 0x226   : > { %p9360_p10 = scmp.ne.s32.totalorder %s1226_s26, %s9359_s12  ;;  %p9368_p0 = scmp.lt.s32.totalorder %s9359_s12, %s9359_s12 }
 0x228   : > { %p9362_p11 = pnand %p9360_p10, %p9900_p7  ;;  %p9369_p1 = por %p9368_p0, %p9367_p13 }
 0x22a   : > { %p9363_p12 = pneg %p9362_p11 }
 0x22c   : > { %p9370_p4 = pnand %p9369_p1, %p9363_p12 }
 0x22e   : > { %9373 = shalt.err (!%p9370_p4)
}
 0x22f   : > { %s10772_s8 = sld [smem:[#allocation80_spill]] }
 0x230   : > { %8112 = dma.hbm_to_vmem [thread:$0]  (!%p9888_p5), %s10771_s28, 64, %s1226_s26, [#allocation24]  }
 0x235   : > { %s9374_s10 = scalar_lea.hbm %s10772_s8, 8192 }
 0x236   : > { %p9375_p6 = scmp.ne.s32.totalorder %s10772_s8, %s9374_s10  ;;  %p9381_p3 = scmp.lt.u32.totalorder %s9374_s10, %s10772_s8 }
 0x238   : > { %p9377_p8 = pnand %p9375_p6, %p9900_p7 }
 0x23a   : > { %p9378_p2 = pneg %p9377_p8 }
 0x23c   : > { %p9383_p9 = pnand %p9381_p3, %p9378_p2 }
 0x23e   : > { %9386 = shalt.err (!%p9383_p9)
}
 0x23f   : > { %s9387_s12 = scalar_lea.vmem %s10164_s9, 8192  ;;  %p9395_p13 = scmp.lt.s32.totalorder %s10164_s9, %s10164_s9 }
 0x240   : > { %p9388_p10 = scmp.ne.s32.totalorder %s10164_s9, %s9387_s12  ;;  %p9396_p0 = scmp.lt.s32.totalorder %s9387_s12, %s9387_s12 }
 0x242   : > { %p9390_p11 = pnand %p9388_p10, %p9900_p7  ;;  %p9397_p1 = por %p9396_p0, %p9395_p13 }
 0x244   : > { %p9391_p12 = pneg %p9390_p11 }
 0x246   : > { %p9398_p4 = pnand %p9397_p1, %p9391_p12 }
 0x248   : > { %9401 = shalt.err (!%p9398_p4)
}
 0x249   : > { %s9640_s26 = smov 128   ;;  %s10773_s1 = sld [smem:[#allocation81_spill]] }
 0x24a   : > { %s9641_s3 = smov 8   ;;  %s9642_s10 = smov [#allocation31]  }
 0x24b   : > { %8118 = dma.hbm_to_vmem [thread:$0]  (!%p9888_p5), %s10772_s8, 8192, %s10164_s9, [#allocation27], %s9640_s26, %s9640_s26, %s9641_s3  }
 0x24c   : > { %s1271_s4 = sshll.u32 %s9642_s10, 4  ;;  %s9643_s13 = smov [#allocation34]   ;;  %s1272_s4 = int_to_ptr.vmem [resolvable:$true] %s1271_s4 }
 0x24d   : > { %s1295_s14 = sshll.u32 %s9643_s13, 4  ;;  %s10191_s14 = int_to_ptr.vmem [resolvable:$true] %s1295_s14 }
 0x24f   : > { %s9402_s12 = scalar_lea.hbm %s10773_s1, 32 }
 0x250   : > { %p9403_p6 = scmp.ne.s32.totalorder %s10773_s1, %s9402_s12  ;;  %p9409_p3 = scmp.lt.u32.totalorder %s9402_s12, %s10773_s1 }
 0x252   : > { %p9405_p8 = pnand %p9403_p6, %p9900_p7 }
 0x254   : > { %p9406_p2 = pneg %p9405_p8 }
 0x256   : > { %p9411_p9 = pnand %p9409_p3, %p9406_p2 }
 0x258   : > { %9414 = shalt.err (!%p9411_p9)
}
 0x259   : > { %s9415_s16 = scalar_lea.vmem %s1272_s4, 32  ;;  %p9423_p13 = scmp.lt.s32.totalorder %s1272_s4, %s1272_s4 }
 0x25a   : > { %p9416_p10 = scmp.ne.s32.totalorder %s1272_s4, %s9415_s16  ;;  %p9424_p0 = scmp.lt.s32.totalorder %s9415_s16, %s9415_s16 }
 0x25c   : > { %p9418_p11 = pnand %p9416_p10, %p9900_p7  ;;  %p9425_p1 = por %p9424_p0, %p9423_p13 }
 0x25e   : > { %p9419_p12 = pneg %p9418_p11 }
 0x260   : > { %p9426_p4 = pnand %p9425_p1, %p9419_p12 }
 0x262   : > { %9429 = shalt.err (!%p9426_p4)
}
 0x263   : > { %s10774_s9 = sld [smem:[#allocation83_spill]] }
 0x264   : > { %8124 = dma.hbm_to_vmem [thread:$0]  (!%p9888_p5), %s10773_s1, 32, %s1272_s4, [#allocation30]  }
 0x269   : > { %s9430_s13 = scalar_lea.hbm %s10774_s9, 16 }
 0x26a   : > { %p9431_p6 = scmp.ne.s32.totalorder %s10774_s9, %s9430_s13  ;;  %p9437_p3 = scmp.lt.u32.totalorder %s9430_s13, %s10774_s9 }
 0x26c   : > { %p9433_p8 = pnand %p9431_p6, %p9900_p7 }
 0x26e   : > { %p9434_p2 = pneg %p9433_p8 }
 0x270   : > { %p9439_p9 = pnand %p9437_p3, %p9434_p2 }
 0x272   : > { %9442 = shalt.err (!%p9439_p9)
}
 0x273   : > { %s9443_s16 = scalar_lea.vmem %s10191_s14, 16  ;;  %s9450_s26 = scalar_lea.vmem %s10191_s14, 32 }
 0x274   : > { %p9444_p10 = scmp.ne.s32.totalorder %s10191_s14, %s9443_s16  ;;  %p9451_p13 = scmp.lt.s32.totalorder %s10191_s14, %s10191_s14 }
 0x275   : > { %p9452_p0 = scmp.lt.s32.totalorder %s9450_s26, %s9443_s16 }
 0x276   : > { %p9446_p11 = pnand %p9444_p10, %p9900_p7 }
 0x277   : > { %p9453_p1 = por %p9452_p0, %p9451_p13 }
 0x278   : > { %p9447_p12 = pneg %p9446_p11 }
 0x27a   : > { %p9454_p4 = pnand %p9453_p1, %p9447_p12 }
 0x27c   : > { %9457 = shalt.err (!%p9454_p4)
}
 0x27d   : > { %8130 = dma.hbm_to_vmem [thread:$0]  (!%p9888_p5), %s10774_s9, 16, %s10191_s14, [#allocation33]  }
 0x27e   : > { %s9644_s4 = smov [#allocation37]   ;;  %s9645_s10 = smov [#allocation40]  }
 0x27f   : > { %s1316_s3 = sshll.u32 %s9644_s4, 4  ;;  %s1341_s12 = sshll.u32 %s9645_s10, 4  ;;  %s1317_s3 = int_to_ptr.vmem [resolvable:$true] %s1316_s3  ;;  %s10219_s12 = int_to_ptr.vmem [resolvable:$true] %s1341_s12 }
 0x280   : > { %s9458_s13 = scalar_lea.hbm %s9848_s21, 1024 }
 0x281   : > { %p9459_p6 = scmp.ne.s32.totalorder %s9848_s21, %s9458_s13  ;;  %p9465_p3 = scmp.lt.u32.totalorder %s9458_s13, %s9848_s21 }
 0x283   : > { %p9461_p8 = pnand %p9459_p6, %p9900_p7 }
 0x285   : > { %p9462_p2 = pneg %p9461_p8 }
 0x287   : > { %p9467_p9 = pnand %p9465_p3, %p9462_p2 }
 0x289   : > { %9470 = shalt.err (!%p9467_p9)
}
 0x28a   : > { %s9471_s16 = scalar_lea.vmem %s1317_s3, 1024  ;;  %p9479_p13 = scmp.lt.s32.totalorder %s1317_s3, %s1317_s3 }
 0x28b   : > { %p9472_p10 = scmp.ne.s32.totalorder %s1317_s3, %s9471_s16  ;;  %p9480_p0 = scmp.lt.s32.totalorder %s9471_s16, %s9471_s16 }
 0x28d   : > { %p9474_p11 = pnand %p9472_p10, %p9900_p7  ;;  %p9481_p1 = por %p9480_p0, %p9479_p13 }
 0x28f   : > { %p9475_p12 = pneg %p9474_p11 }
 0x291   : > { %p9482_p4 = pnand %p9481_p1, %p9475_p12 }
 0x293   : > { %9485 = shalt.err (!%p9482_p4)
}
 0x294   : > { %8136 = dma.hbm_to_vmem [thread:$0]  (!%p9888_p5), %s9848_s21, 1024, %s1317_s3, [#allocation36], %s10766_s7, %s10766_s7, %s10765_s2  }
 0x295   : > { %s9486_s14 = scalar_lea.hbm %s9858_s5, 16 }
 0x296   : > { %p9487_p6 = scmp.ne.s32.totalorder %s9858_s5, %s9486_s14  ;;  %p9493_p3 = scmp.lt.u32.totalorder %s9486_s14, %s9858_s5 }
 0x298   : > { %p9489_p8 = pnand %p9487_p6, %p9900_p7 }
 0x29a   : > { %p9490_p2 = pneg %p9489_p8 }
 0x29c   : > { %p9495_p9 = pnand %p9493_p3, %p9490_p2 }
 0x29e   : > { %9498 = shalt.err (!%p9495_p9)
}
 0x29f   : > { %s9499_s26 = scalar_lea.vmem %s10219_s12, 16  ;;  %s9506_s4 = scalar_lea.vmem %s10219_s12, 32 }
 0x2a0   : > { %p9500_p10 = scmp.ne.s32.totalorder %s10219_s12, %s9499_s26  ;;  %p9507_p13 = scmp.lt.s32.totalorder %s10219_s12, %s10219_s12 }
 0x2a1   : > { %p9508_p0 = scmp.lt.s32.totalorder %s9506_s4, %s9499_s26 }
 0x2a2   : > { %p9502_p11 = pnand %p9500_p10, %p9900_p7 }
 0x2a3   : > { %p9509_p1 = por %p9508_p0, %p9507_p13 }
 0x2a4   : > { %p9503_p12 = pneg %p9502_p11 }
 0x2a6   : > { %p9510_p4 = pnand %p9509_p1, %p9503_p12 }
 0x2a8   : > { %9513 = shalt.err (!%p9510_p4)
}
 0x2a9   : > { %8142 = dma.hbm_to_vmem [thread:$0]  (!%p9888_p5), %s9858_s5, 16, %s10219_s12, [#allocation39]  }
 0x2aa   : > { %p10775_p6 = scmp.ne.s32.totalorder %s10762_s15, 0 }
 0x2ab   : > { %p10776_p8 = scmp.eq.s32.totalorder (!%p10775_p6), %s9871_s11, 0 }
 0x2ac   : > { %1378 = sbr.rel (%p10775_p6) target bundleno = 3945 (0xf69), region = 184 }
 0x2b3   : > { %9519 = dma.done.wait (%p10776_p8), [#allocation4], 16   ;;  %p10777_p7 = pmov %p10776_p8 }
 0x2b5   : > { %9521 = vsyncadd (%p10777_p7), [#allocation4], 4294967280  ;;  %p10778_p2 = pmov %p10777_p7 }
 0x2b7   : > { %9523 = dma.done.wait (%p10778_p2), [#allocation6], 1296   ;;  %p10779_p3 = pmov %p10778_p2 }
 0x2b8   : > { %p10780_p9 = pmov %p10778_p2 }
 0x2b9   : > { %9525 = vsyncadd (%p10779_p3), [#allocation6], 4294966000 }
 0x2ba   : > { %9527 = dma.done.wait (%p10780_p9), [#allocation9], 1040   ;;  %p10781_p5 = pmov %p10778_p2 }
 0x2bb   : > { %p10782_p10 = pmov %p10778_p2 }
 0x2bc   : > { %9529 = vsyncadd (%p10781_p5), [#allocation9], 4294966256 }
 0x2bd   : > { %9531 = dma.done.wait (%p10782_p10), [#allocation12], 32   ;;  %p10783_p11 = pmov %p10778_p2 }
 0x2be   : > { %p10784_p12 = pmov %p10778_p2 }
 0x2bf   : > { %9533 = vsyncadd (%p10783_p11), [#allocation12], 4294967264 }
 0x2c0   : > { %9535 = dma.done.wait (%p10784_p12), [#allocation15], 32   ;;  %p10785_p13 = pmov %p10778_p2 }
 0x2c1   : > { %p10786_p0 = pmov %p10778_p2 }
 0x2c2   : > { %9537 = vsyncadd (%p10785_p13), [#allocation15], 4294967264 }
 0x2c3   : > { %9539 = dma.done.wait (%p10786_p0), [#allocation18], 32   ;;  %p10787_p1 = pmov %p10786_p0 }
 0x2c4   : > { %p10788_p4 = pmov %p10786_p0 }
 0x2c5   : > { %9541 = vsyncadd (%p10787_p1), [#allocation18], 4294967264 }
 0x2c6   : > { %9543 = dma.done.wait (%p10788_p4), [#allocation21], 256   ;;  %p10789_p6 = pmov %p10786_p0 }
 0x2c7   : > { %p10790_p8 = pmov %p10786_p0 }
 0x2c8   : > { %9545 = vsyncadd (%p10789_p6), [#allocation21], 4294967040 }
 0x2c9   : > { %9547 = dma.done.wait (%p10790_p8), [#allocation24], 32832   ;;  %p10791_p7 = pmov %p10786_p0 }
 0x2ca   : > { %p10792_p2 = pmov %p10786_p0 }
 0x2cb   : > { %9549 = vsyncadd (%p10791_p7), [#allocation24], 4294934464 }
 0x2cc   : > { %9551 = dma.done.wait (%p10792_p2), [#allocation27], 8256   ;;  %p10793_p3 = pmov %p10786_p0 }
 0x2cd   : > { %p10794_p9 = pmov %p10786_p0 }
 0x2ce   : > { %9553 = vsyncadd (%p10793_p3), [#allocation27], 4294959040 }
 0x2cf   : > { %9555 = dma.done.wait (%p10794_p9), [#allocation30], 64   ;;  %p10795_p5 = pmov %p10786_p0 }
 0x2d0   : > { %p10796_p10 = pmov %p10786_p0 }
 0x2d1   : > { %9557 = vsyncadd (%p10795_p5), [#allocation30], 4294967232 }
 0x2d2   : > { %9559 = dma.done.wait (%p10796_p10), [#allocation33], 2064   ;;  %p10797_p11 = pmov %p10786_p0 }
 0x2d3   : > { %p10798_p12 = pmov %p10786_p0 }
 0x2d4   : > { %9561 = vsyncadd (%p10797_p11), [#allocation33], 4294965232 }
 0x2d5   : > { %9563 = dma.done.wait (%p10798_p12), [#allocation36], 1040   ;;  %p10799_p13 = pmov %p10786_p0 }
 0x2d7   : > { %9565 = vsyncadd (%p10799_p13), [#allocation36], 4294966256 }
 0x2d8   : > { %9567 = dma.done.wait (%p10786_p0), [#allocation39], 32   ;;  %p10800_p1 = pmov %p10786_p0 }
 0x2d9   : > { %s10801_s15 = sld [smem:[#allocation59_spill]]  ;;  %s10802_s22 = sld [smem:[#allocation54_spill]]  ;;  %vm1624_vm0 = vcmask 1041408   ;;  %vm1625_vm1 = vcmask 1042432   ;;  %v9646_v0 = vmov 65535   ;;  %vm1617_vm2 = vcmask 39936  }
 0x2da   : > { %9569 = vsyncadd (%p10800_p1), [#allocation39], 4294967264  ;;  %p1584_p4 = scmp.lt.s32.totalorder %s9871_s11, 1  ;;  %v1626_v1 = vsel %vm1624_vm0, 4294967295, %v9646_v0  ;;  %s10803_s2 = sld [smem:[#allocation60_spill]]  ;;  %v9647_v7 = vmov 0.0  }
 0x2db   : > { %v1627_v2 = vsel %vm1625_vm1, %v1626_v1, 0  ;;  %7720 = vmatprep.subr.bf16.mxu1 %v9647_v7  ;;  %vm9648_vm3 = vmmov 0   ;;  %s10804_s3 = sld [smem:[#allocation57_spill]]  ;;  %v7125_v19 = vld [vmem:[#allocation3] ss:$0 sm:$0xff]  ;;  %vm1711_vm7 = vcmask 162816  }
 0x2dc   : > { %s10820_s11 = smov (!%p1584_p4, %s9871_s11), 1  ;;  %7724 = vmatprep.mubr.msk.bf16.mxu1 %vm9648_vm3, %v9647_v7  ;;  %v8281_v34 = vld [vmem:[#allocation5 + $0x10] sm:$0xff]   ;;  %v8282_v35 = vld [vmem:[#allocation5 + $0x18] sm:$0xff]   ;;  %vm1826_vm8 = vcmask 261120   ;;  %v8283_v41 = vld [vmem:[#allocation5] sm:$0xff]   ;;  %s10805_s10 = sld [smem:[#allocation58_spill]] }
 0x2dd   : > { %s7966_s0 = smul.u32 12, %s10820_s11  ;;  %7721 = vmatpush3.bf16.msra.mxu1 %v8281_v34  ;;  %v8284_v46 = vld [vmem:[#allocation5 + $0x8] sm:$0xff]   ;;  %v8285_v51 = vld [vmem:[#allocation5 + $0x20] sm:$0xff]   ;;  %v8287_v59 = vld [vmem:[#allocation5 + $0x30] sm:$0xff]   ;;  %s10806_s12 = sld [smem:[#allocation65_spill]]  ;;  %vm2267_vm10 = vcmask 31744  }
 0x2de   : > { %7722 = vmatprep.subr.bf16.mxu1 %v9647_v7  ;;  %v8286_v53 = vld [vmem:[#allocation5 + $0x28] sm:$0xff]   ;;  %v8288_v1 = vld [vmem:[#allocation5 + $0x38] sm:$0xff]   ;;  %vm2801_vm14 = vcmask 257024   ;;  %s10807_s13 = sld [smem:[#allocation67_spill]]  ;;  %s10808_s16 = sld [smem:[#allocation56_spill]]  ;;  %vm2962_vm1 = vcmask 1040384  }
 0x2df   : > { %v1608_v3 = vld [vmem:[%s10801_s15] sm:$0x7]  ;;  %s1588_s7 = scalar_lea.vmem %s10802_s22, %s7966_s0  ;;  %v8297_v34 = vld [vmem:[#allocation10] sm:$0xff]   ;;  %s10809_s14 = sld [smem:[#allocation55_spill]] }
 0x2e0   : > { %v1629_v4 = vand.u32 %v1627_v2, %v1608_v3  ;;  %v8279_v5 = vld [vmem:[%s1588_s7] sm:$0xff]   ;;  %v8280_v6 = vld [vmem:[%s1588_s7 + $0x8] ss:$0 sps:$4 sm:$0x33]   ;;  %v8289_v3 = vld [vmem:[#allocation5 + $0x40] sm:$0xff]   ;;  %s7590_s26 = sshll.u32 %s10820_s11, 3 }
 0x2e1   : > { %7700 = vmatprep.mubr.msk.bf16.mxu0 %vm1617_vm2, %v8279_v5  ;;  %v7124_v9 = vld [vmem:[%s10803_s2] ss:$0 sm:$0xff]  ;;  %v7127_v30 = vld [vmem:[%s10804_s3 + $0x2] sm:$0x3]  ;;  %v7135_v31 = vld [vmem:[%s10804_s3 + $0x4] sm:$0x3]  ;;  %7723 = vmatpush3.bf16.msra.mxu1 %v8282_v35 }
 0x2e2   : > { %7698 = vmatprep.subr.bf16.mxu0 %v1629_v4  ;;  %v1710_v29 = vld [vmem:[%s10804_s3] sm:$0x3]  ;;  %v7140_v32 = vld [vmem:[%s10804_s3 + $0x6] sm:$0x3]  ;;  %v7145_v33 = vld [vmem:[%s10804_s3 + $0x8] sm:$0x3]  ;;  %7728 = vmatprep.subr.bf16.mxu1 %v9647_v7 }
 0x2e3   : > { %7699 = vmatpush3.bf16.msra.mxu0 %v1629_v4  ;;  %v8290_v4 = vld [vmem:[#allocation5 + $0x48] sm:$0xff]   ;;  %s10810_s22 = sld [smem:[#allocation70_spill]]  ;;  %s10811_s0 = sld [smem:[#allocation71_spill]] }
 0x2e4   : > { %7704 = vmatprep.subr.bf16.mxu0 %v9647_v7  ;;  %s1598_s4 = scalar_lea.vmem %s10808_s16, %s7590_s26  ;;  %s10812_s2 = sld [smem:[#allocation72_spill]] }
 0x2e5   : > { %s1593_s15 = scalar_lea.vmem %s10809_s14, %s7590_s26  ;;  %s10813_s7 = sld [smem:[#allocation74_spill]] }
 0x2e6   : > { %7701 = vmatmul.mubr.msk.bf16.vlgmr.msra.gmra.mrb[0].mxu0 %vm1617_vm2, %v8280_v6  ;;  %vm2958_vm2 = vcmask 23552   ;;  %s10815_s16 = sld [smem:[#allocation75_spill]]  ;;  %s10816_s14 = sld [smem:[#allocation76_spill]] }
 0x2e7   : > { %7708 = vmatprep.mubr.msk.bf16.mxu0 %vm9648_vm3, %v9647_v7  ;;  %s10817_s26 = sld [smem:[#allocation73_spill]] }
 0x3b9   : > { %v7702_v8 = vpop.f32.mrb[0].mxu0 }
 0x3ba   : > { %vm1683_vm4 = vcmp.ge.f32.partialorder %v7702_v8, 0.0  ;;  %v1686_v10 = vmul.f32 0.2, %v7702_v8  ;;  %v1665_v11 = vpop.f32.mrb[1].mxu0 }
 0x3bb   : > { %vm1681_vm5 = vcmp.ge.f32.partialorder %v1665_v11, 0.0  ;;  %v1684_v12 = vmul.f32 0.2, %v1665_v11  ;;  %v7703_v13 = vpop.f32.mrb[2].mxu0 }
 0x3bc   : > { %v1689_v14 = vsel %vm1683_vm4, %v7702_v8, %v1686_v10  ;;  %v1668_v15 = vpop.f32.mrb[3].mxu0  ;;  %v7150_v8 = vld [vmem:[#allocation7] ss:$0 sm:$0xff] }
 0x3bd   : > { %v1698_v16 = vmul.f32 %v7124_v9, %v1689_v14  ;;  %v1687_v17 = vsel %vm1681_vm5, %v1665_v11, %v1684_v12  ;;  %vm1682_vm6 = vcmp.ge.f32.partialorder %v1668_v15, 0.0  ;;  %v1685_v18 = vmul.f32 0.2, %v1668_v15  ;;  %v7151_v14 = vld [vmem:[#allocation8] ss:$0 sm:$0xff] }
 0x3be   : > { %v1696_v20 = vmul.f32 %v7124_v9, %v1687_v17 }
 0x3bf   : > { %v1688_v21 = vsel %vm1682_vm6, %v1668_v15, %v1685_v18  ;;  %v1707_v23 = vadd.f32 %v7125_v19, %v1698_v16 }
 0x3c0   : > { %v1697_v22 = vmul.f32 %v7124_v9, %v1688_v21  ;;  %v1705_v24 = vadd.f32 %v7125_v19, %v1696_v20  ;;  %v7153_v20 = vld [vmem:[%s10805_s10 + $0x1] sm:$0x1]  ;;  %v7161_v21 = vld [vmem:[%s10805_s10 + $0x2] sm:$0x1] }
 0x3c1   : > { %v10322_v27 = vpack.c.bf16 %v1707_v23, %v1707_v23  ;;  %v7166_v23 = vld [vmem:[%s10805_s10 + $0x3] sm:$0x1] }
 0x3c2   : > { %v1706_v25 = vadd.f32 %v7125_v19, %v1697_v22  ;;  %v2266_v19 = vld [vmem:[%s10805_s10] sm:$0x1] }
 0x3c3   : > { %v1716_v28 = vsel %vm1624_vm0, %v10322_v27, 0  ;;  %v8291_v22 = vld [vmem:[%s10806_s12] sm:$0xff]  }
 0x3c4   : > { %v10320_v26 = vpack.c.bf16 %v1706_v25, %v1705_v24  ;;  %v8292_v24 = vld [vmem:[%s10806_s12 + $0x8] sm:$0xff]   ;;  %v8293_v25 = vld [vmem:[%s10806_s12] sm:$0xff]  }
 0x3c6   : > { %7705 = vmatpush3.bf16.msra.mxu0 %v10320_v26 }
 0x3c7   : > { %7706 = vmatprep.subr.bf16.mxu0 %v9647_v7 }
 0x3ca   : > { %7707 = vmatpush3.bf16.msra.mxu0 %v1716_v28 }
 0x3cb   : > { %7712 = vmatprep.subr.bf16.mxu0 %v9647_v7 }
 0x3cd   : > { %7709 = vmatmul.mubr.msk.bf16.vlgmr.msra.gmra.mrb[4].mxu0 %vm1711_vm7, %v1710_v29 }
 0x3ce   : > { %7713 = vmatpush3.bf16.msra.mxu0 %v10320_v26  ;;  %7716 = vmatprep.mubr.msk.bf16.mxu0 %vm9648_vm3, %v9647_v7 }
 0x3cf   : > { %7714 = vmatprep.subr.bf16.mxu0 %v9647_v7 }
 0x3d2   : > { %7715 = vmatpush3.bf16.msra.mxu0 %v1716_v28 }
 0x3d3   : > { %7736 = vmatprep.subr.bf16.mxu0 %v9647_v7 }
 0x3d5   : > { %7717 = vmatmul.mubr.msk.bf16.vlgmr.msra.gmra.mrb[8].mxu0 %vm1711_vm7, %v7127_v30 }
 0x3d6   : > { %7737 = vmatpush3.bf16.msra.mxu0 %v10320_v26  ;;  %7740 = vmatprep.mubr.msk.bf16.mxu0 %vm9648_vm3, %v9647_v7 }
 0x3d7   : > { %7738 = vmatprep.subr.bf16.mxu0 %v9647_v7 }
 0x3da   : > { %7739 = vmatpush3.bf16.msra.mxu0 %v1716_v28 }
 0x3db   : > { %7752 = vmatprep.subr.bf16.mxu0 %v9647_v7 }
 0x3dd   : > { %7741 = vmatmul.mubr.msk.bf16.vlgmr.msra.gmra.mrb[12].mxu0 %vm1711_vm7, %v7135_v31 }
 0x3de   : > { %7753 = vmatpush3.bf16.msra.mxu0 %v10320_v26  ;;  %7756 = vmatprep.mubr.msk.bf16.mxu0 %vm9648_vm3, %v9647_v7 }
 0x3df   : > { %7754 = vmatprep.subr.bf16.mxu0 %v9647_v7 }
 0x3e2   : > { %7755 = vmatpush3.bf16.msra.mxu0 %v1716_v28 }
 0x3e3   : > { %7768 = vmatprep.subr.bf16.mxu0 %v9647_v7 }
 0x3e5   : > { %7757 = vmatmul.mubr.msk.bf16.vlgmr.msra.gmra.mrb[16].mxu0 %vm1711_vm7, %v7140_v32 }
 0x3e6   : > { %7769 = vmatpush3.bf16.msra.mxu0 %v10320_v26  ;;  %7772 = vmatprep.mubr.msk.bf16.mxu0 %vm9648_vm3, %v9647_v7 }
 0x3e7   : > { %7770 = vmatprep.subr.bf16.mxu0 %v9647_v7 }
 0x3ea   : > { %7771 = vmatpush3.bf16.msra.mxu0 %v1716_v28  ;;  %v8294_v28 = vld [vmem:[%s10806_s12 + $0x8] sm:$0xff]  }
 0x3eb   : > { %7784 = vmatprep.subr.bf16.mxu0 %v9647_v7 }
 0x3ed   : > { %7773 = vmatmul.mubr.msk.bf16.vlgmr.msra.gmra.mrb[20].mxu0 %vm1711_vm7, %v7145_v33 }
 0x3ee   : > { %7786 = vmatprep.mubr.msk.bf16.mxu0 %vm9648_vm3, %v9647_v7 }
 0x4a0   : > { %v1752_v36 = vpop.f32.mrb[4].mxu0 }
 0x4a1   : > { %v7710_v37 = vpop.f32.mrb[5].mxu0  ;;  %v1758_v52 = vpack.c.bf16 %v1752_v36, %v1752_v36 }
 0x4a2   : > { %v1755_v38 = vpop.f32.mrb[6].mxu0 }
 0x4a3   : > { %v7711_v39 = vpop.f32.mrb[7].mxu0 }
 0x4a4   : > { %v8298_v39 = vld [vmem:[#allocation10 + $0x8] sm:$0xff]  }
 0x4a8   : > { %v1802_v40 = vpop.f32.mrb[8].mxu0 }
 0x4a9   : > { %v1808_v42 = vpack.c.bf16 %v1802_v40, %v1802_v40  ;;  %v7718_v43 = vpop.f32.mrb[9].mxu0 }
 0x4aa   : > { %v1805_v44 = vpop.f32.mrb[10].mxu0 }
 0x4ab   : > { %v7719_v45 = vpop.f32.mrb[11].mxu0  ;;  %7725 = vmatmul.mubr.msk.bf16.vlgmr.msra.gmra.mrb[0].mxu1 %vm1826_vm8, %v1808_v42  ;;  %v8299_v44 = vld [vmem:[#allocation10 + $0x20] sm:$0xff]  }
 0x4ac   : > { %7729 = vmatpush3.bf16.msra.mxu1 %v8283_v41  ;;  %7732 = vmatprep.mubr.msk.bf16.mxu1 %vm9648_vm3, %v9647_v7 }
 0x4ad   : > { %7730 = vmatprep.subr.bf16.mxu1 %v9647_v7 }
 0x4b0   : > { %7731 = vmatpush3.bf16.msra.mxu1 %v8284_v46  ;;  %v1964_v47 = vpop.f32.mrb[12].mxu0 }
 0x4b1   : > { %7744 = vmatprep.subr.bf16.mxu1 %v9647_v7  ;;  %v7742_v48 = vpop.f32.mrb[13].mxu0  ;;  %v1970_v58 = vpack.c.bf16 %v1964_v47, %v1964_v47  ;;  %v8300_v47 = vld [vmem:[#allocation10 + $0x28] sm:$0xff]  }
 0x4b2   : > { %v1967_v49 = vpop.f32.mrb[14].mxu0 }
 0x4b3   : > { %v7743_v50 = vpop.f32.mrb[15].mxu0 }
 0x4b7   : > { %7733 = vmatmul.mubr.msk.bf16.vlgmr.msra.gmra.mrb[0].mxu1 %vm1826_vm8, %v1758_v52 }
 0x4b8   : > { %7745 = vmatpush3.bf16.msra.mxu1 %v8285_v51  ;;  %7748 = vmatprep.mubr.msk.bf16.mxu1 %vm9648_vm3, %v9647_v7  ;;  %v2071_v54 = vpop.f32.mrb[16].mxu0 }
 0x4b9   : > { %7746 = vmatprep.subr.bf16.mxu1 %v9647_v7  ;;  %v7758_v55 = vpop.f32.mrb[17].mxu0  ;;  %v2077_v2 = vpack.c.bf16 %v2071_v54, %v2071_v54  ;;  %v7175_v54 = vld [vmem:[#allocation14] ss:$0 sm:$0xff] }
 0x4ba   : > { %v2074_v56 = vpop.f32.mrb[18].mxu0 }
 0x4bb   : > { %v7759_v57 = vpop.f32.mrb[19].mxu0 }
 0x4bc   : > { %7747 = vmatpush3.bf16.msra.mxu1 %v8286_v53  ;;  %v8301_v53 = vld [vmem:[#allocation10 + $0x30] sm:$0xff]  }
 0x4bd   : > { %7760 = vmatprep.subr.bf16.mxu1 %v9647_v7 }
 0x4c0   : > { %v2178_v60 = vpop.f32.mrb[20].mxu0 }
 0x4c1   : > { %v7774_v61 = vpop.f32.mrb[21].mxu0  ;;  %v2184_v5 = vpack.c.bf16 %v2178_v60, %v2178_v60 }
 0x4c2   : > { %v2181_v62 = vpop.f32.mrb[22].mxu0 }
 0x4c3   : > { %7749 = vmatmul.mubr.msk.bf16.vlgmr.msra.gmra.mrb[0].mxu1 %vm1826_vm8, %v1970_v58  ;;  %v7775_v63 = vpop.f32.mrb[23].mxu0 }
 0x4c4   : > { %7761 = vmatpush3.bf16.msra.mxu1 %v8287_v59  ;;  %7764 = vmatprep.mubr.msk.bf16.mxu1 %vm9648_vm3, %v9647_v7  ;;  %v7176_v59 = vld [vmem:[#allocation16] ss:$0 sm:$0xff] }
 0x4c5   : > { %7762 = vmatprep.subr.bf16.mxu1 %v9647_v7 }
 0x4c8   : > { %7763 = vmatpush3.bf16.msra.mxu1 %v8288_v1 }
 0x4c9   : > { %7776 = vmatprep.subr.bf16.mxu1 %v9647_v7 }
 0x4cf   : > { %7765 = vmatmul.mubr.msk.bf16.vlgmr.msra.gmra.mrb[0].mxu1 %vm1826_vm8, %v2077_v2  ;;  %v8302_v2 = vld [vmem:[#allocation10 + $0x38] sm:$0xff]  }
 0x4d0   : > { %7777 = vmatpush3.bf16.msra.mxu1 %v8289_v3  ;;  %7780 = vmatprep.mubr.msk.bf16.mxu1 %vm9648_vm3, %v9647_v7 }
 0x4d1   : > { %7778 = vmatprep.subr.bf16.mxu1 %v9647_v7 }
 0x4d4   : > { %7779 = vmatpush3.bf16.msra.mxu1 %v8290_v4 }
 0x4d5   : > { %7796 = vmatprep.subr.bf16.mxu1 %v9647_v7 }
 0x4db   : > { %7781 = vmatmul.mubr.msk.bf16.vlgmr.msra.gmra.mrb[0].mxu1 %vm1826_vm8, %v2184_v5 }
 0x4dc   : > { %7800 = vmatprep.mubr.msk.bf16.mxu1 %vm9648_vm3, %v9647_v7 }
 0x5ae   : > { %v2239_v6 = vpop.f32.mrb[0].mxu1 }
 0x5af   : > { %vm2248_vm9 = vcmp.ge.f32.partialorder %v2239_v6, 0.0  ;;  %v2249_v9 = vmul.f32 0.2, %v2239_v6  ;;  %v7782_v10 = vpop.f32.mrb[1].mxu1 }
 0x5b0   : > { %v2242_v11 = vpop.f32.mrb[2].mxu1 }
 0x5b1   : > { %v2250_v12 = vsel %vm2248_vm9, %v2239_v6, %v2249_v9  ;;  %v7783_v13 = vpop.f32.mrb[3].mxu1  ;;  %vm2948_vm9 = vcmask 253952  }
 0x5b2   : > { %v2257_v15 = vmul.f32 %v7150_v8, %v2250_v12 }
 0x5b4   : > { %v2264_v16 = vadd.f32 %v7151_v14, %v2257_v15 }
 0x5b6   : > { %v2265_v17 = vpack.c.bf16 %v2264_v16, %v2264_v16 }
 0x5b8   : > { %v2272_v18 = vsel %vm1624_vm0, %v2265_v17, 0 }
 0x5b9   : > { %7785 = vmatpush3.bf16.msra.mxu0 %v2272_v18 }
 0x5ba   : > { %7790 = vmatprep.subr.bf16.mxu0 %v9647_v7 }
 0x5bc   : > { %7787 = vmatmul.mubr.msk.bf16.vlgmr.msra.gmra.mrb[24].mxu0 %vm2267_vm10, %v2266_v19  ;;  %v8303_v19 = vld [vmem:[%s10806_s12] sm:$0xff]  }
 0x5bd   : > { %7791 = vmatpush3.bf16.msra.mxu0 %v2272_v18  ;;  %7792 = vmatprep.mubr.msk.bf16.mxu0 %vm9648_vm3, %v9647_v7 }
 0x5be   : > { %7812 = vmatprep.subr.bf16.mxu0 %v9647_v7 }
 0x5c4   : > { %7793 = vmatmul.mubr.msk.bf16.vlgmr.msra.gmra.mrb[28].mxu0 %vm2267_vm10, %v7153_v20  ;;  %v2963_v20 = vsel %vm2962_vm1, 4294967295, %v9646_v0 }
 0x5c5   : > { %7813 = vmatpush3.bf16.msra.mxu0 %v2272_v18  ;;  %7814 = vmatprep.mubr.msk.bf16.mxu0 %vm9648_vm3, %v9647_v7 }
 0x5c6   : > { %7826 = vmatprep.subr.bf16.mxu0 %v9647_v7 }
 0x5cc   : > { %7815 = vmatmul.mubr.msk.bf16.vlgmr.msra.gmra.mrb[32].mxu0 %vm2267_vm10, %v7161_v21  ;;  %v8304_v21 = vld [vmem:[%s10806_s12 + $0x8] sm:$0xff]  }
 0x5cd   : > { %7827 = vmatpush3.bf16.msra.mxu0 %v2272_v18  ;;  %7828 = vmatprep.mubr.msk.bf16.mxu0 %vm9648_vm3, %v9647_v7 }
 0x5ce   : > { %7840 = vmatprep.subr.bf16.mxu0 %v8291_v22 }
 0x5d4   : > { %7829 = vmatmul.mubr.msk.bf16.vlgmr.msra.gmra.mrb[36].mxu0 %vm2267_vm10, %v7166_v23  ;;  %v2964_v23 = vsel %vm1624_vm0, %v2963_v20, 0  ;;  %vm3057_vm0 = vcmask 130048   ;;  %v3114_v20 = vld [vmem:[%s10811_s0 + $0x8] sm:$0xff] }
 0x5d5   : > { %7841 = vmatpush3.bf16.msra.mxu0 %v8291_v22  ;;  %7844 = vmatprep.mubr.msk.bf16.mxu0 %vm1826_vm8, %v10320_v26  ;;  %v8295_v26 = vld [vmem:[#allocation10 + $0x10] sm:$0xff]   ;;  %v2952_v22 = vld [vmem:[%s10807_s13] sm:$0x3]  ;;  %s10814_s13 = smov %s10813_s7 }
 0x5d6   : > { %7842 = vmatprep.subr.bf16.mxu0 %v8292_v24  ;;  %7797 = vmatpush3.bf16.msra.mxu1 %v8295_v26 }
 0x5d7   : > { %7798 = vmatprep.subr.bf16.mxu1 %v9647_v7 }
 0x5d9   : > { %7843 = vmatpush3.bf16.msra.mxu0 %v8292_v24  ;;  %v2966_v24 = vand.u32 %v2964_v23, %v2952_v22  ;;  %v3117_v23 = vld [vmem:[%s10812_s2] sm:$0xff] }
 0x5da   : > { %7848 = vmatprep.subr.bf16.mxu0 %v9647_v7 }
 0x5dc   : > { %7845 = vmatmul.mubr.msk.bf16.vlgmr.msra.gmra.mrb[40].mxu0 %vm1826_vm8, %v10322_v27  ;;  %v8296_v27 = vld [vmem:[#allocation10 + $0x18] sm:$0xff]  }
 0x5dd   : > { %7849 = vmatpush3.bf16.msra.mxu0 %v8293_v25  ;;  %7852 = vmatprep.mubr.msk.bf16.mxu0 %vm9648_vm3, %v9647_v7  ;;  %v8306_v25 = vld [vmem:[%s1598_s4] sm:$0xff]   ;;  %s7592_s4 = sshll.u32 %s10820_s11, 4 }
 0x5de   : > { %7850 = vmatprep.subr.bf16.mxu0 %v9647_v7  ;;  %7799 = vmatpush3.bf16.msra.mxu1 %v8296_v27  ;;  %v2694_v27 = vld [vmem:[#allocation11] sm:$0x1] }
 0x5df   : > { %7804 = vmatprep.subr.bf16.mxu1 %v9647_v7 }
 0x5e1   : > { %7851 = vmatpush3.bf16.msra.mxu0 %v8294_v28  ;;  %v8305_v28 = vld [vmem:[%s1593_s15] sm:$0xff]   ;;  %s1603_s15 = scalar_lea.vmem %s9863_s6, %s7592_s4 }
 0x5e2   : > { %7864 = vmatprep.subr.bf16.mxu0 %v9647_v7 }
 0x5e4   : > { %7853 = vmatmul.mubr.msk.bf16.vlgmr.msra.gmra.mrb[44].mxu0 %vm1826_vm8, %v2265_v17 }
 0x5e5   : > { %7866 = vmatprep.mubr.msk.bf16.mxu0 %vm9648_vm3, %v9647_v7  ;;  %7865 = vmatpush3.bf16.msra.mxu0 %v2966_v24 }
 0x5ec   : > { %7867 = vmatmul.mubr.msk.bf16.vlgmr.msra.gmra.mrb[48].mxu0 %vm2958_vm2, %v8305_v28  ;;  %vm3513_vm2 = vcmask 596992  }
 0x68f   : > { %v2308_v29 = vpop.f32.mrb[24].mxu0 }
 0x690   : > { %v7788_v30 = vpop.f32.mrb[25].mxu0  ;;  %v2314_v45 = vpack.c.bf16 %v2308_v29, %v2308_v29 }
 0x691   : > { %v2311_v31 = vpop.f32.mrb[26].mxu0 }
 0x692   : > { %v7789_v32 = vpop.f32.mrb[27].mxu0 }
 0x693   : > { %v2695_v32 = vld [vmem:[#allocation13] sm:$0x1] }
 0x697   : > { %v2358_v33 = vpop.f32.mrb[28].mxu0 }
 0x698   : > { %v2364_v35 = vpack.c.bf16 %v2358_v33, %v2358_v33  ;;  %v7794_v36 = vpop.f32.mrb[29].mxu0 }
 0x699   : > { %v2361_v37 = vpop.f32.mrb[30].mxu0 }
 0x69a   : > { %7801 = vmatmul.mubr.msk.bf16.vlgmr.msra.gmra.mrb[4].mxu1 %vm1826_vm8, %v2364_v35  ;;  %v7795_v38 = vpop.f32.mrb[31].mxu0  ;;  %v8307_v37 = vld [vmem:[%s10810_s22] sm:$0xff]  }
 0x69b   : > { %7805 = vmatpush3.bf16.msra.mxu1 %v8297_v34  ;;  %7808 = vmatprep.mubr.msk.bf16.mxu1 %vm9648_vm3, %v9647_v7 }
 0x69c   : > { %7806 = vmatprep.subr.bf16.mxu1 %v9647_v7 }
 0x69f   : > { %7807 = vmatpush3.bf16.msra.mxu1 %v8298_v39  ;;  %v2519_v40 = vpop.f32.mrb[32].mxu0 }
 0x6a0   : > { %v7816_v41 = vpop.f32.mrb[33].mxu0  ;;  %7818 = vmatprep.subr.bf16.mxu1 %v9647_v7  ;;  %v2525_v51 = vpack.c.bf16 %v2519_v40, %v2519_v40  ;;  %v8308_v40 = vld [vmem:[%s10810_s22 + $0x8] sm:$0xff]  }
 0x6a1   : > { %v2522_v42 = vpop.f32.mrb[34].mxu0 }
 0x6a2   : > { %v7817_v43 = vpop.f32.mrb[35].mxu0 }
 0x6a6   : > { %7809 = vmatmul.mubr.msk.bf16.vlgmr.msra.gmra.mrb[4].mxu1 %vm1826_vm8, %v2314_v45 }
 0x6a7   : > { %7819 = vmatpush3.bf16.msra.mxu1 %v8299_v44  ;;  %v2626_v46 = vpop.f32.mrb[36].mxu0  ;;  %7822 = vmatprep.mubr.msk.bf16.mxu1 %vm9648_vm3, %v9647_v7 }
 0x6a8   : > { %v7830_v48 = vpop.f32.mrb[37].mxu0  ;;  %7820 = vmatprep.subr.bf16.mxu1 %v9647_v7  ;;  %v2632_v14 = vpack.c.bf16 %v2626_v46, %v2626_v46 }
 0x6a9   : > { %v2629_v49 = vpop.f32.mrb[38].mxu0 }
 0x6aa   : > { %v7831_v50 = vpop.f32.mrb[39].mxu0 }
 0x6ab   : > { %7821 = vmatpush3.bf16.msra.mxu1 %v8300_v47  ;;  %v7187_v47 = vld [vmem:[#allocation17] ss:$0 sm:$0xff]  ;;  %v7188_v50 = vld [vmem:[#allocation19] ss:$0 sm:$0xff] }
 0x6ac   : > { %7832 = vmatprep.subr.bf16.mxu1 %v9647_v7 }
 0x6af   : > { %v7846_v52 = vpop.f32.mrb[40].mxu0 }
 0x6b0   : > { %vm2774_vm11 = vcmp.ge.f32.partialorder %v7846_v52, 0.0  ;;  %v2777_v55 = vmul.f32 0.2, %v7846_v52  ;;  %v2756_v56 = vpop.f32.mrb[41].mxu0 }
 0x6b1   : > { %vm2772_vm12 = vcmp.ge.f32.partialorder %v2756_v56, 0.0  ;;  %v2775_v57 = vmul.f32 0.2, %v2756_v56  ;;  %v7847_v58 = vpop.f32.mrb[42].mxu0 }
 0x6b2   : > { %v2780_v60 = vsel %vm2774_vm11, %v7846_v52, %v2777_v55  ;;  %7823 = vmatmul.mubr.msk.bf16.vlgmr.msra.gmra.mrb[4].mxu1 %vm1826_vm8, %v2525_v51  ;;  %v2759_v61 = vpop.f32.mrb[43].mxu0  ;;  %v9649_v52 = vmov 0  }
 0x6b3   : > { %v2789_v62 = vmul.f32 %v7175_v54, %v2780_v60  ;;  %v2778_v63 = vsel %vm2772_vm12, %v2756_v56, %v2775_v57  ;;  %vm2773_vm13 = vcmp.ge.f32.partialorder %v2759_v61, 0.0  ;;  %v2776_v1 = vmul.f32 0.2, %v2759_v61  ;;  %7833 = vmatpush3.bf16.msra.mxu1 %v8301_v53  ;;  %7836 = vmatprep.mubr.msk.bf16.mxu1 %vm9648_vm3, %v9647_v7  ;;  %v2941_v60 = vld [vmem:[#allocation14] sm:$0x1] }
 0x6b4   : > { %v2787_v3 = vmul.f32 %v7175_v54, %v2778_v63  ;;  %7834 = vmatprep.subr.bf16.mxu1 %v9647_v7  ;;  %8278 = vset.pattern.permute.xlu1 %v9649_v52 }
 0x6b5   : > { %v2798_v4 = vadd.f32 %v7176_v59, %v2789_v62  ;;  %v2779_v5 = vsel %vm2773_vm13, %v2759_v61, %v2776_v1  ;;  %8277 = vset.pattern.permute.xlu0 %v9649_v52  ;;  %3663 = vmatprep.mubr.bf16.mxu0 %v9649_v52  ;;  %v2942_v1 = vld [vmem:[#allocation16] sm:$0x1] }
 0x6b6   : > { %v2796_v6 = vadd.f32 %v7176_v59, %v2787_v3  ;;  %v2788_v8 = vmul.f32 %v7175_v54, %v2779_v5 }
 0x6b7   : > { %2802 = vst.msk [vmem:[#allocation2 + $0x10] sm:$0xf] %vm2801_vm14, %v2798_v4  ;;  %v2855_v9 = vpop.f32.mrb[44].mxu0  ;;  %7835 = vmatpush3.bf16.msra.mxu1 %v8302_v2 }
 0x6b8   : > { %2799 = vst.msk [vmem:[#allocation2] sm:$0xff] %vm1826_vm8, %v2796_v6  ;;  %v2797_v10 = vadd.f32 %v7176_v59, %v2788_v8  ;;  %vm2863_vm15 = vcmp.ge.f32.partialorder %v2855_v9, 0.0  ;;  %v2864_v11 = vmul.f32 0.2, %v2855_v9  ;;  %v7854_v12 = vpop.f32.mrb[45].mxu0  ;;  %7856 = vmatprep.subr.bf16.mxu1 %v9647_v7 }
 0x6b9   : > { %v2858_v13 = vpop.f32.mrb[46].mxu0 }
 0x6ba   : > { %2800 = vst.msk [vmem:[#allocation2 + $0x8] sm:$0xff] %vm1826_vm8, %v2797_v10  ;;  %v2865_v15 = vsel %vm2863_vm15, %v2855_v9, %v2864_v11  ;;  %v7855_v16 = vpop.f32.mrb[47].mxu0  ;;  %v3115_v10 = vld [vmem:[%s10811_s0 + $0x10] sm:$0xff]  ;;  %v3113_v13 = vld [vmem:[%s10811_s0] sm:$0xff] }
 0x6bb   : > { %v2872_v17 = vmul.f32 %v7175_v54, %v2865_v15  ;;  %v3116_v15 = vld [vmem:[%s10811_s0 + $0x18] sm:$0xff] }
 0x6bd   : > { %v2879_v18 = vadd.f32 %v7176_v59, %v2872_v17 }
 0x6be   : > { %7837 = vmatmul.mubr.msk.bf16.vlgmr.msra.gmra.mrb[4].mxu1 %vm1826_vm8, %v2632_v14 }
 0x6bf   : > { %2880 = vst.msk [vmem:[#allocation2 + $0x14] sm:$0xf] %vm2801_vm14, %v2879_v18  ;;  %7860 = vmatprep.mubr.msk.bf16.mxu1 %vm9648_vm3, %v9647_v7  ;;  %7857 = vmatpush3.bf16.msra.mxu1 %v8303_v19  ;;  %v3165_v41 = vld [vmem:[#allocation2] sm:$0xff]  ;;  %v3002_v44 = vpop.f32.mrb[48].mxu0  ;;  %v3119_v18 = vld [vmem:[%s10812_s2 + $0x10] sm:$0xff]  ;;  %vm3517_vm14 = vcmask 1043456  }
 0x6c0   : > { %7858 = vmatprep.subr.bf16.mxu1 %v9647_v7  ;;  %v3013_v45 = vmul.f32 0.2, %v3002_v44  ;;  %v7868_v46 = vpop.f32.mrb[49].mxu0  ;;  %vm3011_vm5 = vcmp.ge.f32.partialorder %v3002_v44, 0.0 }
 0x6c1   : > { %v3166_v39 = vld [vmem:[#allocation2 + $0x8] sm:$0xff]  ;;  %v3005_v53 = vpop.f32.mrb[50].mxu0 }
 0x6c2   : > { %v3175_v42 = vpack.c.bf16 %v3166_v39, %v3165_v41  ;;  %v3015_v48 = vsel %vm3011_vm5, %v3002_v44, %v3013_v45  ;;  %vm3012_vm6 = vcmp.ge.f32.partialorder %v3005_v53, 0.0  ;;  %v3014_v54 = vmul.f32 0.2, %v3005_v53  ;;  %v7869_v55 = vpop.f32.mrb[51].mxu0  ;;  %v3247_v39 = vld [vmem:[%s10813_s7 + $0x8] sm:$0xff]  ;;  %v3287_v44 = vld [vmem:[%s10816_s14 + $0x30] sm:$0xff] }
 0x6c3   : > { %7859 = vmatpush3.bf16.msra.mxu1 %v8304_v21  ;;  %v3023_v49 = vmul.f32 %v7187_v47, %v3015_v48  ;;  %v3249_v41 = vld [vmem:[%s10815_s16 + $0x8] sm:$0xff]  ;;  %v3295_v48 = vld [vmem:[%s10816_s14 + $0x70] sm:$0xff] }
 0x6c4   : > { %7870 = vmatprep.subr.bf16.mxu1 %v8306_v25  ;;  %v3191_v43 = vsel %vm1826_vm8, %v3175_v42, 0  ;;  %v3016_v56 = vsel %vm3012_vm6, %v3005_v53, %v3014_v54  ;;  %v3248_v42 = vld [vmem:[%s10815_s16] sm:$0xff] }
 0x6c5   : > { %v3031_v51 = vadd.f32 %v7188_v50, %v3023_v49  ;;  %v3024_v57 = vmul.f32 %v7187_v47, %v3016_v56  ;;  %v3291_v47 = vld [vmem:[%s10816_s14 + $0x50] sm:$0xff] }
 0x6c6   : > { %v7208_v49 = vcombine.low %v3291_v47, %v3295_v48 }
 0x6c7   : > { %3033 = vst.msk [vmem:[#allocation2 + $0x19] sm:$0xff] %vm1826_vm8, %v3031_v51  ;;  %v3032_v58 = vadd.f32 %v7188_v50, %v3024_v57  ;;  %v7209_v50 = vcombine.high %v3291_v47, %v3295_v48  ;;  %v8312_v48 = vld [vmem:[#allocation23 + $0x4] ss:$16 sps:$4 sm:$0xff]  }
 0x6c9   : > { %3034 = vst.msk [vmem:[#allocation2 + $0x21] sm:$0xff] %vm1826_vm8, %v3032_v58 }
 0x6d0   : > { %v3169_v56 = vld [vmem:[#allocation2 + $0x20] sm:$0xff] }
 0x791   : > { %v2687_v26 = vpop.f32.mrb[4].mxu1 }
 0x792   : > { %vm2696_vm4 = vcmp.ge.f32.partialorder %v2687_v26, 0.0  ;;  %v2697_v29 = vmul.f32 0.2, %v2687_v26  ;;  %v7838_v30 = vpop.f32.mrb[5].mxu1 }
 0x793   : > { %v2690_v31 = vpop.f32.mrb[6].mxu1 }
 0x794   : > { %v2698_v33 = vsel %vm2696_vm4, %v2687_v26, %v2697_v29  ;;  %v7839_v34 = vpop.f32.mrb[7].mxu1  ;;  %v3167_v31 = vld [vmem:[#allocation2 + $0x10] sm:$0xff] }
 0x795   : > { %v2699_v35 = vmul.f32 %v2698_v33, %v2694_v27  ;;  %v3120_v33 = vld [vmem:[%s10812_s2 + $0x18] sm:$0xff] }
 0x797   : > { %v2700_v36 = vadd.f32 %v2699_v35, %v2695_v32  ;;  %v3118_v35 = vld [vmem:[%s10812_s2 + $0x8] sm:$0xff] }
 0x799   : > { %v2881_v38 = vpack.c.bf16 %v2700_v36, %v2700_v36 }
 0x79b   : > { %7861 = vmatmul.mubr.msk.bf16.vlgmr.msra.gmra.mrb[8].mxu1 %vm1826_vm8, %v2881_v38 }
 0x79c   : > { %7871 = vmatpush3.bf16.msra.mxu1 %v8306_v25  ;;  %7872 = vmatprep.mubr.msk.bf16.mxu1 %vm3057_vm0, %v8307_v37 }
 0x79d   : > { %7876 = vmatprep.subr.bf16.mxu1 %v9647_v7 }
 0x7a3   : > { %7873 = vmatmul.mubr.msk.bf16.vlgmr.msra.gmra.mrb[12].mxu1 %vm3057_vm0, %v8308_v40  ;;  %v3246_v40 = vld [vmem:[%s10814_s13] sm:$0xff] }
 0x7a4   : > { %7886 = vmatprep.mubr.msk.bf16.mxu1 %vm9648_vm3, %v9647_v7 }
 0x7a5   : > { %7877 = vmatpush3.bf16.xpose.msra.mxu1 %v3191_v43  ;;  %v3283_v43 = vld [vmem:[%s10816_s14 + $0x10] sm:$0xff] }
 0x7a6   : > { %7878 = vmatprep.subr.bf16.mxu1 %v9647_v7  ;;  %v7200_v45 = vcombine.low %v3283_v43, %v3287_v44  ;;  %v7201_v46 = vcombine.high %v3283_v43, %v3287_v44  ;;  %v3282_v44 = vld [vmem:[%s10816_s14 + $0x8] sm:$0xff] }
 0x7a8   : > { %3631 = vmatprep.subr.bf16.mxu0 %v7201_v46 }
 0x7a9   : > { %3632 = vmatpush1.bf16.msra.mxu0 %v7200_v45  ;;  %v3286_v45 = vld [vmem:[%s10816_s14 + $0x28] sm:$0xff] }
 0x7aa   : > { %3633 = vmatprep.subr.bf16.mxu0 %v7209_v50  ;;  %v7198_v46 = vcombine.low %v3282_v44, %v3286_v45  ;;  %v7199_v47 = vcombine.high %v3282_v44, %v3286_v45 }
 0x7ad   : > { %3634 = vmatpush1.bf16.msra.mxu0 %v7208_v49 }
 0x86e   : > { %v2935_v59 = vpop.f32.mrb[8].mxu1 }
 0x86f   : > { %vm2943_vm7 = vcmp.ge.f32.partialorder %v2935_v59, 0.0  ;;  %v2944_v61 = vmul.f32 0.2, %v2935_v59  ;;  %v7862_v62 = vpop.f32.mrb[9].mxu1 }
 0x870   : > { %v2938_v63 = vpop.f32.mrb[10].mxu1 }
 0x871   : > { %v2945_v2 = vsel %vm2943_vm7, %v2935_v59, %v2944_v61  ;;  %v7863_v3 = vpop.f32.mrb[11].mxu1 }
 0x872   : > { %v2946_v4 = vmul.f32 %v2945_v2, %v2941_v60  ;;  %v3281_v3 = vld [vmem:[%s10816_s14] sm:$0xff] }
 0x874   : > { %v2947_v5 = vadd.f32 %v2946_v4, %v2942_v1  ;;  %v3285_v4 = vld [vmem:[%s10816_s14 + $0x20] sm:$0xff] }
 0x876   : > { %2949 = vst.msk [vmem:[#allocation2 + $0x18] sm:$0x1] %vm2948_vm9, %v2947_v5  ;;  %v7874_v6 = vpop.f32.mrb[12].mxu1 }
 0x877   : > { %vm3123_vm10 = vcmp.ge.f32.partialorder %v7874_v6, 0.0  ;;  %v3127_v8 = vmul.f32 0.2, %v7874_v6  ;;  %v3098_v9 = vpop.f32.mrb[13].mxu1 }
 0x878   : > { %vm3121_vm11 = vcmp.ge.f32.partialorder %v3098_v9, 0.0  ;;  %v3125_v11 = vmul.f32 0.2, %v3098_v9  ;;  %v7875_v12 = vpop.f32.mrb[14].mxu1 }
 0x879   : > { %v3131_v14 = vsel %vm3123_vm10, %v7874_v6, %v3127_v8  ;;  %vm3124_vm12 = vcmp.ge.f32.partialorder %v7875_v12, 0.0  ;;  %v3128_v16 = vmul.f32 0.2, %v7875_v12  ;;  %v3101_v17 = vpop.f32.mrb[15].mxu1  ;;  %v7197_v6 = vcombine.high %v3281_v3, %v3285_v4 }
 0x87a   : > { %v3129_v19 = vsel %vm3121_vm11, %v3098_v9, %v3125_v11  ;;  %vm3122_vm13 = vcmp.ge.f32.partialorder %v3101_v17, 0.0  ;;  %v3126_v21 = vmul.f32 0.2, %v3101_v17  ;;  %v3135_v22 = vmul.f32 %v3131_v14, %v3115_v10  ;;  %v3289_v9 = vld [vmem:[%s10816_s14 + $0x40] sm:$0xff] }
 0x87b   : > { %v3132_v24 = vsel %vm3124_vm12, %v7875_v12, %v3128_v16  ;;  %v3133_v25 = vmul.f32 %v3129_v19, %v3113_v13  ;;  %v3293_v10 = vld [vmem:[%s10816_s14 + $0x60] sm:$0xff]  ;;  %v7196_v12 = vcombine.low %v3281_v3, %v3285_v4  ;;  %v3299_v19 = vld [vmem:[%s10816_s14 + $0x90] sm:$0xff] }
 0x87c   : > { %v3136_v28 = vmul.f32 %v3132_v24, %v3116_v15  ;;  %v3130_v26 = vsel %vm3122_vm13, %v3101_v17, %v3126_v21  ;;  %v3139_v27 = vadd.f32 %v3135_v22, %v3119_v18  ;;  %v8309_v11 = vld [vmem:[%s10817_s26] sm:$0xff]   ;;  %v7205_v13 = vcombine.high %v3289_v9, %v3293_v10 }
 0x87d   : > { %v3134_v29 = vmul.f32 %v3130_v26, %v3114_v20  ;;  %v3137_v30 = vadd.f32 %v3133_v25, %v3117_v23  ;;  %v3168_v32 = vld [vmem:[#allocation2 + $0x18] sm:$0xff]  ;;  %v3297_v14 = vld [vmem:[%s10816_s14 + $0x80] sm:$0xff]  ;;  %v7204_v16 = vcombine.low %v3289_v9, %v3293_v10  ;;  %v3303_v20 = vld [vmem:[%s10816_s14 + $0xb0] sm:$0xff]  ;;  %v3519_v22 = vsel %vm3517_vm14, 4294967295, %v9646_v0 }
 0x87e   : > { %3153 = vperm.xlu1 %8278, %v3139_v27   ;;  %v3176_v34 = vpack.c.bf16 %v3168_v32, %v3167_v31  ;;  %v3140_v37 = vadd.f32 %v3136_v28, %v3120_v33  ;;  %v3301_v15 = vld [vmem:[%s10816_s14 + $0xa0] sm:$0xff]  ;;  %v7217_v21 = vcombine.high %v3299_v19, %v3303_v20  ;;  %v7216_v23 = vcombine.low %v3299_v19, %v3303_v20  ;;  %v3307_v26 = vld [vmem:[%s10816_s14 + $0xd0] sm:$0xff]  ;;  %v3298_v9 = vld [vmem:[%s10816_s14 + $0x88] sm:$0xff] }
 0x87f   : > { %3143 = vperm.xlu0 %8277, %v3137_v30   ;;  %v3138_v38 = vadd.f32 %v3134_v29, %v3118_v35  ;;  %v7213_v17 = vcombine.high %v3297_v14, %v3301_v15  ;;  %v7212_v18 = vcombine.low %v3297_v14, %v3301_v15  ;;  %v3305_v24 = vld [vmem:[%s10816_s14 + $0xc0] sm:$0xff]  ;;  %v3311_v27 = vld [vmem:[%s10816_s14 + $0xf0] sm:$0xff]  ;;  %v3302_v10 = vld [vmem:[%s10816_s14 + $0xa8] sm:$0xff] }
 0x880   : > { %v3194_v36 = vsel %vm1826_vm8, %v3176_v34, 0  ;;  %3635 = vmatprep.subr.bf16.mxu0 %v7217_v21  ;;  %v3309_v25 = vld [vmem:[%s10816_s14 + $0xe0] sm:$0xff]  ;;  %v7225_v31 = vcombine.high %v3307_v26, %v3311_v27  ;;  %v7224_v34 = vcombine.low %v3307_v26, %v3311_v27  ;;  %v3315_v0 = vld [vmem:[%s10816_s14 + $0x110] sm:$0xff]  ;;  %v3306_v14 = vld [vmem:[%s10816_s14 + $0xc8] sm:$0xff]  ;;  %v7214_v20 = vcombine.low %v3298_v9, %v3302_v10 }
 0x881   : > { %7879 = vmatpush3.bf16.xpose.msra.mxu1 %v3194_v36  ;;  %3636 = vmatpush1.bf16.msra.mxu0 %v7216_v23  ;;  %v7221_v28 = vcombine.high %v3305_v24, %v3309_v25  ;;  %v7220_v30 = vcombine.low %v3305_v24, %v3309_v25  ;;  %v3313_v32 = vld [vmem:[%s10816_s14 + $0x100] sm:$0xff]  ;;  %v3319_v36 = vld [vmem:[%s10816_s14 + $0x130] sm:$0x11]  ;;  %v3310_v15 = vld [vmem:[%s10816_s14 + $0xe8] sm:$0xff] }
 0x882   : > { %3158 = vperm.xlu1 %8278, %v3140_v37   ;;  %7880 = vmatprep.subr.bf16.mxu1 %v9647_v7  ;;  %v3317_v33 = vld [vmem:[%s10816_s14 + $0x120] sm:$0x11]  ;;  %v8324_v19 = vld [vmem:[#allocation23 + $0x44] ss:$16 sps:$4 sm:$0xff]   ;;  %v7223_v21 = vcombine.high %v3306_v14, %v3310_v15  ;;  %v7222_v25 = vcombine.low %v3306_v14, %v3310_v15  ;;  %v8331_v15 = vld [vmem:[#allocation23 + $0x68] ss:$16 sps:$4 sm:$0xff]  }
 0x883   : > { %3148 = vperm.xlu0 %8277, %v3138_v38   ;;  %v7229_v35 = vcombine.high %v3313_v32, %v3317_v33  ;;  %3637 = vmatprep.subr.bf16.mxu0 %v7225_v31  ;;  %v7228_v37 = vcombine.low %v3313_v32, %v3317_v33  ;;  %v7233_v38 = vcombine.high %v3315_v0, %v3319_v36  ;;  %v8322_v23 = vld [vmem:[#allocation23 + $0x40] ss:$16 sps:$4 sm:$0xff]   ;;  %v8330_v24 = vld [vmem:[#allocation23 + $0x64] ss:$16 sps:$4 sm:$0xff]  }
 0x884   : > { %v8328_v27 = vld [vmem:[#allocation23 + $0x60] ss:$16 sps:$4 sm:$0xff]   ;;  %v3288_v31 = vld [vmem:[%s10816_s14 + $0x38] sm:$0xff] }
 0x885   : > { %3638 = vmatpush1.bf16.msra.mxu0 %v7224_v34  ;;  %v8336_v32 = vld [vmem:[#allocation23 + $0x84] ss:$16 sps:$4 sm:$0xff]   ;;  %v8382_v14 = vld [vmem:[#allocation23 + $0x180] ss:$16 sps:$4 sm:$0xff]  }
 0x886   : > { %3263 = vperm.xlu1 %8278, %v3247_v39  }
 0x887   : > { %3258 = vperm.xlu0 %8277, %v3246_v40   ;;  %v7232_v40 = vcombine.low %v3315_v0, %v3319_v36  ;;  %v3292_v0 = vld [vmem:[%s10816_s14 + $0x58] sm:$0xff] }
 0x888   : > { %v3296_v36 = vld [vmem:[%s10816_s14 + $0x78] sm:$0xff] }
 0x889   : > { %v7210_v44 = vcombine.low %v3292_v0, %v3296_v36 }
 0x88a   : > { %3275 = vperm.xlu1 %8278, %v3249_v41  }
 0x88b   : > { %3270 = vperm.xlu0 %8277, %v3248_v42  }
 0x8fd   : > { %v3154_v51 = vpop.permute.xlu1 %3153 }
 0x8fe   : > { %3163 = vst.msk [vmem:[#allocation2 + $0x39] sm:$0xff] %vm1826_vm8, %v3154_v51  ;;  %v3144_v53 = vpop.permute.xlu0 %3143 }
 0x8ff   : > { %3161 = vst.msk [vmem:[#allocation2 + $0x29] sm:$0xff] %vm1826_vm8, %v3144_v53 }
 0x901   : > { %v3159_v54 = vpop.permute.xlu1 %3158 }
 0x902   : > { %3164 = vst.msk [vmem:[#allocation2 + $0x41] sm:$0xff] %vm1826_vm8, %v3159_v54  ;;  %v3149_v55 = vpop.permute.xlu0 %3148 }
 0x903   : > { %3162 = vst.msk [vmem:[#allocation2 + $0x31] sm:$0xff] %vm1826_vm8, %v3149_v55 }
 0x905   : > { %v3264_v49 = vpop.permute.xlu1 %3263 }
 0x906   : > { %v3170_v57 = vld [vmem:[#allocation2 + $0x28] sm:$0xff]  ;;  %v3259_v51 = vpop.permute.xlu0 %3258 }
 0x907   : > { %v3177_v58 = vpack.c.bf16 %v3170_v57, %v3169_v56 }
 0x909   : > { %v3197_v59 = vsel %vm1826_vm8, %v3177_v58, 0  ;;  %v3173_v1 = vld [vmem:[#allocation2 + $0x40] sm:$0xff]  ;;  %v3174_v2 = vld [vmem:[#allocation2 + $0x48] sm:$0x1] }
 0x90a   : > { %7881 = vmatpush3.bf16.xpose.msra.mxu1 %v3197_v59  ;;  %v3171_v60 = vld [vmem:[#allocation2 + $0x30] sm:$0xff]  ;;  %v3172_v61 = vld [vmem:[#allocation2 + $0x38] sm:$0xff]  ;;  %v3179_v5 = vpack.c.bf16 %v3174_v2, %v3173_v1  ;;  %v3290_v1 = vld [vmem:[%s10816_s14 + $0x48] sm:$0xff] }
 0x90b   : > { %7882 = vmatprep.subr.bf16.mxu1 %v9647_v7  ;;  %v3178_v62 = vpack.c.bf16 %v3172_v61, %v3171_v60  ;;  %v3294_v2 = vld [vmem:[%s10816_s14 + $0x68] sm:$0xff] }
 0x90c   : > { %v3203_v8 = vsel %vm1826_vm8, %v3179_v5, 0 }
 0x90d   : > { %v3200_v63 = vsel %vm1826_vm8, %v3178_v62, 0  ;;  %v3271_v62 = vpop.permute.xlu0 %3270 }
 0x912   : > { %7883 = vmatpush3.bf16.xpose.msra.mxu1 %v3200_v63  ;;  %v3276_v63 = vpop.permute.xlu1 %3275 }
 0x913   : > { %7884 = vmatprep.subr.bf16.mxu1 %v9647_v7 }
 0x91a   : > { %7885 = vmatpush3.bf16.xpose.msra.mxu1 %v3203_v8  ;;  %v8310_v8 = vld [vmem:[#allocation23] ss:$16 sps:$4 sm:$0xff]  }
 0x91b   : > { %3545 = vmatprep.subr.bf16.mxu1 %v7197_v6  ;;  %v7207_v6 = vcombine.high %v3290_v1, %v3294_v2 }
 0x921   : > { %7887 = vmatmul.mubr.msk.bf16.vlgmr.msra.gmra.mrb[16].mxu1 %vm1826_vm8, %v8309_v11  ;;  %vm3518_vm8 = vcmask 1044480   ;;  %v8318_v11 = vld [vmem:[#allocation23 + $0x24] ss:$16 sps:$4 sm:$0xff]  }
 0x922   : > { %3546 = vmatpush1.bf16.msra.mxu1 %v7196_v12  ;;  %3577 = vmatprep.mubr.bf16.mxu1 %v9649_v52  ;;  %v10509_v29 = vsel %vm3518_vm8, %v3519_v22, 0  ;;  %v7206_v12 = vcombine.low %v3290_v1, %v3294_v2  ;;  %v8364_v1 = vld [vmem:[#allocation23 + $0x120] ss:$16 sps:$4 sm:$0xff]   ;;  %v8372_v2 = vld [vmem:[#allocation23 + $0x144] ss:$16 sps:$4 sm:$0xff]  }
 0x923   : > { %3547 = vmatprep.subr.bf16.mxu1 %v7205_v13  ;;  %v3525_v39 = vand.u32 %v7229_v35, %v10509_v29  ;;  %v3522_v41 = vand.u32 %v7228_v37, %v10509_v29  ;;  %v3537_v42 = vand.u32 %v7233_v38, %v10509_v29  ;;  %v3534_v43 = vand.u32 %v7232_v40, %v10509_v29  ;;  %v8334_v35 = vld [vmem:[#allocation23 + $0x80] ss:$16 sps:$4 sm:$0xff]   ;;  %v8342_v37 = vld [vmem:[#allocation23 + $0xa4] ss:$16 sps:$4 sm:$0xff]  }
 0x924   : > { %v7215_v13 = vcombine.high %v3298_v9, %v3302_v10  ;;  %v8340_v40 = vld [vmem:[#allocation23 + $0xa0] ss:$16 sps:$4 sm:$0xff]   ;;  %v8319_v9 = vld [vmem:[#allocation23 + $0x28] ss:$16 sps:$4 sm:$0xff]  }
 0x925   : > { %3639 = vmatprep.subr.bf16.mxu0 %v3537_v42  ;;  %v3304_v42 = vld [vmem:[%s10816_s14 + $0xb8] sm:$0xff]  ;;  %v8376_v10 = vld [vmem:[#allocation23 + $0x160] ss:$16 sps:$4 sm:$0xff]  }
 0x926   : > { %3548 = vmatpush1.bf16.msra.mxu1 %v7204_v16  ;;  %3640 = vmatpush1.bf16.msra.mxu0 %v3534_v43  ;;  %v8316_v16 = vld [vmem:[#allocation23 + $0x20] ss:$16 sps:$4 sm:$0xff]   ;;  %v8348_v43 = vld [vmem:[#allocation23 + $0xc4] ss:$16 sps:$4 sm:$0xff]  }
 0x927   : > { %3549 = vmatprep.subr.bf16.mxu1 %v7213_v17  ;;  %5425 = vmatprep.subr.bf16.mxu0 %v8312_v48  ;;  %v3314_v17 = vld [vmem:[%s10816_s14 + $0x108] sm:$0xff]  ;;  %v8346_v48 = vld [vmem:[#allocation23 + $0xc0] ss:$16 sps:$4 sm:$0xff]  }
 0x92a   : > { %3550 = vmatpush1.bf16.msra.mxu1 %v7212_v18  ;;  %v3318_v18 = vld [vmem:[%s10816_s14 + $0x128] sm:$0x11] }
 0x92b   : > { %3551 = vmatprep.subr.bf16.mxu1 %v7221_v28  ;;  %v7231_v22 = vcombine.high %v3314_v17, %v3318_v18  ;;  %v7230_v28 = vcombine.low %v3314_v17, %v3318_v18  ;;  %v8345_v17 = vld [vmem:[#allocation23 + $0xac] ss:$16 sps:$4 sm:$0xff]   ;;  %v8343_v18 = vld [vmem:[#allocation23 + $0xa8] ss:$16 sps:$4 sm:$0xff]  }
 0x92d   : > { %v3531_v26 = vand.u32 %v7231_v22, %v10509_v29  ;;  %v3528_v33 = vand.u32 %v7230_v28, %v10509_v29  ;;  %v8355_v22 = vld [vmem:[#allocation23 + $0xe8] ss:$16 sps:$4 sm:$0xff]  }
 0x92e   : > { %3552 = vmatpush1.bf16.msra.mxu1 %v7220_v30  ;;  %v3284_v30 = vld [vmem:[%s10816_s14 + $0x18] sm:$0xff] }
 0x92f   : > { %3553 = vmatprep.subr.bf16.mxu1 %v3525_v39  ;;  %v7203_v34 = vcombine.high %v3284_v30, %v3288_v31  ;;  %v7202_v38 = vcombine.low %v3284_v30, %v3288_v31  ;;  %v7211_v39 = vcombine.high %v3292_v0, %v3296_v36  ;;  %v8367_v28 = vld [vmem:[#allocation23 + $0x128] ss:$16 sps:$4 sm:$0xff]   ;;  %v8381_v30 = vld [vmem:[#allocation23 + $0x16c] ss:$16 sps:$4 sm:$0xff]   ;;  %v3768_v31 = vlaneseq  ;;  %v8390_v36 = vld [vmem:[#allocation23 + $0x1a4] ss:$16 sps:$4 sm:$0xff]  }
 0x932   : > { %3554 = vmatpush1.bf16.msra.mxu1 %v3522_v41  ;;  %v3300_v41 = vld [vmem:[%s10816_s14 + $0x98] sm:$0xff] }
 0x933   : > { %3588 = vmatprep.subr.bf16.mxu1 %v7199_v47  ;;  %v7219_v45 = vcombine.high %v3300_v41, %v3304_v42  ;;  %v3312_v47 = vld [vmem:[%s10816_s14 + $0xf8] sm:$0xff] }
 0x9f4   : > { %v3239_v50 = vpop.f32.mrb[16].mxu1 }
 0x9f5   : > { %vm3250_vm15 = vcmp.ge.f32.partialorder %v3239_v50, 0.0  ;;  %v3252_v53 = vmul.f32 0.2, %v3239_v50  ;;  %v7888_v54 = vpop.f32.mrb[17].mxu1 }
 0x9f6   : > { %v3242_v55 = vpop.f32.mrb[18].mxu1 }
 0x9f7   : > { %v3254_v56 = vsel %vm3250_vm15, %v3239_v50, %v3252_v53  ;;  %vm3251_vm1 = vcmp.ge.f32.partialorder %v3242_v55, 0.0  ;;  %v3253_v57 = vmul.f32 0.2, %v3242_v55  ;;  %v7889_v58 = vpop.f32.mrb[19].mxu1  ;;  %v3320_v50 = vld [vmem:[%s10816_s14 + $0x138] sm:$0x11]  ;;  %v7218_v53 = vcombine.low %v3300_v41, %v3304_v42 }
 0x9f8   : > { %v3266_v59 = vmul.f32 %v3259_v51, %v3254_v56  ;;  %v8354_v51 = vld [vmem:[#allocation23 + $0xe4] ss:$16 sps:$4 sm:$0xff]   ;;  %v8352_v56 = vld [vmem:[#allocation23 + $0xe0] ss:$16 sps:$4 sm:$0xff]   ;;  %v8393_v42 = vld [vmem:[#allocation23 + $0x1ac] ss:$16 sps:$4 sm:$0xff]  }
 0x9f9   : > { %v3255_v60 = vsel %vm3251_vm1, %v3242_v55, %v3253_v57  ;;  %v8360_v57 = vld [vmem:[#allocation23 + $0x104] ss:$16 sps:$4 sm:$0xff]  }
 0x9fa   : > { %v3267_v61 = vmul.f32 %v3264_v49, %v3255_v60  ;;  %v3278_v3 = vadd.f32 %v3271_v62, %v3266_v59  ;;  %v3316_v49 = vld [vmem:[%s10816_s14 + $0x118] sm:$0xff]  ;;  %v8358_v60 = vld [vmem:[#allocation23 + $0x100] ss:$16 sps:$4 sm:$0xff]  }
 0x9fb   : > { %v7235_v55 = vcombine.high %v3316_v49, %v3320_v50  ;;  %v7234_v58 = vcombine.low %v3316_v49, %v3320_v50  ;;  %v8397_v49 = vld [vmem:[#allocation23 + $0x1c8] ss:$16 sps:$4 sm:$0xff]  }
 0x9fc   : > { %v3279_v4 = vadd.f32 %v3276_v63, %v3267_v61  ;;  %v8366_v61 = vld [vmem:[#allocation23 + $0x124] ss:$16 sps:$4 sm:$0xff]   ;;  %v8315_v63 = vld [vmem:[#allocation23 + $0xc] ss:$16 sps:$4 sm:$0xff]  }
 0x9fd   : > { %v3543_v59 = vand.u32 %v7235_v55, %v10509_v29  ;;  %v3540_v62 = vand.u32 %v7234_v58, %v10509_v29  ;;  %v8327_v29 = vld [vmem:[#allocation23 + $0x4c] ss:$16 sps:$4 sm:$0xff]   ;;  %v8403_v55 = vld [vmem:[#allocation23 + $0x1e8] ss:$16 sps:$4 sm:$0xff]  }
 0x9fe   : > { %v10523_v5 = vpack.c.bf16 %v3279_v4, %v3278_v3  ;;  %v8313_v3 = vld [vmem:[#allocation23 + $0x8] ss:$16 sps:$4 sm:$0xff]   ;;  %v8321_v4 = vld [vmem:[#allocation23 + $0x2c] ss:$16 sps:$4 sm:$0xff]  }
 0xa00   : > { %7236 = vmatmul.mubr.msk.bf16.vlgmr.msra.gmra.mrb[20].mxu1 %vm3513_vm2, %v10523_v5  ;;  %7238 = vmatmul.mubr.msk.bf16.vlgmr.msra.gmra.mrb[52].mxu0 %vm3513_vm2, %v10523_v5 }
 0xa01   : > { %3589 = vmatpush1.bf16.msra.mxu1 %v7198_v46  ;;  %3620 = vmatprep.mubr.bf16.mxu1 %v9649_v52  ;;  %v3308_v46 = vld [vmem:[%s10816_s14 + $0xd8] sm:$0xff] }
 0xa02   : > { %3590 = vmatprep.subr.bf16.mxu1 %v7207_v6  ;;  %5426 = vmatpush1.bf16.msra.mxu0 %v8310_v8  ;;  %v7227_v54 = vcombine.high %v3308_v46, %v3312_v47  ;;  %v8370_v6 = vld [vmem:[#allocation23 + $0x140] ss:$16 sps:$4 sm:$0xff]   ;;  %v8378_v8 = vld [vmem:[#allocation23 + $0x164] ss:$16 sps:$4 sm:$0xff]  }
 0xa03   : > { %5427 = vmatprep.subr.bf16.mxu0 %v8318_v11  ;;  %v8384_v11 = vld [vmem:[#allocation23 + $0x184] ss:$16 sps:$4 sm:$0xff]  }
 0xa05   : > { %3591 = vmatpush1.bf16.msra.mxu1 %v7206_v12  ;;  %v8325_v12 = vld [vmem:[#allocation23 + $0x48] ss:$16 sps:$4 sm:$0xff]  }
 0xa06   : > { %3592 = vmatprep.subr.bf16.mxu1 %v7215_v13  ;;  %5428 = vmatpush1.bf16.msra.mxu0 %v8316_v16  ;;  %v8333_v13 = vld [vmem:[#allocation23 + $0x6c] ss:$16 sps:$4 sm:$0xff]  }
 0xa07   : > { %5429 = vmatprep.subr.bf16.mxu0 %v8324_v19  ;;  %v8339_v16 = vld [vmem:[#allocation23 + $0x8c] ss:$16 sps:$4 sm:$0xff]  }
 0xa08   : > { %v8351_v19 = vld [vmem:[#allocation23 + $0xcc] ss:$16 sps:$4 sm:$0xff]  }
 0xa09   : > { %3593 = vmatpush1.bf16.msra.mxu1 %v7214_v20  ;;  %v8349_v20 = vld [vmem:[#allocation23 + $0xc8] ss:$16 sps:$4 sm:$0xff]  }
 0xa0a   : > { %3594 = vmatprep.subr.bf16.mxu1 %v7223_v21  ;;  %5430 = vmatpush1.bf16.msra.mxu0 %v8322_v23  ;;  %v8357_v21 = vld [vmem:[#allocation23 + $0xec] ss:$16 sps:$4 sm:$0xff]  }
 0xa0b   : > { %5431 = vmatprep.subr.bf16.mxu0 %v8330_v24  ;;  %v8363_v23 = vld [vmem:[#allocation23 + $0x10c] ss:$16 sps:$4 sm:$0xff]   ;;  %v8361_v24 = vld [vmem:[#allocation23 + $0x108] ss:$16 sps:$4 sm:$0xff]  }
 0xa0d   : > { %3595 = vmatpush1.bf16.msra.mxu1 %v7222_v25  ;;  %v8369_v25 = vld [vmem:[#allocation23 + $0x12c] ss:$16 sps:$4 sm:$0xff]  }
 0xa0e   : > { %3596 = vmatprep.subr.bf16.mxu1 %v3531_v26  ;;  %5432 = vmatpush1.bf16.msra.mxu0 %v8328_v27  ;;  %v8375_v26 = vld [vmem:[#allocation23 + $0x14c] ss:$16 sps:$4 sm:$0xff]   ;;  %v8373_v27 = vld [vmem:[#allocation23 + $0x148] ss:$16 sps:$4 sm:$0xff]  }
 0xa0f   : > { %5433 = vmatprep.subr.bf16.mxu0 %v8336_v32  ;;  %v8379_v32 = vld [vmem:[#allocation23 + $0x168] ss:$16 sps:$4 sm:$0xff]  }
 0xa11   : > { %3597 = vmatpush1.bf16.msra.mxu1 %v3528_v33  ;;  %v8387_v33 = vld [vmem:[#allocation23 + $0x18c] ss:$16 sps:$4 sm:$0xff]  }
 0xa12   : > { %3674 = vmatprep.subr.bf16.mxu1 %v7203_v34  ;;  %5434 = vmatpush1.bf16.msra.mxu0 %v8334_v35  ;;  %v10555_v34 = vshrl.u32 %v3768_v31, 7  ;;  %v10557_v35 = vld [vmem:[#allocation20] sm:$0xff] }
 0xa13   : > { %5435 = vmatprep.subr.bf16.mxu0 %v8342_v37  ;;  %v8385_v37 = vld [vmem:[#allocation23 + $0x188] ss:$16 sps:$4 sm:$0xff]  }
 0xa14   : > { %7237 = vmatmul.mubr.msk.bf16.vlgmr.msra.gmra.mrb[24].mxu1 %vm3513_vm2, %v10523_v5  ;;  %v3786_v0 = vsub.s32 4, %v10555_v34  ;;  %v3790_v41 = vsub.s32 5, %v10555_v34 }
 0xa15   : > { %3675 = vmatpush1.bf16.msra.mxu1 %v7202_v38  ;;  %3706 = vmatprep.mubr.bf16.mxu1 %v9649_v52  ;;  %v7226_v52 = vcombine.low %v3308_v46, %v3312_v47  ;;  %v10560_v38 = vld [vmem:[#allocation22] sm:$0xff]  ;;  %v8396_v46 = vld [vmem:[#allocation23 + $0x1c4] ss:$16 sps:$4 sm:$0xff]  }
 0xa16   : > { %3676 = vmatprep.subr.bf16.mxu1 %v7211_v39  ;;  %5436 = vmatpush1.bf16.msra.mxu0 %v8340_v40  ;;  %v8388_v39 = vld [vmem:[#allocation23 + $0x1a0] ss:$16 sps:$4 sm:$0xff]   ;;  %v10563_v40 = vrot.slane %v10557_v35, %v3786_v0  ;;  %v8399_v47 = vld [vmem:[#allocation23 + $0x1cc] ss:$16 sps:$4 sm:$0xff]   ;;  %v10573_v50 = vrot.slane %v10560_v38, %v3790_v41 }
 0xa17   : > { %5437 = vmatprep.subr.bf16.mxu0 %v8348_v43  ;;  %v10567_v43 = vrot.slane %v10560_v38, %v3786_v0 }
 0xa19   : > { %3677 = vmatpush1.bf16.msra.mxu1 %v7210_v44  ;;  %v10570_v44 = vrot.slane %v10557_v35, %v3790_v41 }
 0xa1a   : > { %3678 = vmatprep.subr.bf16.mxu1 %v7219_v45  ;;  %5438 = vmatpush1.bf16.msra.mxu0 %v8346_v48  ;;  %v8391_v45 = vld [vmem:[#allocation23 + $0x1a8] ss:$16 sps:$4 sm:$0xff]   ;;  %v8394_v48 = vld [vmem:[#allocation23 + $0x1c0] ss:$16 sps:$4 sm:$0xff]  }
 0xa1b   : > { %5439 = vmatprep.subr.bf16.mxu0 %v8354_v51  ;;  %v8402_v51 = vld [vmem:[#allocation23 + $0x1e4] ss:$16 sps:$4 sm:$0xff]  }
 0xa1d   : > { %3679 = vmatpush1.bf16.msra.mxu1 %v7218_v53  ;;  %v8405_v53 = vld [vmem:[#allocation23 + $0x1ec] ss:$16 sps:$4 sm:$0xff]  }
 0xa1e   : > { %3680 = vmatprep.subr.bf16.mxu1 %v7227_v54  ;;  %5440 = vmatpush1.bf16.msra.mxu0 %v8352_v56  ;;  %v8400_v54 = vld [vmem:[#allocation23 + $0x1e0] ss:$16 sps:$4 sm:$0xff]   ;;  %v8408_v56 = vld [vmem:[#allocation23 + $0x204] ss:$16 sps:$4 sm:$0xff]  }
 0xa1f   : > { %5441 = vmatprep.subr.bf16.mxu0 %v8360_v57  ;;  %v8411_v57 = vld [vmem:[#allocation23 + $0x20c] ss:$16 sps:$4 sm:$0xff]  }
 0xa21   : > { %3681 = vmatpush1.bf16.msra.mxu1 %v7226_v52  ;;  %v3794_v52 = vsub.s32 6, %v10555_v34 }
 0xa22   : > { %3682 = vmatprep.subr.bf16.mxu1 %v3543_v59  ;;  %5442 = vmatpush1.bf16.msra.mxu0 %v8358_v60  ;;  %v3798_v60 = vsub.s32 7, %v10555_v34 }
 0xa23   : > { %5443 = vmatprep.subr.bf16.mxu0 %v8366_v61  ;;  %v10577_v58 = vrot.slane %v10557_v35, %v3794_v52  ;;  %v10580_v59 = vrot.slane %v10560_v38, %v3794_v52  ;;  %v8409_v52 = vld [vmem:[#allocation23 + $0x208] ss:$16 sps:$4 sm:$0xff]  }
 0xa24   : > { %v10584_v61 = vrot.slane %v10557_v35, %v3798_v60 }
 0xa25   : > { %3683 = vmatpush1.bf16.msra.mxu1 %v3540_v62  ;;  %v10587_v62 = vrot.slane %v10560_v38, %v3798_v60 }
 0xa26   : > { %5597 = vmatprep.subr.bf16.mxu1 %v8315_v63  ;;  %5444 = vmatpush1.bf16.msra.mxu0 %v8364_v1  ;;  %v10590_v63 = vsub.s32 0, %v10555_v34 }
 0xa27   : > { %5445 = vmatprep.subr.bf16.mxu0 %v8372_v2 }
 0xa28   : > { %7239 = vmatmul.mubr.msk.bf16.vlgmr.msra.gmra.mrb[28].mxu1 %vm3513_vm2, %v10523_v5  ;;  %v8337_v5 = vld [vmem:[#allocation23 + $0x88] ss:$16 sps:$4 sm:$0xff]   ;;  %v3771_v2 = vrot.slane %v10557_v35, %v10590_v63 }
 0xa29   : > { %5598 = vmatpush1.bf16.msra.mxu1 %v8313_v3 }
 0xa2a   : > { %5599 = vmatprep.subr.bf16.mxu1 %v8321_v4  ;;  %5446 = vmatpush1.bf16.msra.mxu0 %v8370_v6  ;;  %v10595_v4 = vsub.s32 1, %v10555_v34 }
 0xa2b   : > { %5447 = vmatprep.subr.bf16.mxu0 %v8378_v8 }
 0xa2d   : > { %5600 = vmatpush1.bf16.msra.mxu1 %v8319_v9  ;;  %v3828_v9 = vrot.slane %v10560_v38, %v10590_v63 }
 0xa2e   : > { %5601 = vmatprep.subr.bf16.mxu1 %v8327_v29  ;;  %5448 = vmatpush1.bf16.msra.mxu0 %v8376_v10 }
 0xa2f   : > { %5449 = vmatprep.subr.bf16.mxu0 %v8384_v11 }
 0xa31   : > { %5602 = vmatpush1.bf16.msra.mxu1 %v8325_v12 }
 0xa32   : > { %5603 = vmatprep.subr.bf16.mxu1 %v8333_v13  ;;  %5450 = vmatpush1.bf16.msra.mxu0 %v8382_v14 }
 0xa33   : > { %5451 = vmatprep.subr.bf16.mxu0 %v8390_v36 }
 0xa35   : > { %5604 = vmatpush1.bf16.msra.mxu1 %v8331_v15 }
 0xa36   : > { %5605 = vmatprep.subr.bf16.mxu1 %v8339_v16  ;;  %5452 = vmatpush1.bf16.msra.mxu0 %v8388_v39 }
 0xa37   : > { %5453 = vmatprep.subr.bf16.mxu0 %v8396_v46 }
 0xa39   : > { %5606 = vmatpush1.bf16.msra.mxu1 %v8337_v5  ;;  %v3775_v5 = vrot.slane %v10557_v35, %v10595_v4 }
 0xa3a   : > { %5607 = vmatprep.subr.bf16.mxu1 %v8345_v17  ;;  %5454 = vmatpush1.bf16.msra.mxu0 %v8394_v48 }
 0xa3b   : > { %5455 = vmatprep.subr.bf16.mxu0 %v8402_v51 }
 0xa3d   : > { %5608 = vmatpush1.bf16.msra.mxu1 %v8343_v18 }
 0xa3e   : > { %5609 = vmatprep.subr.bf16.mxu1 %v8351_v19  ;;  %5456 = vmatpush1.bf16.msra.mxu0 %v8400_v54 }
 0xa3f   : > { %5468 = vmatprep.subr.bf16.mxu0 %v8408_v56 }
 0xa41   : > { %5610 = vmatpush1.bf16.msra.mxu1 %v8349_v20 }
 0xa42   : > { %5611 = vmatprep.subr.bf16.mxu1 %v8357_v21 }
 0xa45   : > { %5612 = vmatpush1.bf16.msra.mxu1 %v8355_v22  ;;  %v3832_v22 = vrot.slane %v10560_v38, %v10595_v4 }
 0xa46   : > { %5613 = vmatprep.subr.bf16.mxu1 %v8363_v23 }
 0xa49   : > { %5614 = vmatpush1.bf16.msra.mxu1 %v8361_v24 }
 0xa4a   : > { %5615 = vmatprep.subr.bf16.mxu1 %v8369_v25 }
 0xa4d   : > { %5616 = vmatpush1.bf16.msra.mxu1 %v8367_v28 }
 0xa4e   : > { %5617 = vmatprep.subr.bf16.mxu1 %v8375_v26 }
 0xa51   : > { %5618 = vmatpush1.bf16.msra.mxu1 %v8373_v27 }
 0xa52   : > { %5619 = vmatprep.subr.bf16.mxu1 %v8381_v30 }
 0xa55   : > { %5620 = vmatpush1.bf16.msra.mxu1 %v8379_v32 }
 0xa56   : > { %5621 = vmatprep.subr.bf16.mxu1 %v8387_v33 }
 0xa59   : > { %5622 = vmatpush1.bf16.msra.mxu1 %v8385_v37 }
 0xa5a   : > { %5623 = vmatprep.subr.bf16.mxu1 %v8393_v42 }
 0xa5d   : > { %5624 = vmatpush1.bf16.msra.mxu1 %v8391_v45 }
 0xa5e   : > { %5625 = vmatprep.subr.bf16.mxu1 %v8399_v47 }
 0xa61   : > { %5626 = vmatpush1.bf16.msra.mxu1 %v8397_v49 }
 0xa62   : > { %5627 = vmatprep.subr.bf16.mxu1 %v8405_v53 }
 0xa65   : > { %5628 = vmatpush1.bf16.msra.mxu1 %v8403_v55 }
 0xa66   : > { %5640 = vmatprep.subr.bf16.mxu1 %v8411_v57  ;;  %v8406_v57 = vld [vmem:[#allocation23 + $0x200] ss:$16 sps:$4 sm:$0xff]  }
 0xad3   : > { %v3579_v1 = vpop.f32.mrb[20].mxu1  ;;  %v3665_v3 = vpop.f32.mrb[52].mxu0 }
 0xad4   : > { %vm3719_vm4 = vcmp.ge.f32.partialorder %v3579_v1, 0.0  ;;  %v3735_v6 = vmul.f32 0.2, %v3579_v1  ;;  %vm3723_vm0 = vcmp.ge.f32.partialorder %v3665_v3, 0.0  ;;  %v3739_v8 = vmul.f32 0.2, %v3665_v3 }
 0xad5   : > { %v3581_v29 = vpop.f32.mrb[21].mxu1  ;;  %v3667_v10 = vpop.f32.mrb[53].mxu0 }
 0xad6   : > { %v3751_v11 = vsel %vm3719_vm4, %v3579_v1, %v3735_v6  ;;  %v3755_v12 = vsel %vm3723_vm0, %v3665_v3, %v3739_v8  ;;  %vm3720_vm5 = vcmp.ge.f32.partialorder %v3581_v29, 0.0  ;;  %v3736_v13 = vmul.f32 0.2, %v3581_v29  ;;  %v3583_v14 = vpop.f32.mrb[22].mxu1  ;;  %v3669_v15 = vpop.f32.mrb[54].mxu0 }
 0xad7   : > { %v3812_v16 = vmul.f32 %v10563_v40, %v3755_v12  ;;  %vm3724_vm6 = vcmp.ge.f32.partialorder %v3667_v10, 0.0  ;;  %v3740_v17 = vmul.f32 0.2, %v3667_v10  ;;  %v3585_v18 = vpop.f32.mrb[23].mxu1  ;;  %v3671_v19 = vpop.f32.mrb[55].mxu0  ;;  %v3808_v20 = vmul.f32 %v3771_v2, %v3751_v11 }
 0xad8   : > { %vm3727_vm7 = vcmp.ge.f32.partialorder %v3583_v14, 0.0  ;;  %v3743_v21 = vmul.f32 0.2, %v3583_v14  ;;  %v3752_v24 = vsel %vm3720_vm5, %v3581_v29, %v3736_v13  ;;  %vm3731_vm9 = vcmp.ge.f32.partialorder %v3669_v15, 0.0  ;;  %v8417_v1 = vld [vmem:[#allocation23 + $0x22c] ss:$16 sps:$4 sm:$0xff]  }
 0xad9   : > { %v3869_v23 = vadd.f32 %v10567_v43, %v3812_v16  ;;  %v3756_v25 = vsel %vm3724_vm6, %v3667_v10, %v3740_v17  ;;  %v3747_v27 = vmul.f32 0.2, %v3669_v15  ;;  %vm3728_vm10 = vcmp.ge.f32.partialorder %v3585_v18, 0.0  ;;  %v8420_v8 = vld [vmem:[#allocation23 + $0x244] ss:$16 sps:$4 sm:$0xff]  }
 0xada   : > { %v3813_v28 = vmul.f32 %v10570_v44, %v3756_v25  ;;  %v3759_v26 = vsel %vm3727_vm7, %v3583_v14, %v3743_v21  ;;  %v3744_v31 = vmul.f32 0.2, %v3585_v18  ;;  %vm3732_vm11 = vcmp.ge.f32.partialorder %v3671_v19, 0.0  ;;  %v8418_v11 = vld [vmem:[#allocation23 + $0x240] ss:$16 sps:$4 sm:$0xff]  }
 0xadb   : > { %v3816_v30 = vmul.f32 %v3771_v2, %v3759_v26  ;;  %v3748_v32 = vmul.f32 0.2, %v3671_v19  ;;  %v3865_v33 = vadd.f32 %v3828_v9, %v3808_v20  ;;  %v3809_v0 = vmul.f32 %v3775_v5, %v3752_v24  ;;  %v8429_v21 = vld [vmem:[#allocation23 + $0x26c] ss:$16 sps:$4 sm:$0xff]  }
 0xadc   : > { %v3763_v36 = vsel %vm3731_vm9, %v3669_v15, %v3747_v27  ;;  %v3870_v37 = vadd.f32 %v10573_v50, %v3813_v28  ;;  %v3760_v42 = vsel %vm3728_vm10, %v3585_v18, %v3744_v31  ;;  %v10616_v2 = vsub.s32 2, %v10555_v34  ;;  %v8421_v15 = vld [vmem:[#allocation23 + $0x248] ss:$16 sps:$4 sm:$0xff]   ;;  %v8426_v18 = vld [vmem:[#allocation23 + $0x264] ss:$16 sps:$4 sm:$0xff]  }
 0xadd   : > { %v3873_v39 = vadd.f32 %v3828_v9, %v3816_v30  ;;  %v3820_v41 = vmul.f32 %v10563_v40, %v3763_v36  ;;  %v3764_v45 = vsel %vm3732_vm11, %v3671_v19, %v3748_v32  ;;  %v3817_v46 = vmul.f32 %v3775_v5, %v3760_v42  ;;  %v8414_v40 = vld [vmem:[#allocation23 + $0x224] ss:$16 sps:$4 sm:$0xff]   ;;  %v8423_v9 = vld [vmem:[#allocation23 + $0x24c] ss:$16 sps:$4 sm:$0xff]   ;;  %v8424_v30 = vld [vmem:[#allocation23 + $0x260] ss:$16 sps:$4 sm:$0xff]  }
 0xade   : > { %v3821_v47 = vmul.f32 %v10570_v44, %v3764_v45  ;;  %v3866_v51 = vadd.f32 %v3832_v22, %v3809_v0  ;;  %v8412_v44 = vld [vmem:[#allocation23 + $0x220] ss:$16 sps:$4 sm:$0xff]   ;;  %v3779_v6 = vrot.slane %v10557_v35, %v10616_v2  ;;  %v3836_v12 = vrot.slane %v10560_v38, %v10616_v2  ;;  %v8427_v31 = vld [vmem:[#allocation23 + $0x268] ss:$16 sps:$4 sm:$0xff]   ;;  %v8435_v0 = vld [vmem:[#allocation23 + $0x28c] ss:$16 sps:$4 sm:$0xff]  }
 0xadf   : > { %v3877_v48 = vadd.f32 %v10567_v43, %v3820_v41  ;;  %v3881_v49 = vpack.c.bf16 %v3873_v39, %v3865_v33  ;;  %v3874_v53 = vadd.f32 %v3832_v22, %v3817_v46  ;;  %v10619_v43 = vsub.s32 3, %v10555_v34  ;;  %v8432_v33 = vld [vmem:[#allocation23 + $0x284] ss:$16 sps:$4 sm:$0xff]   ;;  %v8433_v41 = vld [vmem:[#allocation23 + $0x288] ss:$16 sps:$4 sm:$0xff]  }
 0xae0   : > { %v3878_v54 = vadd.f32 %v10573_v50, %v3821_v47  ;;  %v8415_v50 = vld [vmem:[#allocation23 + $0x228] ss:$16 sps:$4 sm:$0xff]   ;;  %v8438_v45 = vld [vmem:[#allocation23 + $0x2a4] ss:$16 sps:$4 sm:$0xff]   ;;  %v8441_v46 = vld [vmem:[#allocation23 + $0x2ac] ss:$16 sps:$4 sm:$0xff]  }
 0xae1   : > { %v10611_v55 = vpack.c.bf16 %v3877_v48, %v3869_v23  ;;  %v3882_v56 = vpack.c.bf16 %v3874_v53, %v3866_v51  ;;  %v3783_v34 = vrot.slane %v10557_v35, %v10619_v43  ;;  %v3840_v24 = vrot.slane %v10560_v38, %v10619_v43  ;;  %v8430_v38 = vld [vmem:[#allocation23 + $0x280] ss:$16 sps:$4 sm:$0xff]   ;;  %v8439_v48 = vld [vmem:[#allocation23 + $0x2a8] ss:$16 sps:$4 sm:$0xff]   ;;  %v8447_v51 = vld [vmem:[#allocation23 + $0x2cc] ss:$16 sps:$4 sm:$0xff]  }
 0xae2   : > { %v10613_v60 = vpack.c.bf16 %v3878_v54, %v3870_v37  ;;  %v8436_v47 = vld [vmem:[#allocation23 + $0x2a0] ss:$16 sps:$4 sm:$0xff]   ;;  %v8445_v54 = vld [vmem:[#allocation23 + $0x2c8] ss:$16 sps:$4 sm:$0xff]  }
 0xae3   : > { %5457 = vmatprep.mubr.bf16.mxu0 %v3882_v56  ;;  %5629 = vmatprep.mubr.bf16.mxu1 %v3882_v56  ;;  %v8442_v53 = vld [vmem:[#allocation23 + $0x2c0] ss:$16 sps:$4 sm:$0xff]  }
 0xae4   : > { %5458 = vmatmul.mubr.bf16.vlgmr.msra.gmra.mrb[56].mxu0 %v3881_v49  ;;  %5630 = vmatmul.mubr.bf16.vlgmr.msra.gmra.mrb[32].mxu1 %v3881_v49  ;;  %v8444_v49 = vld [vmem:[#allocation23 + $0x2c4] ss:$16 sps:$4 sm:$0xff]  }
 0xae5   : > { %5469 = vmatpush1.bf16.msra.mxu0 %v8406_v57  ;;  %5641 = vmatpush1.bf16.msra.mxu1 %v8409_v52  ;;  %v8450_v57 = vld [vmem:[#allocation23 + $0x2e4] ss:$16 sps:$4 sm:$0xff]   ;;  %v8453_v52 = vld [vmem:[#allocation23 + $0x2ec] ss:$16 sps:$4 sm:$0xff]  }
 0xae6   : > { %5470 = vmatprep.subr.bf16.mxu0 %v8414_v40  ;;  %5642 = vmatprep.subr.bf16.mxu1 %v8417_v1 }
 0xae7   : > { %v3622_v3 = vpop.f32.mrb[24].mxu1 }
 0xae8   : > { %vm3721_vm12 = vcmp.ge.f32.partialorder %v3622_v3, 0.0  ;;  %v3737_v29 = vmul.f32 0.2, %v3622_v3  ;;  %v3624_v10 = vpop.f32.mrb[25].mxu1 }
 0xae9   : > { %vm3722_vm13 = vcmp.ge.f32.partialorder %v3624_v10, 0.0  ;;  %v3738_v13 = vmul.f32 0.2, %v3624_v10  ;;  %v3626_v14 = vpop.f32.mrb[26].mxu1  ;;  %5471 = vmatpush1.bf16.msra.mxu0 %v8412_v44  ;;  %5643 = vmatpush1.bf16.msra.mxu1 %v8415_v50  ;;  %v8448_v44 = vld [vmem:[#allocation23 + $0x2e0] ss:$16 sps:$4 sm:$0xff]  }
 0xaea   : > { %v3753_v16 = vsel %vm3721_vm12, %v3622_v3, %v3737_v29  ;;  %vm3729_vm14 = vcmp.ge.f32.partialorder %v3626_v14, 0.0  ;;  %v3745_v5 = vmul.f32 0.2, %v3626_v14  ;;  %v3628_v17 = vpop.f32.mrb[27].mxu1  ;;  %5472 = vmatprep.subr.bf16.mxu0 %v8420_v8  ;;  %5644 = vmatprep.subr.bf16.mxu1 %v8423_v9 }
 0xaeb   : > { %v3810_v19 = vmul.f32 %v3779_v6, %v3753_v16  ;;  %v3754_v20 = vsel %vm3722_vm13, %v3624_v10, %v3738_v13  ;;  %vm3730_vm8 = vcmp.ge.f32.partialorder %v3628_v17, 0.0  ;;  %v3746_v35 = vmul.f32 0.2, %v3628_v17  ;;  %v8456_v10 = vld [vmem:[#allocation23 + $0x304] ss:$16 sps:$4 sm:$0xff]  }
 0xaec   : > { %v3811_v22 = vmul.f32 %v3783_v34, %v3754_v20  ;;  %v3761_v23 = vsel %vm3729_vm14, %v3626_v14, %v3745_v5  ;;  %v8459_v13 = vld [vmem:[#allocation23 + $0x30c] ss:$16 sps:$4 sm:$0xff]   ;;  %v8457_v20 = vld [vmem:[#allocation23 + $0x308] ss:$16 sps:$4 sm:$0xff]  }
 0xaed   : > { %v3867_v25 = vadd.f32 %v3836_v12, %v3810_v19  ;;  %v3818_v28 = vmul.f32 %v3779_v6, %v3761_v23  ;;  %v3762_v26 = vsel %vm3730_vm8, %v3628_v17, %v3746_v35  ;;  %5473 = vmatpush1.bf16.msra.mxu0 %v8418_v11  ;;  %5645 = vmatpush1.bf16.msra.mxu1 %v8421_v15  ;;  %v8451_v6 = vld [vmem:[#allocation23 + $0x2e8] ss:$16 sps:$4 sm:$0xff]   ;;  %v8454_v19 = vld [vmem:[#allocation23 + $0x300] ss:$16 sps:$4 sm:$0xff]   ;;  %v8465_v23 = vld [vmem:[#allocation23 + $0x32c] ss:$16 sps:$4 sm:$0xff]  }
 0xaee   : > { %v3819_v27 = vmul.f32 %v3783_v34, %v3762_v26  ;;  %5474 = vmatprep.subr.bf16.mxu0 %v8426_v18  ;;  %5646 = vmatprep.subr.bf16.mxu1 %v8429_v21  ;;  %v3868_v36 = vadd.f32 %v3840_v24, %v3811_v22  ;;  %v8462_v22 = vld [vmem:[#allocation23 + $0x324] ss:$16 sps:$4 sm:$0xff]  }
 0xaef   : > { %v3875_v32 = vadd.f32 %v3836_v12, %v3818_v28  ;;  %v8468_v26 = vld [vmem:[#allocation23 + $0x344] ss:$16 sps:$4 sm:$0xff]  }
 0xaf0   : > { %v3876_v37 = vadd.f32 %v3840_v24, %v3819_v27  ;;  %v8471_v27 = vld [vmem:[#allocation23 + $0x34c] ss:$16 sps:$4 sm:$0xff]  }
 0xaf1   : > { %v10629_v39 = vpack.c.bf16 %v3875_v32, %v3867_v25  ;;  %5475 = vmatpush1.bf16.msra.mxu0 %v8424_v30  ;;  %5647 = vmatpush1.bf16.msra.mxu1 %v8427_v31  ;;  %v8469_v30 = vld [vmem:[#allocation23 + $0x348] ss:$16 sps:$4 sm:$0xff]   ;;  %v8474_v31 = vld [vmem:[#allocation23 + $0x364] ss:$16 sps:$4 sm:$0xff]   ;;  %v8472_v32 = vld [vmem:[#allocation23 + $0x360] ss:$16 sps:$4 sm:$0xff]  }
 0xaf2   : > { %v3884_v42 = vpack.c.bf16 %v3876_v37, %v3868_v36  ;;  %5476 = vmatprep.subr.bf16.mxu0 %v8432_v33  ;;  %5648 = vmatprep.subr.bf16.mxu1 %v8435_v0  ;;  %v8475_v33 = vld [vmem:[#allocation23 + $0x368] ss:$16 sps:$4 sm:$0xff]   ;;  %v8480_v0 = vld [vmem:[#allocation23 + $0x384] ss:$16 sps:$4 sm:$0xff]   ;;  %v8483_v36 = vld [vmem:[#allocation23 + $0x38c] ss:$16 sps:$4 sm:$0xff]  }
 0xaf3   : > { %v8478_v37 = vld [vmem:[#allocation23 + $0x380] ss:$16 sps:$4 sm:$0xff]  }
 0xaf4   : > { %5500 = vmatprep.mubr.bf16.mxu0 %v3884_v42  ;;  %5672 = vmatprep.mubr.bf16.mxu1 %v3884_v42  ;;  %v8489_v42 = vld [vmem:[#allocation23 + $0x3ac] ss:$16 sps:$4 sm:$0xff]  }
 0xaf5   : > { %5477 = vmatpush1.bf16.msra.mxu0 %v8430_v38  ;;  %5649 = vmatpush1.bf16.msra.mxu1 %v8433_v41  ;;  %v8481_v38 = vld [vmem:[#allocation23 + $0x388] ss:$16 sps:$4 sm:$0xff]   ;;  %v8486_v41 = vld [vmem:[#allocation23 + $0x3a4] ss:$16 sps:$4 sm:$0xff]  }
 0xaf6   : > { %5478 = vmatprep.subr.bf16.mxu0 %v8438_v45  ;;  %5650 = vmatprep.subr.bf16.mxu1 %v8441_v46  ;;  %v8484_v45 = vld [vmem:[#allocation23 + $0x3a0] ss:$16 sps:$4 sm:$0xff]   ;;  %v8487_v46 = vld [vmem:[#allocation23 + $0x3a8] ss:$16 sps:$4 sm:$0xff]  }
 0xaf9   : > { %5479 = vmatpush1.bf16.msra.mxu0 %v8436_v47  ;;  %5651 = vmatpush1.bf16.msra.mxu1 %v8439_v48  ;;  %v8492_v47 = vld [vmem:[#allocation23 + $0x3c4] ss:$16 sps:$4 sm:$0xff]   ;;  %v8495_v48 = vld [vmem:[#allocation23 + $0x3cc] ss:$16 sps:$4 sm:$0xff]  }
 0xafa   : > { %5480 = vmatprep.subr.bf16.mxu0 %v8444_v49  ;;  %5652 = vmatprep.subr.bf16.mxu1 %v8447_v51  ;;  %v8490_v49 = vld [vmem:[#allocation23 + $0x3c0] ss:$16 sps:$4 sm:$0xff]   ;;  %v8493_v51 = vld [vmem:[#allocation23 + $0x3c8] ss:$16 sps:$4 sm:$0xff]  }
 0xafb   : > { %v3708_v56 = vpop.f32.mrb[28].mxu1 }
 0xafc   : > { %vm3725_vm15 = vcmp.ge.f32.partialorder %v3708_v56, 0.0  ;;  %v3741_v40 = vmul.f32 0.2, %v3708_v56  ;;  %v3710_v1 = vpop.f32.mrb[29].mxu1 }
 0xafd   : > { %vm3726_vm1 = vcmp.ge.f32.partialorder %v3710_v1, 0.0  ;;  %v3742_v50 = vmul.f32 0.2, %v3710_v1  ;;  %v3712_v3 = vpop.f32.mrb[30].mxu1  ;;  %5481 = vmatpush1.bf16.msra.mxu0 %v8442_v53  ;;  %5653 = vmatpush1.bf16.msra.mxu1 %v8445_v54  ;;  %v8498_v53 = vld [vmem:[#allocation23 + $0x3e4] ss:$16 sps:$4 sm:$0xff]  }
 0xafe   : > { %v3757_v8 = vsel %vm3725_vm15, %v3708_v56, %v3741_v40  ;;  %vm3733_vm2 = vcmp.ge.f32.partialorder %v3712_v3, 0.0  ;;  %v3749_v9 = vmul.f32 0.2, %v3712_v3  ;;  %v3714_v29 = vpop.f32.mrb[31].mxu1  ;;  %5482 = vmatprep.subr.bf16.mxu0 %v8450_v57  ;;  %5654 = vmatprep.subr.bf16.mxu1 %v8453_v52  ;;  %v8501_v54 = vld [vmem:[#allocation23 + $0x3ec] ss:$16 sps:$4 sm:$0xff]  }
 0xaff   : > { %v3814_v34 = vmul.f32 %v10577_v58, %v3757_v8  ;;  %v3758_v11 = vsel %vm3726_vm1, %v3710_v1, %v3742_v50  ;;  %vm3734_vm4 = vcmp.ge.f32.partialorder %v3714_v29, 0.0  ;;  %v3750_v12 = vmul.f32 0.2, %v3714_v29  ;;  %v8496_v56 = vld [vmem:[#allocation23 + $0x3e0] ss:$16 sps:$4 sm:$0xff]  }
 0xb00   : > { %v3815_v14 = vmul.f32 %v10584_v61, %v3758_v11  ;;  %v3765_v15 = vsel %vm3733_vm2, %v3712_v3, %v3749_v9  ;;  %v8499_v57 = vld [vmem:[#allocation23 + $0x3e8] ss:$16 sps:$4 sm:$0xff]   ;;  %v8504_v52 = vld [vmem:[#allocation23 + $0x404] ss:$16 sps:$4 sm:$0xff]   ;;  %v8507_v40 = vld [vmem:[#allocation23 + $0x40c] ss:$16 sps:$4 sm:$0xff]  }
 0xb01   : > { %v3871_v16 = vadd.f32 %v10580_v59, %v3814_v34  ;;  %v3822_v5 = vmul.f32 %v10577_v58, %v3765_v15  ;;  %v3766_v17 = vsel %vm3734_vm4, %v3714_v29, %v3750_v12  ;;  %5483 = vmatpush1.bf16.msra.mxu0 %v8448_v44  ;;  %5655 = vmatpush1.bf16.msra.mxu1 %v8451_v6  ;;  %v8460_v58 = vld [vmem:[#allocation23 + $0x320] ss:$16 sps:$4 sm:$0xff]   ;;  %v8505_v44 = vld [vmem:[#allocation23 + $0x408] ss:$16 sps:$4 sm:$0xff]   ;;  %v8510_v50 = vld [vmem:[#allocation23 + $0x424] ss:$16 sps:$4 sm:$0xff]  }
 0xb02   : > { %v3823_v18 = vmul.f32 %v10584_v61, %v3766_v17  ;;  %v3872_v35 = vadd.f32 %v10587_v62, %v3815_v14  ;;  %5484 = vmatprep.subr.bf16.mxu0 %v8456_v10  ;;  %5656 = vmatprep.subr.bf16.mxu1 %v8459_v13  ;;  %v8463_v61 = vld [vmem:[#allocation23 + $0x328] ss:$16 sps:$4 sm:$0xff]   ;;  %v8502_v1 = vld [vmem:[#allocation23 + $0x400] ss:$16 sps:$4 sm:$0xff]   ;;  %v8513_v3 = vld [vmem:[#allocation23 + $0x42c] ss:$16 sps:$4 sm:$0xff]  }
 0xb03   : > { %v3879_v21 = vadd.f32 %v10580_v59, %v3822_v5  ;;  %v8466_v59 = vld [vmem:[#allocation23 + $0x340] ss:$16 sps:$4 sm:$0xff]   ;;  %v8511_v8 = vld [vmem:[#allocation23 + $0x428] ss:$16 sps:$4 sm:$0xff]   ;;  %v8516_v9 = vld [vmem:[#allocation23 + $0x444] ss:$16 sps:$4 sm:$0xff]  }
 0xb04   : > { %v3880_v24 = vadd.f32 %v10587_v62, %v3823_v18  ;;  %v8477_v62 = vld [vmem:[#allocation23 + $0x36c] ss:$16 sps:$4 sm:$0xff]   ;;  %v8508_v6 = vld [vmem:[#allocation23 + $0x420] ss:$16 sps:$4 sm:$0xff]   ;;  %v8517_v34 = vld [vmem:[#allocation23 + $0x448] ss:$16 sps:$4 sm:$0xff]  }
 0xb05   : > { %v10639_v25 = vpack.c.bf16 %v3879_v21, %v3871_v16  ;;  %5485 = vmatpush1.bf16.msra.mxu0 %v8454_v19  ;;  %5657 = vmatpush1.bf16.msra.mxu1 %v8457_v20  ;;  %v8519_v29 = vld [vmem:[#allocation23 + $0x44c] ss:$16 sps:$4 sm:$0xff]   ;;  %v8514_v10 = vld [vmem:[#allocation23 + $0x440] ss:$16 sps:$4 sm:$0xff]   ;;  %v8522_v11 = vld [vmem:[#allocation23 + $0x464] ss:$16 sps:$4 sm:$0xff]  }
 0xb06   : > { %v10641_v28 = vpack.c.bf16 %v3880_v24, %v3872_v35  ;;  %5486 = vmatprep.subr.bf16.mxu0 %v8462_v22  ;;  %5658 = vmatprep.subr.bf16.mxu1 %v8465_v23  ;;  %v8520_v12 = vld [vmem:[#allocation23 + $0x460] ss:$16 sps:$4 sm:$0xff]   ;;  %v8523_v13 = vld [vmem:[#allocation23 + $0x468] ss:$16 sps:$4 sm:$0xff]   ;;  %v8528_v14 = vld [vmem:[#allocation23 + $0x484] ss:$16 sps:$4 sm:$0xff]  }
 0xb07   : > { %v8526_v15 = vld [vmem:[#allocation23 + $0x480] ss:$16 sps:$4 sm:$0xff]   ;;  %v8529_v16 = vld [vmem:[#allocation23 + $0x488] ss:$16 sps:$4 sm:$0xff]   ;;  %v8534_v5 = vld [vmem:[#allocation23 + $0x4a4] ss:$16 sps:$4 sm:$0xff]  }
 0xb08   : > { %v8537_v17 = vld [vmem:[#allocation23 + $0x4ac] ss:$16 sps:$4 sm:$0xff]   ;;  %v8532_v18 = vld [vmem:[#allocation23 + $0x4a0] ss:$16 sps:$4 sm:$0xff]   ;;  %v8535_v19 = vld [vmem:[#allocation23 + $0x4a8] ss:$16 sps:$4 sm:$0xff]  }
 0xb09   : > { %5487 = vmatpush1.bf16.msra.mxu0 %v8460_v58  ;;  %5659 = vmatpush1.bf16.msra.mxu1 %v8463_v61  ;;  %v8540_v20 = vld [vmem:[#allocation23 + $0x4c4] ss:$16 sps:$4 sm:$0xff]   ;;  %v8543_v35 = vld [vmem:[#allocation23 + $0x4cc] ss:$16 sps:$4 sm:$0xff]   ;;  %v8538_v21 = vld [vmem:[#allocation23 + $0x4c0] ss:$16 sps:$4 sm:$0xff]  }
 0xb0a   : > { %5488 = vmatprep.subr.bf16.mxu0 %v8468_v26  ;;  %5660 = vmatprep.subr.bf16.mxu1 %v8471_v27  ;;  %v8541_v22 = vld [vmem:[#allocation23 + $0x4c8] ss:$16 sps:$4 sm:$0xff]   ;;  %v8546_v23 = vld [vmem:[#allocation23 + $0x4e4] ss:$16 sps:$4 sm:$0xff]   ;;  %v8549_v24 = vld [vmem:[#allocation23 + $0x4ec] ss:$16 sps:$4 sm:$0xff]  }
 0xb0b   : > { %v8544_v58 = vld [vmem:[#allocation23 + $0x4e0] ss:$16 sps:$4 sm:$0xff]   ;;  %v8547_v61 = vld [vmem:[#allocation23 + $0x4e8] ss:$16 sps:$4 sm:$0xff]   ;;  %v8552_v26 = vld [vmem:[#allocation23 + $0x504] ss:$16 sps:$4 sm:$0xff]  }
 0xb0c   : > { %v8555_v27 = vld [vmem:[#allocation23 + $0x50c] ss:$16 sps:$4 sm:$0xff]  }
 0xb0d   : > { %5489 = vmatpush1.bf16.msra.mxu0 %v8466_v59  ;;  %5661 = vmatpush1.bf16.msra.mxu1 %v8469_v30  ;;  %v8550_v59 = vld [vmem:[#allocation23 + $0x500] ss:$16 sps:$4 sm:$0xff]   ;;  %v8553_v30 = vld [vmem:[#allocation23 + $0x508] ss:$16 sps:$4 sm:$0xff]  }
 0xb0e   : > { %5490 = vmatprep.subr.bf16.mxu0 %v8474_v31  ;;  %5662 = vmatprep.subr.bf16.mxu1 %v8477_v62  ;;  %v8558_v31 = vld [vmem:[#allocation23 + $0x524] ss:$16 sps:$4 sm:$0xff]   ;;  %v8561_v62 = vld [vmem:[#allocation23 + $0x52c] ss:$16 sps:$4 sm:$0xff]  }
 0xb11   : > { %5491 = vmatpush1.bf16.msra.mxu0 %v8472_v32  ;;  %5663 = vmatpush1.bf16.msra.mxu1 %v8475_v33  ;;  %v8556_v32 = vld [vmem:[#allocation23 + $0x520] ss:$16 sps:$4 sm:$0xff]   ;;  %v8559_v33 = vld [vmem:[#allocation23 + $0x528] ss:$16 sps:$4 sm:$0xff]  }
 0xb12   : > { %5492 = vmatprep.subr.bf16.mxu0 %v8480_v0  ;;  %5664 = vmatprep.subr.bf16.mxu1 %v8483_v36  ;;  %v8564_v0 = vld [vmem:[#allocation23 + $0x544] ss:$16 sps:$4 sm:$0xff]   ;;  %v8567_v36 = vld [vmem:[#allocation23 + $0x54c] ss:$16 sps:$4 sm:$0xff]  }
 0xb15   : > { %5493 = vmatpush1.bf16.msra.mxu0 %v8478_v37  ;;  %5665 = vmatpush1.bf16.msra.mxu1 %v8481_v38  ;;  %v8562_v37 = vld [vmem:[#allocation23 + $0x540] ss:$16 sps:$4 sm:$0xff]   ;;  %v8565_v38 = vld [vmem:[#allocation23 + $0x548] ss:$16 sps:$4 sm:$0xff]  }
 0xb16   : > { %5494 = vmatprep.subr.bf16.mxu0 %v8486_v41  ;;  %5666 = vmatprep.subr.bf16.mxu1 %v8489_v42  ;;  %v8570_v41 = vld [vmem:[#allocation23 + $0x564] ss:$16 sps:$4 sm:$0xff]   ;;  %v8573_v42 = vld [vmem:[#allocation23 + $0x56c] ss:$16 sps:$4 sm:$0xff]  }
 0xb19   : > { %5495 = vmatpush1.bf16.msra.mxu0 %v8484_v45  ;;  %5667 = vmatpush1.bf16.msra.mxu1 %v8487_v46  ;;  %v8568_v45 = vld [vmem:[#allocation23 + $0x560] ss:$16 sps:$4 sm:$0xff]   ;;  %v8571_v46 = vld [vmem:[#allocation23 + $0x568] ss:$16 sps:$4 sm:$0xff]  }
 0xb1a   : > { %5496 = vmatprep.subr.bf16.mxu0 %v8492_v47  ;;  %5668 = vmatprep.subr.bf16.mxu1 %v8495_v48  ;;  %v8576_v47 = vld [vmem:[#allocation23 + $0x584] ss:$16 sps:$4 sm:$0xff]   ;;  %v8579_v48 = vld [vmem:[#allocation23 + $0x58c] ss:$16 sps:$4 sm:$0xff]  }
 0xb1d   : > { %5497 = vmatpush1.bf16.msra.mxu0 %v8490_v49  ;;  %5669 = vmatpush1.bf16.msra.mxu1 %v8493_v51  ;;  %v8574_v49 = vld [vmem:[#allocation23 + $0x580] ss:$16 sps:$4 sm:$0xff]   ;;  %v8577_v51 = vld [vmem:[#allocation23 + $0x588] ss:$16 sps:$4 sm:$0xff]  }
 0xb1e   : > { %5498 = vmatprep.subr.bf16.mxu0 %v8498_v53  ;;  %5670 = vmatprep.subr.bf16.mxu1 %v8501_v54  ;;  %v8582_v53 = vld [vmem:[#allocation23 + $0x5a4] ss:$16 sps:$4 sm:$0xff]   ;;  %v8585_v54 = vld [vmem:[#allocation23 + $0x5ac] ss:$16 sps:$4 sm:$0xff]  }
 0xb21   : > { %5499 = vmatpush1.bf16.msra.mxu0 %v8496_v56  ;;  %5671 = vmatpush1.bf16.msra.mxu1 %v8499_v57  ;;  %v8580_v56 = vld [vmem:[#allocation23 + $0x5a0] ss:$16 sps:$4 sm:$0xff]   ;;  %v8583_v57 = vld [vmem:[#allocation23 + $0x5a8] ss:$16 sps:$4 sm:$0xff]  }
 0xb22   : > { %5511 = vmatprep.subr.bf16.mxu0 %v8504_v52  ;;  %5683 = vmatprep.subr.bf16.mxu1 %v8507_v40  ;;  %v8588_v52 = vld [vmem:[#allocation23 + $0x5c4] ss:$16 sps:$4 sm:$0xff]   ;;  %v8591_v40 = vld [vmem:[#allocation23 + $0x5cc] ss:$16 sps:$4 sm:$0xff]  }
 0xb24   : > { %5501 = vmatmul.mubr.bf16.vlgmr.msra.gmra.mrb[56].mxu0 %v10629_v39  ;;  %5673 = vmatmul.mubr.bf16.vlgmr.msra.gmra.mrb[32].mxu1 %v10629_v39  ;;  %v8525_v39 = vld [vmem:[#allocation23 + $0x46c] ss:$16 sps:$4 sm:$0xff]  }
 0xb25   : > { %5512 = vmatpush1.bf16.msra.mxu0 %v8502_v1  ;;  %5543 = vmatprep.mubr.bf16.mxu0 %v10613_v60  ;;  %v8586_v1 = vld [vmem:[#allocation23 + $0x5c0] ss:$16 sps:$4 sm:$0xff]  }
 0xb26   : > { %5684 = vmatpush1.bf16.msra.mxu1 %v8505_v44  ;;  %5715 = vmatprep.mubr.bf16.mxu1 %v10613_v60  ;;  %v8531_v60 = vld [vmem:[#allocation23 + $0x48c] ss:$16 sps:$4 sm:$0xff]   ;;  %v8589_v44 = vld [vmem:[#allocation23 + $0x5c8] ss:$16 sps:$4 sm:$0xff]  }
 0xb27   : > { %5513 = vmatprep.subr.bf16.mxu0 %v8510_v50  ;;  %5685 = vmatprep.subr.bf16.mxu1 %v8513_v3  ;;  %v8594_v50 = vld [vmem:[#allocation23 + $0x5e4] ss:$16 sps:$4 sm:$0xff]   ;;  %v8597_v3 = vld [vmem:[#allocation23 + $0x5ec] ss:$16 sps:$4 sm:$0xff]  }
 0xb29   : > { %5514 = vmatpush1.bf16.msra.mxu0 %v8508_v6  ;;  %v8592_v6 = vld [vmem:[#allocation23 + $0x5e0] ss:$16 sps:$4 sm:$0xff]  }
 0xb2a   : > { %5686 = vmatpush1.bf16.msra.mxu1 %v8511_v8  ;;  %5515 = vmatprep.subr.bf16.mxu0 %v8516_v9  ;;  %v8595_v8 = vld [vmem:[#allocation23 + $0x5e8] ss:$16 sps:$4 sm:$0xff]   ;;  %v8600_v9 = vld [vmem:[#allocation23 + $0x604] ss:$16 sps:$4 sm:$0xff]  }
 0xb2b   : > { %5687 = vmatprep.subr.bf16.mxu1 %v8519_v29  ;;  %v8603_v29 = vld [vmem:[#allocation23 + $0x60c] ss:$16 sps:$4 sm:$0xff]  }
 0xb2d   : > { %5516 = vmatpush1.bf16.msra.mxu0 %v8514_v10  ;;  %v8598_v10 = vld [vmem:[#allocation23 + $0x600] ss:$16 sps:$4 sm:$0xff]  }
 0xb2e   : > { %5688 = vmatpush1.bf16.msra.mxu1 %v8517_v34  ;;  %5517 = vmatprep.subr.bf16.mxu0 %v8522_v11  ;;  %v8601_v34 = vld [vmem:[#allocation23 + $0x608] ss:$16 sps:$4 sm:$0xff]   ;;  %v8606_v11 = vld [vmem:[#allocation23 + $0x624] ss:$16 sps:$4 sm:$0xff]  }
 0xb2f   : > { %5689 = vmatprep.subr.bf16.mxu1 %v8525_v39  ;;  %v8609_v39 = vld [vmem:[#allocation23 + $0x62c] ss:$16 sps:$4 sm:$0xff]  }
 0xb31   : > { %5518 = vmatpush1.bf16.msra.mxu0 %v8520_v12  ;;  %v8604_v12 = vld [vmem:[#allocation23 + $0x620] ss:$16 sps:$4 sm:$0xff]  }
 0xb32   : > { %5690 = vmatpush1.bf16.msra.mxu1 %v8523_v13  ;;  %5519 = vmatprep.subr.bf16.mxu0 %v8528_v14  ;;  %v8607_v13 = vld [vmem:[#allocation23 + $0x628] ss:$16 sps:$4 sm:$0xff]   ;;  %v8612_v14 = vld [vmem:[#allocation23 + $0x644] ss:$16 sps:$4 sm:$0xff]  }
 0xb33   : > { %5691 = vmatprep.subr.bf16.mxu1 %v8531_v60  ;;  %v8615_v60 = vld [vmem:[#allocation23 + $0x64c] ss:$16 sps:$4 sm:$0xff]  }
 0xb35   : > { %5520 = vmatpush1.bf16.msra.mxu0 %v8526_v15  ;;  %v8610_v15 = vld [vmem:[#allocation23 + $0x640] ss:$16 sps:$4 sm:$0xff]  }
 0xb36   : > { %5692 = vmatpush1.bf16.msra.mxu1 %v8529_v16  ;;  %5521 = vmatprep.subr.bf16.mxu0 %v8534_v5  ;;  %v8613_v16 = vld [vmem:[#allocation23 + $0x648] ss:$16 sps:$4 sm:$0xff]   ;;  %v8618_v5 = vld [vmem:[#allocation23 + $0x664] ss:$16 sps:$4 sm:$0xff]  }
 0xb37   : > { %5693 = vmatprep.subr.bf16.mxu1 %v8537_v17  ;;  %v8616_v17 = vld [vmem:[#allocation23 + $0x660] ss:$16 sps:$4 sm:$0xff]  }
 0xb39   : > { %5522 = vmatpush1.bf16.msra.mxu0 %v8532_v18  ;;  %v8619_v18 = vld [vmem:[#allocation23 + $0x668] ss:$16 sps:$4 sm:$0xff]  }
 0xb3a   : > { %5694 = vmatpush1.bf16.msra.mxu1 %v8535_v19  ;;  %5523 = vmatprep.subr.bf16.mxu0 %v8540_v20  ;;  %v8624_v19 = vld [vmem:[#allocation23 + $0x684] ss:$16 sps:$4 sm:$0xff]   ;;  %v8627_v20 = vld [vmem:[#allocation23 + $0x68c] ss:$16 sps:$4 sm:$0xff]  }
 0xb3b   : > { %5695 = vmatprep.subr.bf16.mxu1 %v8543_v35  ;;  %v8625_v35 = vld [vmem:[#allocation23 + $0x688] ss:$16 sps:$4 sm:$0xff]  }
 0xb3d   : > { %5524 = vmatpush1.bf16.msra.mxu0 %v8538_v21  ;;  %v8630_v21 = vld [vmem:[#allocation23 + $0x6a4] ss:$16 sps:$4 sm:$0xff]  }
 0xb3e   : > { %5696 = vmatpush1.bf16.msra.mxu1 %v8541_v22  ;;  %5525 = vmatprep.subr.bf16.mxu0 %v8546_v23  ;;  %v8633_v22 = vld [vmem:[#allocation23 + $0x6ac] ss:$16 sps:$4 sm:$0xff]   ;;  %v8628_v23 = vld [vmem:[#allocation23 + $0x6a0] ss:$16 sps:$4 sm:$0xff]  }
 0xb3f   : > { %5697 = vmatprep.subr.bf16.mxu1 %v8549_v24  ;;  %v8631_v24 = vld [vmem:[#allocation23 + $0x6a8] ss:$16 sps:$4 sm:$0xff]  }
 0xb41   : > { %5526 = vmatpush1.bf16.msra.mxu0 %v8544_v58  ;;  %v8636_v58 = vld [vmem:[#allocation23 + $0x6c4] ss:$16 sps:$4 sm:$0xff]  }
 0xb42   : > { %5698 = vmatpush1.bf16.msra.mxu1 %v8547_v61  ;;  %5527 = vmatprep.subr.bf16.mxu0 %v8552_v26  ;;  %v8639_v61 = vld [vmem:[#allocation23 + $0x6cc] ss:$16 sps:$4 sm:$0xff]   ;;  %v8634_v26 = vld [vmem:[#allocation23 + $0x6c0] ss:$16 sps:$4 sm:$0xff]  }
 0xb43   : > { %5699 = vmatprep.subr.bf16.mxu1 %v8555_v27  ;;  %v8637_v27 = vld [vmem:[#allocation23 + $0x6c8] ss:$16 sps:$4 sm:$0xff]  }
 0xb45   : > { %5528 = vmatpush1.bf16.msra.mxu0 %v8550_v59  ;;  %v8642_v59 = vld [vmem:[#allocation23 + $0x6e4] ss:$16 sps:$4 sm:$0xff]  }
 0xb46   : > { %5700 = vmatpush1.bf16.msra.mxu1 %v8553_v30  ;;  %5529 = vmatprep.subr.bf16.mxu0 %v8558_v31  ;;  %v8645_v30 = vld [vmem:[#allocation23 + $0x6ec] ss:$16 sps:$4 sm:$0xff]   ;;  %v8640_v31 = vld [vmem:[#allocation23 + $0x6e0] ss:$16 sps:$4 sm:$0xff]  }
 0xb47   : > { %5701 = vmatprep.subr.bf16.mxu1 %v8561_v62  ;;  %v8643_v62 = vld [vmem:[#allocation23 + $0x6e8] ss:$16 sps:$4 sm:$0xff]  }
 0xb49   : > { %5530 = vmatpush1.bf16.msra.mxu0 %v8556_v32  ;;  %v8648_v32 = vld [vmem:[#allocation23 + $0x704] ss:$16 sps:$4 sm:$0xff]  }
 0xb4a   : > { %5702 = vmatpush1.bf16.msra.mxu1 %v8559_v33  ;;  %5531 = vmatprep.subr.bf16.mxu0 %v8564_v0  ;;  %v8651_v33 = vld [vmem:[#allocation23 + $0x70c] ss:$16 sps:$4 sm:$0xff]   ;;  %v8646_v0 = vld [vmem:[#allocation23 + $0x700] ss:$16 sps:$4 sm:$0xff]  }
 0xb4b   : > { %5703 = vmatprep.subr.bf16.mxu1 %v8567_v36  ;;  %v8649_v36 = vld [vmem:[#allocation23 + $0x708] ss:$16 sps:$4 sm:$0xff]  }
 0xb4d   : > { %5532 = vmatpush1.bf16.msra.mxu0 %v8562_v37  ;;  %v8654_v37 = vld [vmem:[#allocation23 + $0x724] ss:$16 sps:$4 sm:$0xff]  }
 0xb4e   : > { %5704 = vmatpush1.bf16.msra.mxu1 %v8565_v38  ;;  %5533 = vmatprep.subr.bf16.mxu0 %v8570_v41  ;;  %v8657_v38 = vld [vmem:[#allocation23 + $0x72c] ss:$16 sps:$4 sm:$0xff]   ;;  %v8652_v41 = vld [vmem:[#allocation23 + $0x720] ss:$16 sps:$4 sm:$0xff]  }
 0xb4f   : > { %5705 = vmatprep.subr.bf16.mxu1 %v8573_v42  ;;  %v8655_v42 = vld [vmem:[#allocation23 + $0x728] ss:$16 sps:$4 sm:$0xff]  }
 0xb51   : > { %5534 = vmatpush1.bf16.msra.mxu0 %v8568_v45  ;;  %v8660_v45 = vld [vmem:[#allocation23 + $0x744] ss:$16 sps:$4 sm:$0xff]  }
 0xb52   : > { %5706 = vmatpush1.bf16.msra.mxu1 %v8571_v46  ;;  %5535 = vmatprep.subr.bf16.mxu0 %v8576_v47  ;;  %v8663_v46 = vld [vmem:[#allocation23 + $0x74c] ss:$16 sps:$4 sm:$0xff]   ;;  %v8658_v47 = vld [vmem:[#allocation23 + $0x740] ss:$16 sps:$4 sm:$0xff]  }
 0xb53   : > { %5707 = vmatprep.subr.bf16.mxu1 %v8579_v48  ;;  %v8661_v48 = vld [vmem:[#allocation23 + $0x748] ss:$16 sps:$4 sm:$0xff]  }
 0xb55   : > { %5536 = vmatpush1.bf16.msra.mxu0 %v8574_v49  ;;  %v8666_v49 = vld [vmem:[#allocation23 + $0x764] ss:$16 sps:$4 sm:$0xff]  }
 0xb56   : > { %5708 = vmatpush1.bf16.msra.mxu1 %v8577_v51  ;;  %5537 = vmatprep.subr.bf16.mxu0 %v8582_v53  ;;  %v8669_v51 = vld [vmem:[#allocation23 + $0x76c] ss:$16 sps:$4 sm:$0xff]   ;;  %v8664_v53 = vld [vmem:[#allocation23 + $0x760] ss:$16 sps:$4 sm:$0xff]  }
 0xb57   : > { %5709 = vmatprep.subr.bf16.mxu1 %v8585_v54  ;;  %v8667_v54 = vld [vmem:[#allocation23 + $0x768] ss:$16 sps:$4 sm:$0xff]  }
 0xb59   : > { %5538 = vmatpush1.bf16.msra.mxu0 %v8580_v56  ;;  %v8672_v56 = vld [vmem:[#allocation23 + $0x784] ss:$16 sps:$4 sm:$0xff]  }
 0xb5a   : > { %5710 = vmatpush1.bf16.msra.mxu1 %v8583_v57  ;;  %5539 = vmatprep.subr.bf16.mxu0 %v8588_v52  ;;  %v8675_v57 = vld [vmem:[#allocation23 + $0x78c] ss:$16 sps:$4 sm:$0xff]   ;;  %v8670_v52 = vld [vmem:[#allocation23 + $0x780] ss:$16 sps:$4 sm:$0xff]  }
 0xb5b   : > { %5711 = vmatprep.subr.bf16.mxu1 %v8591_v40  ;;  %v8673_v40 = vld [vmem:[#allocation23 + $0x788] ss:$16 sps:$4 sm:$0xff]  }
 0xb5d   : > { %5540 = vmatpush1.bf16.msra.mxu0 %v8586_v1  ;;  %v8678_v1 = vld [vmem:[#allocation23 + $0x7a4] ss:$16 sps:$4 sm:$0xff]  }
 0xb5e   : > { %5712 = vmatpush1.bf16.msra.mxu1 %v8589_v44  ;;  %5541 = vmatprep.subr.bf16.mxu0 %v8594_v50  ;;  %v8681_v44 = vld [vmem:[#allocation23 + $0x7ac] ss:$16 sps:$4 sm:$0xff]   ;;  %v8676_v50 = vld [vmem:[#allocation23 + $0x7a0] ss:$16 sps:$4 sm:$0xff]  }
 0xb5f   : > { %5713 = vmatprep.subr.bf16.mxu1 %v8597_v3  ;;  %v8679_v3 = vld [vmem:[#allocation23 + $0x7a8] ss:$16 sps:$4 sm:$0xff]  }
 0xb61   : > { %5542 = vmatpush1.bf16.msra.mxu0 %v8592_v6  ;;  %v8684_v6 = vld [vmem:[#allocation23 + $0x7c4] ss:$16 sps:$4 sm:$0xff]  }
 0xb62   : > { %5714 = vmatpush1.bf16.msra.mxu1 %v8595_v8  ;;  %5554 = vmatprep.subr.bf16.mxu0 %v8600_v9  ;;  %v8687_v8 = vld [vmem:[#allocation23 + $0x7cc] ss:$16 sps:$4 sm:$0xff]   ;;  %v8682_v9 = vld [vmem:[#allocation23 + $0x7c0] ss:$16 sps:$4 sm:$0xff]  }
 0xb63   : > { %5726 = vmatprep.subr.bf16.mxu1 %v8603_v29  ;;  %v8685_v29 = vld [vmem:[#allocation23 + $0x7c8] ss:$16 sps:$4 sm:$0xff]  }
 0xb64   : > { %5544 = vmatmul.mubr.bf16.vlgmr.msra.gmra.mrb[56].mxu0 %v10611_v55 }
 0xb65   : > { %5716 = vmatmul.mubr.bf16.vlgmr.msra.gmra.mrb[32].mxu1 %v10611_v55  ;;  %5555 = vmatpush1.bf16.msra.mxu0 %v8598_v10  ;;  %v8621_v55 = vld [vmem:[#allocation23 + $0x66c] ss:$16 sps:$4 sm:$0xff]   ;;  %v8690_v10 = vld [vmem:[#allocation23 + $0x7e4] ss:$16 sps:$4 sm:$0xff]  }
 0xb66   : > { %5586 = vmatprep.mubr.bf16.mxu0 %v10641_v28  ;;  %5727 = vmatpush1.bf16.msra.mxu1 %v8601_v34  ;;  %v8693_v34 = vld [vmem:[#allocation23 + $0x7ec] ss:$16 sps:$4 sm:$0xff]  }
 0xb67   : > { %5758 = vmatprep.mubr.bf16.mxu1 %v10641_v28  ;;  %5556 = vmatprep.subr.bf16.mxu0 %v8606_v11  ;;  %v8622_v28 = vld [vmem:[#allocation23 + $0x680] ss:$16 sps:$4 sm:$0xff]  }
 0xb68   : > { %5728 = vmatprep.subr.bf16.mxu1 %v8609_v39  ;;  %v8688_v11 = vld [vmem:[#allocation23 + $0x7e0] ss:$16 sps:$4 sm:$0xff]   ;;  %v8691_v39 = vld [vmem:[#allocation23 + $0x7e8] ss:$16 sps:$4 sm:$0xff]  }
 0xb69   : > { %5557 = vmatpush1.bf16.msra.mxu0 %v8604_v12  ;;  %v8696_v12 = vld [vmem:[#allocation28 + $0x4] ss:$8 sps:$4 sm:$0xff]  }
 0xb6a   : > { %5729 = vmatpush1.bf16.msra.mxu1 %v8607_v13  ;;  %5558 = vmatprep.subr.bf16.mxu0 %v8612_v14  ;;  %v8694_v13 = vld [vmem:[#allocation28] ss:$8 sps:$4 sm:$0xff]   ;;  %v8699_v14 = vld [vmem:[#allocation28 + $0x14] ss:$8 sps:$4 sm:$0xff]  }
 0xb6b   : > { %5730 = vmatprep.subr.bf16.mxu1 %v8615_v60  ;;  %v8697_v60 = vld [vmem:[#allocation28 + $0x10] ss:$8 sps:$4 sm:$0xff]  }
 0xb6d   : > { %5559 = vmatpush1.bf16.msra.mxu0 %v8610_v15  ;;  %v8702_v15 = vld [vmem:[#allocation28 + $0x24] ss:$8 sps:$4 sm:$0xff]  }
 0xb6e   : > { %5731 = vmatpush1.bf16.msra.mxu1 %v8613_v16  ;;  %5560 = vmatprep.subr.bf16.mxu0 %v8618_v5  ;;  %v8700_v16 = vld [vmem:[#allocation28 + $0x20] ss:$8 sps:$4 sm:$0xff]   ;;  %v8705_v5 = vld [vmem:[#allocation28 + $0x34] ss:$8 sps:$4 sm:$0xff]  }
 0xb6f   : > { %5732 = vmatprep.subr.bf16.mxu1 %v8621_v55  ;;  %v8703_v55 = vld [vmem:[#allocation28 + $0x30] ss:$8 sps:$4 sm:$0xff]  }
 0xb71   : > { %5561 = vmatpush1.bf16.msra.mxu0 %v8616_v17  ;;  %v8708_v17 = vld [vmem:[#allocation28 + $0x44] ss:$8 sps:$4 sm:$0xff]  }
 0xb72   : > { %5733 = vmatpush1.bf16.msra.mxu1 %v8619_v18  ;;  %5562 = vmatprep.subr.bf16.mxu0 %v8624_v19  ;;  %v8706_v18 = vld [vmem:[#allocation28 + $0x40] ss:$8 sps:$4 sm:$0xff]   ;;  %v8711_v19 = vld [vmem:[#allocation28 + $0x54] ss:$8 sps:$4 sm:$0xff]  }
 0xb73   : > { %5734 = vmatprep.subr.bf16.mxu1 %v8627_v20  ;;  %v8709_v20 = vld [vmem:[#allocation28 + $0x50] ss:$8 sps:$4 sm:$0xff]  }
 0xb75   : > { %5563 = vmatpush1.bf16.msra.mxu0 %v8622_v28  ;;  %v8712_v28 = vld [vmem:[#allocation28 + $0x60] ss:$8 sps:$4 sm:$0xff]  }
 0xb76   : > { %5735 = vmatpush1.bf16.msra.mxu1 %v8625_v35  ;;  %5564 = vmatprep.subr.bf16.mxu0 %v8630_v21  ;;  %v8717_v35 = vld [vmem:[#allocation28 + $0x74] ss:$8 sps:$4 sm:$0xff]   ;;  %v8715_v21 = vld [vmem:[#allocation28 + $0x70] ss:$8 sps:$4 sm:$0xff]  }
 0xb77   : > { %5736 = vmatprep.subr.bf16.mxu1 %v8633_v22  ;;  %v8720_v22 = vld [vmem:[#allocation28 + $0x84] ss:$8 sps:$4 sm:$0xff]  }
 0xb79   : > { %5565 = vmatpush1.bf16.msra.mxu0 %v8628_v23  ;;  %v8718_v23 = vld [vmem:[#allocation28 + $0x80] ss:$8 sps:$4 sm:$0xff]  }
 0xb7a   : > { %5737 = vmatpush1.bf16.msra.mxu1 %v8631_v24  ;;  %5566 = vmatprep.subr.bf16.mxu0 %v8636_v58  ;;  %v8723_v24 = vld [vmem:[#allocation28 + $0x94] ss:$8 sps:$4 sm:$0xff]   ;;  %v8721_v58 = vld [vmem:[#allocation28 + $0x90] ss:$8 sps:$4 sm:$0xff]  }
 0xb7b   : > { %5738 = vmatprep.subr.bf16.mxu1 %v8639_v61  ;;  %v8726_v61 = vld [vmem:[#allocation28 + $0xa4] ss:$8 sps:$4 sm:$0xff]  }
 0xb7d   : > { %5567 = vmatpush1.bf16.msra.mxu0 %v8634_v26  ;;  %v8724_v26 = vld [vmem:[#allocation28 + $0xa0] ss:$8 sps:$4 sm:$0xff]  }
 0xb7e   : > { %5739 = vmatpush1.bf16.msra.mxu1 %v8637_v27  ;;  %5568 = vmatprep.subr.bf16.mxu0 %v8642_v59  ;;  %v8729_v27 = vld [vmem:[#allocation28 + $0xb4] ss:$8 sps:$4 sm:$0xff]   ;;  %v8727_v59 = vld [vmem:[#allocation28 + $0xb0] ss:$8 sps:$4 sm:$0xff]  }
 0xb7f   : > { %5740 = vmatprep.subr.bf16.mxu1 %v8645_v30  ;;  %v8732_v30 = vld [vmem:[#allocation28 + $0xc4] ss:$8 sps:$4 sm:$0xff]  }
 0xb81   : > { %5569 = vmatpush1.bf16.msra.mxu0 %v8640_v31  ;;  %v8730_v31 = vld [vmem:[#allocation28 + $0xc0] ss:$8 sps:$4 sm:$0xff]  }
 0xb82   : > { %5741 = vmatpush1.bf16.msra.mxu1 %v8643_v62  ;;  %5570 = vmatprep.subr.bf16.mxu0 %v8648_v32  ;;  %v8735_v62 = vld [vmem:[#allocation28 + $0xd4] ss:$8 sps:$4 sm:$0xff]   ;;  %v8733_v32 = vld [vmem:[#allocation28 + $0xd0] ss:$8 sps:$4 sm:$0xff]  }
 0xb83   : > { %5742 = vmatprep.subr.bf16.mxu1 %v8651_v33  ;;  %v8738_v33 = vld [vmem:[#allocation28 + $0xe4] ss:$8 sps:$4 sm:$0xff]  }
 0xb85   : > { %5571 = vmatpush1.bf16.msra.mxu0 %v8646_v0  ;;  %v8736_v0 = vld [vmem:[#allocation28 + $0xe0] ss:$8 sps:$4 sm:$0xff]  }
 0xb86   : > { %5743 = vmatpush1.bf16.msra.mxu1 %v8649_v36  ;;  %5572 = vmatprep.subr.bf16.mxu0 %v8654_v37  ;;  %v8739_v36 = vld [vmem:[#allocation28 + $0xf0] ss:$8 sps:$4 sm:$0xff]   ;;  %v8741_v37 = vld [vmem:[#allocation28 + $0xf4] ss:$8 sps:$4 sm:$0xff]  }
 0xb87   : > { %5744 = vmatprep.subr.bf16.mxu1 %v8657_v38  ;;  %v8744_v38 = vld [vmem:[#allocation28 + $0x104] ss:$8 sps:$4 sm:$0xff]  }
 0xb89   : > { %5573 = vmatpush1.bf16.msra.mxu0 %v8652_v41  ;;  %v8790_v41 = vld [vmem:[#allocation32 + $0x40] sm:$0xff]  }
 0xb8a   : > { %5745 = vmatpush1.bf16.msra.mxu1 %v8655_v42  ;;  %5574 = vmatprep.subr.bf16.mxu0 %v8660_v45  ;;  %v8791_v42 = vld [vmem:[#allocation32] sm:$0xff]   ;;  %v8792_v45 = vld [vmem:[#allocation32 + $0x48] sm:$0xff]  }
 0xb8b   : > { %5746 = vmatprep.subr.bf16.mxu1 %v8663_v46  ;;  %v8793_v46 = vld [vmem:[#allocation32 + $0x8] sm:$0xff]  }
 0xb8d   : > { %5575 = vmatpush1.bf16.msra.mxu0 %v8658_v47  ;;  %v8794_v47 = vld [vmem:[#allocation32 + $0x50] sm:$0xff]  }
 0xb8e   : > { %5747 = vmatpush1.bf16.msra.mxu1 %v8661_v48  ;;  %5576 = vmatprep.subr.bf16.mxu0 %v8666_v49  ;;  %v8795_v48 = vld [vmem:[#allocation32 + $0x10] sm:$0xff]   ;;  %v8796_v49 = vld [vmem:[#allocation32 + $0x58] sm:$0xff]  }
 0xb8f   : > { %5748 = vmatprep.subr.bf16.mxu1 %v8669_v51  ;;  %v8797_v51 = vld [vmem:[#allocation32 + $0x18] sm:$0xff]  }
 0xb91   : > { %5577 = vmatpush1.bf16.msra.mxu0 %v8664_v53  ;;  %v8798_v53 = vld [vmem:[#allocation32 + $0x60] sm:$0xff]  }
 0xb92   : > { %5749 = vmatpush1.bf16.msra.mxu1 %v8667_v54  ;;  %5578 = vmatprep.subr.bf16.mxu0 %v8672_v56  ;;  %v8799_v54 = vld [vmem:[#allocation32 + $0x20] sm:$0xff]   ;;  %v5769_v56 = vld [vmem:[#allocation25] sm:$0xf] }
 0xb93   : > { %5750 = vmatprep.subr.bf16.mxu1 %v8675_v57 }
 0xb95   : > { %5579 = vmatpush1.bf16.msra.mxu0 %v8670_v52  ;;  %v5770_v52 = vld [vmem:[#allocation26] sm:$0xf] }
 0xb96   : > { %5751 = vmatpush1.bf16.msra.mxu1 %v8673_v40  ;;  %5580 = vmatprep.subr.bf16.mxu0 %v8678_v1  ;;  %v5799_v1 = vrot.slane %v5769_v56, %v10590_v63 }
 0xb97   : > { %5752 = vmatprep.subr.bf16.mxu1 %v8681_v44 }
 0xb99   : > { %5581 = vmatpush1.bf16.msra.mxu0 %v8676_v50  ;;  %v5807_v50 = vrot.slane %v5769_v56, %v10616_v2 }
 0xb9a   : > { %5753 = vmatpush1.bf16.msra.mxu1 %v8679_v3  ;;  %5582 = vmatprep.subr.bf16.mxu0 %v8684_v6 }
 0xb9b   : > { %5754 = vmatprep.subr.bf16.mxu1 %v8687_v8 }
 0xb9d   : > { %5583 = vmatpush1.bf16.msra.mxu0 %v8682_v9 }
 0xb9e   : > { %5755 = vmatpush1.bf16.msra.mxu1 %v8685_v29  ;;  %5584 = vmatprep.subr.bf16.mxu0 %v8690_v10  ;;  %v5828_v29 = vrot.slane %v5770_v52, %v10590_v63  ;;  %v5836_v10 = vrot.slane %v5770_v52, %v10616_v2 }
 0xb9f   : > { %5756 = vmatprep.subr.bf16.mxu1 %v8693_v34  ;;  %v5803_v34 = vrot.slane %v5769_v56, %v10595_v4 }
 0xba1   : > { %5585 = vmatpush1.bf16.msra.mxu0 %v8688_v11 }
 0xba2   : > { %5757 = vmatpush1.bf16.msra.mxu1 %v8691_v39  ;;  %6241 = vmatprep.subr.bf16.mxu0 %v8696_v12 }
 0xba3   : > { %7667 = vmatprep.subr.bf16.mxu1 %v8790_v41 }
 0xba4   : > { %5587 = vmatmul.mubr.bf16.vlgmr.msra.gmra.mrb[56].mxu0 %v10639_v25 }
 0xba5   : > { %5759 = vmatmul.mubr.bf16.vlgmr.msra.gmra.mrb[32].mxu1 %v10639_v25  ;;  %6242 = vmatpush1.bf16.msra.mxu0 %v8694_v13  ;;  %v8714_v25 = vld [vmem:[#allocation28 + $0x64] ss:$8 sps:$4 sm:$0xff]   ;;  %v5811_v13 = vrot.slane %v5769_v56, %v10619_v43 }
 0xba6   : > { %6243 = vmatprep.subr.bf16.mxu0 %v8699_v14  ;;  %7668 = vmatpush3.bf16.msra.mxu1 %v8791_v42  ;;  %v8742_v42 = vld [vmem:[#allocation28 + $0x100] ss:$8 sps:$4 sm:$0xff]   ;;  %v8756_v56 = vld [vmem:[#allocation28 + $0x144] ss:$8 sps:$4 sm:$0xff]  }
 0xba7   : > { %7669 = vmatprep.subr.bf16.mxu1 %v8792_v45 }
 0xba9   : > { %6244 = vmatpush1.bf16.msra.mxu0 %v8697_v60 }
 0xbaa   : > { %6245 = vmatprep.subr.bf16.mxu0 %v8702_v15  ;;  %7670 = vmatpush3.bf16.msra.mxu1 %v8793_v46  ;;  %v5832_v15 = vrot.slane %v5770_v52, %v10595_v4 }
 0xbab   : > { %7671 = vmatprep.subr.bf16.mxu1 %v8794_v47  ;;  %v8747_v47 = vld [vmem:[#allocation28 + $0x114] ss:$8 sps:$4 sm:$0xff]  }
 0xbad   : > { %6246 = vmatpush1.bf16.msra.mxu0 %v8700_v16 }
 0xbae   : > { %6247 = vmatprep.subr.bf16.mxu0 %v8705_v5  ;;  %7672 = vmatpush3.bf16.msra.mxu1 %v8795_v48 }
 0xbaf   : > { %7673 = vmatprep.subr.bf16.mxu1 %v8796_v49  ;;  %v8750_v49 = vld [vmem:[#allocation28 + $0x124] ss:$8 sps:$4 sm:$0xff]  }
 0xbb1   : > { %6248 = vmatpush1.bf16.msra.mxu0 %v8703_v55 }
 0xbb2   : > { %6249 = vmatprep.subr.bf16.mxu0 %v8708_v17  ;;  %7674 = vmatpush3.bf16.msra.mxu1 %v8797_v51  ;;  %v8748_v51 = vld [vmem:[#allocation28 + $0x120] ss:$8 sps:$4 sm:$0xff]  }
 0xbb3   : > { %7675 = vmatprep.subr.bf16.mxu1 %v8798_v53  ;;  %v8753_v53 = vld [vmem:[#allocation28 + $0x134] ss:$8 sps:$4 sm:$0xff]  }
 0xbb5   : > { %6250 = vmatpush1.bf16.msra.mxu0 %v8706_v18 }
 0xbb6   : > { %6251 = vmatprep.subr.bf16.mxu0 %v8711_v19  ;;  %7676 = vmatpush3.bf16.msra.mxu1 %v8799_v54  ;;  %v8751_v54 = vld [vmem:[#allocation28 + $0x130] ss:$8 sps:$4 sm:$0xff]  }
 0xbb9   : > { %6252 = vmatpush1.bf16.msra.mxu0 %v8709_v20 }
 0xbba   : > { %6253 = vmatprep.subr.bf16.mxu0 %v8714_v25 }
 0xbbd   : > { %6254 = vmatpush1.bf16.msra.mxu0 %v8712_v28 }
 0xbbe   : > { %6255 = vmatprep.subr.bf16.mxu0 %v8717_v35 }
 0xbc1   : > { %6256 = vmatpush1.bf16.msra.mxu0 %v8715_v21 }
 0xbc2   : > { %6257 = vmatprep.subr.bf16.mxu0 %v8720_v22 }
 0xbc5   : > { %6258 = vmatpush1.bf16.msra.mxu0 %v8718_v23 }
 0xbc6   : > { %6259 = vmatprep.subr.bf16.mxu0 %v8723_v24 }
 0xbc9   : > { %6260 = vmatpush1.bf16.msra.mxu0 %v8721_v58 }
 0xbca   : > { %6261 = vmatprep.subr.bf16.mxu0 %v8726_v61 }
 0xbcd   : > { %6262 = vmatpush1.bf16.msra.mxu0 %v8724_v26 }
 0xbce   : > { %6263 = vmatprep.subr.bf16.mxu0 %v8729_v27 }
 0xbd1   : > { %6264 = vmatpush1.bf16.msra.mxu0 %v8727_v59  ;;  %v5840_v59 = vrot.slane %v5770_v52, %v10619_v43  ;;  %v8745_v43 = vld [vmem:[#allocation28 + $0x110] ss:$8 sps:$4 sm:$0xff]   ;;  %v8759_v52 = vld [vmem:[#allocation28 + $0x154] ss:$8 sps:$4 sm:$0xff]  }
 0xbd2   : > { %6265 = vmatprep.subr.bf16.mxu0 %v8732_v30 }
 0xbd5   : > { %6266 = vmatpush1.bf16.msra.mxu0 %v8730_v31 }
 0xbd6   : > { %6267 = vmatprep.subr.bf16.mxu0 %v8735_v62 }
 0xbd9   : > { %6268 = vmatpush1.bf16.msra.mxu0 %v8733_v32 }
 0xbda   : > { %6269 = vmatprep.subr.bf16.mxu0 %v8738_v33 }
 0xbdd   : > { %6270 = vmatpush1.bf16.msra.mxu0 %v8736_v0 }
 0xbde   : > { %6271 = vmatprep.subr.bf16.mxu0 %v8741_v37 }
 0xbe1   : > { %6272 = vmatpush1.bf16.msra.mxu0 %v8739_v36 }
 0xbe2   : > { %6284 = vmatprep.subr.bf16.mxu0 %v8744_v38 }
 0xc77   : > { %v5588_v57 = vpop.f32.mrb[56].mxu0 }
 0xc78   : > { %vm5771_vm0 = vcmp.ge.f32.partialorder %v5588_v57, 0.0  ;;  %v5779_v40 = vmul.f32 0.2, %v5588_v57  ;;  %v5760_v44 = vpop.f32.mrb[32].mxu1  ;;  %v5590_v3 = vpop.f32.mrb[57].mxu0 }
 0xc79   : > { %vm5773_vm5 = vcmp.ge.f32.partialorder %v5760_v44, 0.0  ;;  %v5781_v6 = vmul.f32 0.2, %v5760_v44  ;;  %vm5772_vm6 = vcmp.ge.f32.partialorder %v5590_v3, 0.0  ;;  %v5780_v8 = vmul.f32 0.2, %v5590_v3 }
 0xc7a   : > { %v5787_v9 = vsel %vm5771_vm0, %v5588_v57, %v5779_v40  ;;  %v5762_v11 = vpop.f32.mrb[33].mxu1  ;;  %v5592_v39 = vpop.f32.mrb[58].mxu0  ;;  %v8754_v57 = vld [vmem:[#allocation28 + $0x140] ss:$8 sps:$4 sm:$0xff]   ;;  %v8757_v40 = vld [vmem:[#allocation28 + $0x150] ss:$8 sps:$4 sm:$0xff]  }
 0xc7b   : > { %v5789_v12 = vsel %vm5773_vm5, %v5760_v44, %v5781_v6  ;;  %vm5774_vm7 = vcmp.ge.f32.partialorder %v5762_v11, 0.0  ;;  %v5764_v14 = vpop.f32.mrb[34].mxu1  ;;  %v5594_v60 = vpop.f32.mrb[59].mxu0  ;;  %v5788_v5 = vsel %vm5772_vm6, %v5590_v3, %v5780_v8  ;;  %v5782_v55 = vmul.f32 0.2, %v5762_v11 }
 0xc7c   : > { %v5818_v16 = vmul.f32 %v5807_v50, %v5789_v12  ;;  %vm5775_vm9 = vcmp.ge.f32.partialorder %v5592_v39, 0.0  ;;  %v5766_v17 = vpop.f32.mrb[35].mxu1  ;;  %v5816_v18 = vmul.f32 %v5799_v1, %v5787_v9  ;;  %v5783_v19 = vmul.f32 0.2, %v5592_v39  ;;  %v8760_v44 = vld [vmem:[#allocation28 + $0x160] ss:$8 sps:$4 sm:$0xff]  }
 0xc7d   : > { %vm5777_vm10 = vcmp.ge.f32.partialorder %v5764_v14, 0.0  ;;  %v5785_v2 = vmul.f32 0.2, %v5764_v14  ;;  %v5790_v25 = vsel %vm5774_vm7, %v5762_v11, %v5782_v55  ;;  %vm5776_vm11 = vcmp.ge.f32.partialorder %v5594_v60, 0.0  ;;  %v8763_v3 = vld [vmem:[#allocation28 + $0x170] ss:$8 sps:$4 sm:$0xff]  }
 0xc7e   : > { %v10660_v20 = vadd.f32 %v5836_v10, %v5818_v16  ;;  %v5784_v28 = vmul.f32 0.2, %v5594_v60  ;;  %v5817_v35 = vmul.f32 %v5803_v34, %v5788_v5  ;;  %v5791_v21 = vsel %vm5775_vm9, %v5592_v39, %v5783_v19  ;;  %v8768_v6 = vld [vmem:[#allocation28 + $0x184] ss:$8 sps:$4 sm:$0xff]   ;;  %v8766_v8 = vld [vmem:[#allocation28 + $0x180] ss:$8 sps:$4 sm:$0xff]  }
 0xc7f   : > { %v5793_v22 = vsel %vm5777_vm10, %v5764_v14, %v5785_v2  ;;  %vm5778_vm12 = vcmp.ge.f32.partialorder %v5766_v17, 0.0  ;;  %v5820_v23 = vmul.f32 %v5799_v1, %v5791_v21  ;;  %v5786_v61 = vmul.f32 0.2, %v5766_v17  ;;  %v8762_v1 = vld [vmem:[#allocation28 + $0x164] ss:$8 sps:$4 sm:$0xff]   ;;  %v8802_v19 = vld [vmem:[#allocation32 + $0x70] sm:$0xff]  }
 0xc80   : > { %v5822_v24 = vmul.f32 %v5807_v50, %v5793_v22  ;;  %v5792_v58 = vsel %vm5776_vm11, %v5594_v60, %v5784_v28  ;;  %v5819_v26 = vmul.f32 %v5811_v13, %v5790_v25  ;;  %v5845_v30 = vadd.f32 %v5828_v29, %v5816_v18  ;;  %v8765_v50 = vld [vmem:[#allocation28 + $0x174] ss:$8 sps:$4 sm:$0xff]   ;;  %v8775_v39 = vld [vmem:[#allocation28 + $0x1b0] ss:$8 sps:$4 sm:$0xff]   ;;  %v8780_v12 = vld [vmem:[#allocation28 + $0x1c4] ss:$8 sps:$4 sm:$0xff]  }
 0xc81   : > { %v5821_v27 = vmul.f32 %v5803_v34, %v5792_v58  ;;  %v5849_v31 = vadd.f32 %v5828_v29, %v5820_v23  ;;  %v5794_v32 = vsel %vm5778_vm12, %v5766_v17, %v5786_v61  ;;  %v5846_v0 = vadd.f32 %v5832_v15, %v5817_v35  ;;  %v8771_v9 = vld [vmem:[#allocation28 + $0x194] ss:$8 sps:$4 sm:$0xff]   ;;  %v8769_v29 = vld [vmem:[#allocation28 + $0x190] ss:$8 sps:$4 sm:$0xff]   ;;  %v8772_v34 = vld [vmem:[#allocation28 + $0x1a0] ss:$8 sps:$4 sm:$0xff]  }
 0xc82   : > { %v10663_v62 = vadd.f32 %v5836_v10, %v5822_v24  ;;  %v5823_v33 = vmul.f32 %v5811_v13, %v5794_v32  ;;  %v5848_v45 = vadd.f32 %v5840_v59, %v5819_v26  ;;  %v8774_v10 = vld [vmem:[#allocation28 + $0x1a4] ss:$8 sps:$4 sm:$0xff]   ;;  %v8777_v11 = vld [vmem:[#allocation28 + $0x1b4] ss:$8 sps:$4 sm:$0xff]   ;;  %v8778_v13 = vld [vmem:[#allocation28 + $0x1c0] ss:$8 sps:$4 sm:$0xff]  }
 0xc83   : > { %v5850_v36 = vadd.f32 %v5832_v15, %v5821_v27  ;;  %v5853_v37 = vpack.c.bf16 %v5849_v31, %v5845_v30  ;;  %v8783_v14 = vld [vmem:[#allocation28 + $0x1d4] ss:$8 sps:$4 sm:$0xff]   ;;  %v8781_v60 = vld [vmem:[#allocation28 + $0x1d0] ss:$8 sps:$4 sm:$0xff]   ;;  %v8786_v15 = vld [vmem:[#allocation28 + $0x1e4] ss:$8 sps:$4 sm:$0xff]  }
 0xc84   : > { %v5855_v38 = vpack.c.bf16 %v10663_v62, %v10660_v20  ;;  %v5852_v46 = vadd.f32 %v5840_v59, %v5823_v33  ;;  %v8784_v16 = vld [vmem:[#allocation28 + $0x1e0] ss:$8 sps:$4 sm:$0xff]   ;;  %v8789_v5 = vld [vmem:[#allocation28 + $0x1f4] ss:$8 sps:$4 sm:$0xff]   ;;  %v8787_v55 = vld [vmem:[#allocation28 + $0x1f0] ss:$8 sps:$4 sm:$0xff]  }
 0xc85   : > { %v5854_v41 = vpack.c.bf16 %v5850_v36, %v5846_v0  ;;  %v8800_v17 = vld [vmem:[#allocation32 + $0x68] sm:$0xff]   ;;  %v8803_v2 = vld [vmem:[#allocation32 + $0x30] sm:$0xff]   ;;  %v8804_v25 = vld [vmem:[#allocation32 + $0x78] sm:$0xff]  }
 0xc86   : > { %v5856_v48 = vpack.c.bf16 %v5852_v46, %v5848_v45  ;;  %v8801_v18 = vld [vmem:[#allocation32 + $0x28] sm:$0xff]   ;;  %7677 = vmatprep.subr.bf16.mxu1 %v8800_v17  ;;  %v8805_v28 = vld [vmem:[#allocation32 + $0x38] sm:$0xff]   ;;  %v7587_v17 = vld [vmem:[#allocation40] ss:$0 sm:$0xff] }
 0xc87   : > { %6273 = vmatprep.mubr.bf16.mxu0 %v5854_v41  ;;  %7678 = vmatpush3.bf16.msra.mxu1 %v8801_v18  ;;  %v6327_v35 = vld [vmem:[#allocation29] sm:$0x3]  ;;  %v6328_v22 = vld [vmem:[#allocation31] sm:$0x3] }
 0xc88   : > { %6274 = vmatmul.mubr.bf16.vlgmr.msra.gmra.mrb[60].mxu0 %v5853_v37  ;;  %7679 = vmatprep.subr.bf16.mxu1 %v8802_v19  ;;  %v6345_v20 = vrot.slane %v6327_v35, %v10590_v63  ;;  %v6349_v58 = vrot.slane %v6327_v35, %v10595_v4  ;;  %v6360_v59 = vrot.slane %v6328_v22, %v10590_v63 }
 0xc89   : > { %6285 = vmatpush1.bf16.msra.mxu0 %v8742_v42  ;;  %6316 = vmatprep.mubr.bf16.mxu0 %v5856_v48  ;;  %v6364_v37 = vrot.slane %v6328_v22, %v10595_v4  ;;  %v8808_v4 = vld [vmem:[#allocation37 + $0x10] sm:$0xff]  }
 0xc8a   : > { %6286 = vmatprep.subr.bf16.mxu0 %v8747_v47 }
 0xc8b   : > { %7680 = vmatpush3.bf16.msra.mxu1 %v8803_v2 }
 0xc8c   : > { %7681 = vmatprep.subr.bf16.mxu1 %v8804_v25 }
 0xc8d   : > { %6287 = vmatpush1.bf16.msra.mxu0 %v8745_v43 }
 0xc8e   : > { %6288 = vmatprep.subr.bf16.mxu0 %v8750_v49  ;;  %v8806_v49 = vld [vmem:[#allocation37] sm:$0xff]  }
 0xc8f   : > { %7682 = vmatpush3.bf16.msra.mxu1 %v8805_v28 }
 0xc90   : > { %7890 = vmatprep.subr.bf16.mxu1 %v9647_v7 }
 0xc91   : > { %6289 = vmatpush1.bf16.msra.mxu0 %v8748_v51  ;;  %v8807_v51 = vld [vmem:[#allocation37 + $0x8] sm:$0xff]  }
 0xc92   : > { %6290 = vmatprep.subr.bf16.mxu0 %v8753_v53  ;;  %v8809_v53 = vld [vmem:[#allocation37 + $0x18] sm:$0xff]  }
 0xc95   : > { %6291 = vmatpush1.bf16.msra.mxu0 %v8751_v54  ;;  %v8810_v54 = vld [vmem:[#allocation37 + $0x20] sm:$0xff]  }
 0xc96   : > { %6292 = vmatprep.subr.bf16.mxu0 %v8756_v56  ;;  %v8811_v56 = vld [vmem:[#allocation37 + $0x28] sm:$0xff]  }
 0xc99   : > { %6293 = vmatpush1.bf16.msra.mxu0 %v8754_v57  ;;  %v8812_v57 = vld [vmem:[#allocation37 + $0x30] sm:$0xff]  }
 0xc9a   : > { %6294 = vmatprep.subr.bf16.mxu0 %v8759_v52  ;;  %v8813_v52 = vld [vmem:[#allocation37 + $0x38] sm:$0xff]  }
 0xc9d   : > { %6295 = vmatpush1.bf16.msra.mxu0 %v8757_v40 }
 0xc9e   : > { %6296 = vmatprep.subr.bf16.mxu0 %v8762_v1 }
 0xca1   : > { %6297 = vmatpush1.bf16.msra.mxu0 %v8760_v44 }
 0xca2   : > { %6298 = vmatprep.subr.bf16.mxu0 %v8765_v50 }
 0xca5   : > { %6299 = vmatpush1.bf16.msra.mxu0 %v8763_v3 }
 0xca6   : > { %6300 = vmatprep.subr.bf16.mxu0 %v8768_v6  ;;  %v7576_v6 = vld [vmem:[#allocation34] ss:$0 sm:$0xff] }
 0xca9   : > { %6301 = vmatpush1.bf16.msra.mxu0 %v8766_v8 }
 0xcaa   : > { %6302 = vmatprep.subr.bf16.mxu0 %v8771_v9 }
 0xcad   : > { %6303 = vmatpush1.bf16.msra.mxu0 %v8769_v29 }
 0xcae   : > { %6304 = vmatprep.subr.bf16.mxu0 %v8774_v10 }
 0xcb1   : > { %6305 = vmatpush1.bf16.msra.mxu0 %v8772_v34 }
 0xcb2   : > { %6306 = vmatprep.subr.bf16.mxu0 %v8777_v11  ;;  %v7577_v11 = vld [vmem:[#allocation35] ss:$0 sm:$0xff] }
 0xcb5   : > { %6307 = vmatpush1.bf16.msra.mxu0 %v8775_v39 }
 0xcb6   : > { %6308 = vmatprep.subr.bf16.mxu0 %v8780_v12 }
 0xcb9   : > { %6309 = vmatpush1.bf16.msra.mxu0 %v8778_v13 }
 0xcba   : > { %6310 = vmatprep.subr.bf16.mxu0 %v8783_v14 }
 0xcbd   : > { %6311 = vmatpush1.bf16.msra.mxu0 %v8781_v60 }
 0xcbe   : > { %6312 = vmatprep.subr.bf16.mxu0 %v8786_v15  ;;  %v7586_v15 = vld [vmem:[#allocation38] ss:$0 sm:$0xff] }
 0xcc1   : > { %6313 = vmatpush1.bf16.msra.mxu0 %v8784_v16 }
 0xcc2   : > { %6314 = vmatprep.subr.bf16.mxu0 %v8789_v5 }
 0xcc5   : > { %6315 = vmatpush1.bf16.msra.mxu0 %v8787_v55 }
 0xcc8   : > { %6317 = vmatmul.mubr.bf16.vlgmr.msra.gmra.mrb[60].mxu0 %v5855_v38 }
 0xd9b   : > { %v6318_v21 = vpop.f32.mrb[60].mxu0 }
 0xd9c   : > { %vm6329_vm13 = vcmp.ge.f32.partialorder %v6318_v21, 0.0  ;;  %v6333_v23 = vmul.f32 0.2, %v6318_v21  ;;  %v6320_v24 = vpop.f32.mrb[61].mxu0 }
 0xd9d   : > { %vm6330_vm14 = vcmp.ge.f32.partialorder %v6320_v24, 0.0  ;;  %v6334_v61 = vmul.f32 0.2, %v6320_v24  ;;  %v6322_v26 = vpop.f32.mrb[62].mxu0 }
 0xd9e   : > { %v6337_v27 = vsel %vm6329_vm13, %v6318_v21, %v6333_v23  ;;  %vm6331_vm8 = vcmp.ge.f32.partialorder %v6322_v26, 0.0  ;;  %v6335_v30 = vmul.f32 0.2, %v6322_v26  ;;  %v6324_v31 = vpop.f32.mrb[63].mxu0 }
 0xd9f   : > { %v6352_v62 = vmul.f32 %v6345_v20, %v6337_v27  ;;  %v6338_v32 = vsel %vm6330_vm14, %v6320_v24, %v6334_v61  ;;  %vm6332_vm15 = vcmp.ge.f32.partialorder %v6324_v31, 0.0  ;;  %v6336_v33 = vmul.f32 0.2, %v6324_v31 }
 0xda0   : > { %v6353_v0 = vmul.f32 %v6349_v58, %v6338_v32  ;;  %v6339_v36 = vsel %vm6331_vm8, %v6322_v26, %v6335_v30 }
 0xda1   : > { %v6354_v38 = vmul.f32 %v6345_v20, %v6339_v36  ;;  %v6340_v41 = vsel %vm6332_vm15, %v6324_v31, %v6336_v33  ;;  %v6367_v45 = vadd.f32 %v6360_v59, %v6352_v62 }
 0xda2   : > { %v6355_v42 = vmul.f32 %v6349_v58, %v6340_v41  ;;  %v6368_v48 = vadd.f32 %v6364_v37, %v6353_v0 }
 0xda3   : > { %v6369_v46 = vadd.f32 %v6360_v59, %v6354_v38 }
 0xda4   : > { %v6370_v47 = vadd.f32 %v6364_v37, %v6355_v42 }
 0xda5   : > { %v6371_v43 = vpack.c.bf16 %v6369_v46, %v6367_v45 }
 0xda6   : > { %v6372_v63 = vpack.c.bf16 %v6370_v47, %v6368_v48 }
 0xda8   : > { %6533 = vmatprep.mubr.bf16.mxu1 %v6372_v63 }
 0xda9   : > { %6534 = vmatmul.mubr.bf16.vlgmr.msra.gmra.mrb[36].mxu1 %v6371_v43 }
 0xdaa   : > { %7891 = vmatpush3.bf16.msra.mxu1 %v8806_v49  ;;  %7906 = vmatprep.mubr.msk.bf16.mxu1 %vm9648_vm3, %v9647_v7 }
 0xdab   : > { %7892 = vmatprep.subr.bf16.mxu1 %v9647_v7 }
 0xdae   : > { %7893 = vmatpush3.bf16.msra.mxu1 %v8807_v51 }
 0xdaf   : > { %7894 = vmatprep.subr.bf16.mxu1 %v9647_v7 }
 0xdb2   : > { %7895 = vmatpush3.bf16.msra.mxu1 %v8808_v4 }
 0xdb3   : > { %7896 = vmatprep.subr.bf16.mxu1 %v9647_v7 }
 0xdb6   : > { %7897 = vmatpush3.bf16.msra.mxu1 %v8809_v53 }
 0xdb7   : > { %7898 = vmatprep.subr.bf16.mxu1 %v9647_v7 }
 0xdba   : > { %7899 = vmatpush3.bf16.msra.mxu1 %v8810_v54 }
 0xdbb   : > { %7900 = vmatprep.subr.bf16.mxu1 %v9647_v7 }
 0xdbe   : > { %7901 = vmatpush3.bf16.msra.mxu1 %v8811_v56 }
 0xdbf   : > { %7902 = vmatprep.subr.bf16.mxu1 %v9647_v7 }
 0xdc2   : > { %7903 = vmatpush3.bf16.msra.mxu1 %v8812_v57 }
 0xdc3   : > { %7904 = vmatprep.subr.bf16.mxu1 %v9647_v7 }
 0xdc6   : > { %7905 = vmatpush3.bf16.msra.mxu1 %v8813_v52 }
 0xe7c   : > { %v7683_v40 = vpop.f32.mrb[36].mxu1 }
 0xe7d   : > { %v7684_v1 = vpop.f32.mrb[37].mxu1 }
 0xe7e   : > { %v7685_v44 = vadd.f32 %v7684_v1, %v7683_v40  ;;  %v7686_v50 = vpop.f32.mrb[38].mxu1 }
 0xe7f   : > { %v7687_v3 = vpop.f32.mrb[39].mxu1 }
 0xe80   : > { %vm6544_vm3 = vcmp.ge.f32.partialorder %v7685_v44, 0.0  ;;  %v6546_v8 = vmul.f32 0.2, %v7685_v44  ;;  %v7688_v9 = vadd.f32 %v7687_v3, %v7686_v50 }
 0xe82   : > { %v6548_v29 = vsel %vm6544_vm3, %v7685_v44, %v6546_v8  ;;  %vm6545_vm1 = vcmp.ge.f32.partialorder %v7688_v9, 0.0  ;;  %v6547_v10 = vmul.f32 0.2, %v7688_v9 }
 0xe83   : > { %v6556_v34 = vmul.f32 %v7576_v6, %v6548_v29 }
 0xe84   : > { %v6549_v39 = vsel %vm6545_vm1, %v7688_v9, %v6547_v10 }
 0xe85   : > { %v6557_v12 = vmul.f32 %v7576_v6, %v6549_v39  ;;  %v6564_v7 = vadd.f32 %v7577_v11, %v6556_v34 }
 0xe87   : > { %v6565_v13 = vadd.f32 %v7577_v11, %v6557_v12 }
 0xe89   : > { %v6566_v14 = vpack.c.bf16 %v6565_v13, %v6564_v7 }
 0xe8b   : > { %7907 = vmatmul.mubr.bf16.vlgmr.msra.gmra.mrb[40].mxu1 %v6566_v14 }
 0xf5e   : > { %v6665_v60 = vpop.f32.mrb[40].mxu1 }
 0xf5f   : > { %vm6674_vm2 = vcmp.ge.f32.partialorder %v6665_v60, 0.0  ;;  %v6676_v16 = vmul.f32 0.2, %v6665_v60  ;;  %v7908_v5 = vpop.f32.mrb[41].mxu1 }
 0xf60   : > { %v6668_v55 = vpop.f32.mrb[42].mxu1 }
 0xf61   : > { %v6678_v18 = vsel %vm6674_vm2, %v6665_v60, %v6676_v16  ;;  %vm6675_vm4 = vcmp.ge.f32.partialorder %v6668_v55, 0.0  ;;  %v6677_v19 = vmul.f32 0.2, %v6668_v55  ;;  %v7909_v2 = vpop.f32.mrb[43].mxu1 }
 0xf62   : > { %v6686_v25 = vmul.f32 %v7586_v15, %v6678_v18 }
 0xf63   : > { %v6679_v28 = vsel %vm6675_vm4, %v6668_v55, %v6677_v19 }
 0xf64   : > { %v6694_v35 = vadd.f32 %v7587_v17, %v6686_v25  ;;  %v6687_v21 = vmul.f32 %v7586_v15, %v6679_v28 }
 0xf66   : > { %6696 = vst [vmem:[%s1603_s15] sm:$0xff] %v6694_v35  ;;  %v6695_v22 = vadd.f32 %v7587_v17, %v6687_v21 }
 0xf68   : > { %6697 = vst [vmem:[%s1603_s15 + $0x8] sm:$0xff] %v6695_v22 }
 0xf69 PF: > { %s10818_s7 = sld [smem:[#allocation85_spill]] }
 0xf6f   : > { %s106_s7 = sadd.s32 1, %s10818_s7  }
 0xf70   : > { %p103_p6 = scmp.ge.s32.totalorder %s106_s7, 4  }
 0xf72   :  { %105 = sbr.rel (!%p103_p6) target bundleno = 88 (0x58), region = 376 }
 0xf79   :  { %6719 = vsyncpa [#allocation4], 1 }
 0xf7a   :  { %6721 = vsyncpa [#allocation4 + $0x1], 1 }
 0xf7b   :  { %6722 = vsyncpa [#allocation6], 1 }
 0xf7c   :  { %6723 = vsyncpa [#allocation9], 1 }
 0xf7d   :  { %6724 = vsyncpa [#allocation12], 1 }
 0xf7e   :  { %6725 = vsyncpa [#allocation15], 1 }
 0xf7f   :  { %6726 = vsyncpa [#allocation18], 1 }
 0xf80   :  { %6727 = vsyncpa [#allocation21], 1 }
 0xf81   :  { %6728 = vsyncpa [#allocation24], 1 }
 0xf82   :  { %6729 = vsyncpa [#allocation27], 1 }
 0xf83   :  { %6730 = vsyncpa [#allocation30], 1 }
 0xf84   :  { %6731 = vsyncpa [#allocation33], 1 }
 0xf85   :  { %6732 = vsyncpa [#allocation36], 1 }
 0xf86   :  { %6733 = vsyncpa [#allocation39], 1 }

</bundles_post_ra>
